<compile_context>
chip_gen: v6e
topology: v6e:2x2x1
jax: 0.10.0
libtpu: 0.0.40
codegen_flags: <defaults>
</compile_context>

<pallas_src>
import numpy as np
import jax
import jax.numpy as jnp
from jax.experimental import pallas as pl
from jax.experimental.pallas import tpu as pltpu


# ------------------------------ fused kernel --------------------------------

def _dappm_kernel(x_ref,
                  mpt1_ref, mpt2_ref, mpt3_ref, mpt4_ref,
                  u1_ref, u2_ref, u3_ref, u4_ref,
                  g_ref,
                  ss_ref, sb_ref, ws_ref,
                  ps_ref, pb_ref, wp_ref,
                  cs_ref, cb_ref, wc_ref,
                  hs_ref, hb_ref, wh_ref,
                  o_ref):
    f32, bf16 = jnp.float32, jnp.bfloat16

    x = x_ref[0]                                        # (cin, HW) f32
    xb = x.astype(bf16)

    # shortcut: Wsh @ relu(BNsh(x))  -> running accumulator (cout, HW)
    hsc = jnp.maximum(x * hs_ref[...] + hb_ref[...], 0.0)
    acc = jnp.dot(wh_ref[...], hsc.astype(bf16), preferred_element_type=f32)

    # scale0: W0 @ relu(BN0(x))
    h0 = jnp.maximum(x * ss_ref[0] + sb_ref[0], 0.0)
    y = jnp.dot(ws_ref[0], h0.astype(bf16), preferred_element_type=f32)    # (bp, HW)

    # compression chunk 0 (fold the 1x1 over the virtual concat on the fly)
    hc = jnp.maximum(y * cs_ref[0] + cb_ref[0], 0.0)
    acc = acc + jnp.dot(wc_ref[0], hc.astype(bf16), preferred_element_type=f32)

    mpts = (mpt1_ref, mpt2_ref, mpt3_ref, mpt4_ref)
    ups = (u1_ref, u2_ref, u3_ref, u4_ref)

    for lvl in range(4):
        # scale_{lvl+1}: avg-pool (matmul) -> BN -> ReLU -> 1x1 conv -> bilinear up (matmul)
        pooled = jnp.dot(xb, mpts[lvl][...], preferred_element_type=f32)       # (cin, P)
        hp = jnp.maximum(pooled * ss_ref[lvl + 1] + sb_ref[lvl + 1], 0.0)
        z = jnp.dot(ws_ref[lvl + 1], hp.astype(bf16),
                    preferred_element_type=f32)                                # (bp, P)
        up = jnp.dot(z.astype(bf16), ups[lvl][...],
                     preferred_element_type=f32)                               # (bp, HW)

        # process_{lvl+1}: BN -> ReLU -> 3x3 conv (padding=1)
        t = jnp.maximum((up + y) * ps_ref[lvl] + pb_ref[lvl], 0.0)
        tb = t.astype(bf16)
        # horizontally shifted copies (dx = -1, 0, +1); row-boundary zeros are baked
        # into the shift matrices g_ref[0]/g_ref[1]
        th = (jnp.dot(tb, g_ref[0], preferred_element_type=f32).astype(bf16),
              tb,
              jnp.dot(tb, g_ref[1], preferred_element_type=f32).astype(bf16))
        rows = []
        for dy in range(3):
            r = jnp.dot(wp_ref[lvl * 9 + dy * 3 + 0], th[0], preferred_element_type=f32)
            r = r + jnp.dot(wp_ref[lvl * 9 + dy * 3 + 1], th[1], preferred_element_type=f32)
            r = r + jnp.dot(wp_ref[lvl * 9 + dy * 3 + 2], th[2], preferred_element_type=f32)
            rows.append(r)
        # vertical shifts (dy = -1, +1) via g_ref[2]/g_ref[3]
        y = (rows[1]
             + jnp.dot(rows[0].astype(bf16), g_ref[2], preferred_element_type=f32)
             + jnp.dot(rows[2].astype(bf16), g_ref[3], preferred_element_type=f32))

        hc = jnp.maximum(y * cs_ref[lvl + 1] + cb_ref[lvl + 1], 0.0)
        acc = acc + jnp.dot(wc_ref[lvl + 1], hc.astype(bf16), preferred_element_type=f32)

    o_ref[0] = acc


# ------------------- structural matrices (NumPy glue, tiny) ------------------

def _sum_matrix(n, k, s, p):
    out = (n + 2 * p - k) // s + 1
    m = np.zeros((out, n), np.float32)
    for i in range(out):
        for t in range(k):
            j = i * s - p + t
            if 0 <= j < n:
                m[i, j] = 1.0
    return m


def _bilinear_matrix(in_size, out_size):
    # F.interpolate(mode='bilinear', align_corners=False) along one axis: (out, in).
    m = np.zeros((out_size, in_size), np.float32)
    if in_size == 1:
        m[:, 0] = 1.0
        return m
    scale = in_size / out_size
    for i in range(out_size):
        src = max((i + 0.5) * scale - 0.5, 0.0)
        i0 = min(int(np.floor(src)), in_size - 1)
        i1 = min(i0 + 1, in_size - 1)
        lam = src - i0
        m[i, i0] += 1.0 - lam
        m[i, i1] += lam
    return m


def build_spatial_constants(h, w):
    """Pool/upsample matmul matrices (channel-major: X(C,HW) @ M) and the 4
    kron-factored 3x3-conv shift matrices."""
    hw = h * w
    pools = [((3, 5), (1, 2), (1, 2)),
             ((5, 9), (2, 4), (2, 4)),
             ((9, 17), (4, 8), (4, 8))]
    mp_list, up_list = [], []
    for k, s, p in pools:
        mh = _sum_matrix(h, k[0], s[0], p[0])                 # (Ho, h)
        mw = _sum_matrix(w, k[1], s[1], p[1])                 # (Wo, w)
        mpool = np.kron(mh, mw) / float(k[0] * k[1])          # (P, HW) count_include_pad
        bh = _bilinear_matrix(mh.shape[0], h)                 # (h, Ho)
        bw = _bilinear_matrix(mw.shape[0], w)                 # (w, Wo)
        up = np.kron(bh, bw)                                  # (HW, P)
        P = mpool.shape[0]
        Pp = ((P + 7) // 8) * 8                               # sublane-pad P
        mpt = np.zeros((hw, Pp), np.float32); mpt[:, :P] = mpool.T
        u = np.zeros((Pp, hw), np.float32);  u[:P, :] = up.T  # zero rows kill padded lanes
        mp_list.append(jnp.asarray(mpt, jnp.bfloat16))
        up_list.append(jnp.asarray(u, jnp.bfloat16))
    # scale4: AdaptiveAvgPool2d((1,1)); bilinear upsample of a 1x1 map == broadcast.
    mpt4 = np.zeros((hw, 8), np.float32); mpt4[:, 0] = 1.0 / hw
    u4 = np.zeros((8, hw), np.float32);   u4[0, :] = 1.0
    mp_list.append(jnp.asarray(mpt4, jnp.bfloat16))
    up_list.append(jnp.asarray(u4, jnp.bfloat16))

    # shift matrices (right-multiply a (C, HW) tile):
    #   g[0]: dx=-1, g[1]: dx=+1 (zero at row boundaries)
    #   g[2]: dy=-1, g[3]: dy=+1 (zero at top/bottom)
    g = np.zeros((4, hw, hw), np.float32)
    for p in range(hw):
        y, x = divmod(p, w)
        if x - 1 >= 0:
            g[0, p - 1, p] = 1.0
        if x + 1 < w:
            g[1, p + 1, p] = 1.0
        if y - 1 >= 0:
            g[2, p - w, p] = 1.0
        if y + 1 < h:
            g[3, p + w, p] = 1.0
    return mp_list, up_list, jnp.asarray(g, jnp.bfloat16)


# ------------------------------ parameters ----------------------------------

def make_params(key, cin, bp, cout):
    keys = iter(jax.random.split(key, 40))

    def bn(c):
        k1, k2, k3, k4 = jax.random.split(next(keys), 4)
        gamma = jax.random.uniform(k1, (c,), jnp.float32, 0.5, 1.5)
        beta = 0.1 * jax.random.normal(k2, (c,), jnp.float32)
        mean = 0.1 * jax.random.normal(k3, (c,), jnp.float32)
        var = jax.random.uniform(k4, (c,), jnp.float32, 0.5, 1.5)
        scale = gamma / jnp.sqrt(var + 1e-5)
        bias = beta - mean * scale
        return scale.reshape(c, 1), bias.reshape(c, 1)        # per-channel, channel-major

    def conv1(ci, co):
        wgt = 0.05 * jax.random.normal(next(keys), (co, ci), jnp.float32)
        return wgt.astype(jnp.bfloat16)                       # left-multiplies (ci, HW)

    def conv3(ci, co):
        wgt = 0.05 * jax.random.normal(next(keys), (co, ci, 3, 3), jnp.float32)
        return jnp.transpose(wgt, (2, 3, 0, 1)).reshape(9, co, ci).astype(jnp.bfloat16)

    p = {}
    sc_s, sc_b = zip(*[bn(cin) for _ in range(5)])             # scale0..scale4 BN
    p['s_scale'] = jnp.stack(sc_s)                             # (5, cin, 1)
    p['b_scale'] = jnp.stack(sc_b)
    p['w_scale'] = jnp.stack([conv1(cin, bp) for _ in range(5)])      # (5, bp, cin)
    pr_s, pr_b = zip(*[bn(bp) for _ in range(4)])              # process1..4 BN
    p['s_proc'] = jnp.stack(pr_s)                              # (4, bp, 1)
    p['b_proc'] = jnp.stack(pr_b)
    p['w_proc'] = jnp.concatenate([conv3(bp, bp) for _ in range(4)], axis=0)  # (36, bp, bp)
    cs, cb = bn(5 * bp)                                        # compression BN, split per branch
    p['s_comp'] = cs.reshape(5, bp, 1)
    p['b_comp'] = cb.reshape(5, bp, 1)
    wcomp = 0.05 * jax.random.normal(next(keys), (cout, 5 * bp), jnp.float32)
    p['w_comp'] = jnp.transpose(wcomp.reshape(cout, 5, bp), (1, 0, 2)).astype(jnp.bfloat16)
    p['s_short'], p['b_short'] = bn(cin)                       # (cin, 1)
    p['w_short'] = conv1(cin, cout)                            # (cout, cin)
    return p


# ------------------------------- forward ------------------------------------

def _const_spec(a):
    zero = (0,) * a.ndim
    return pl.BlockSpec(a.shape, lambda i: zero)


def dappm_forward(x, params, consts):
    mpts, ups, g = consts
    n, cin, h, w = x.shape
    hw = h * w
    bp = params['w_scale'].shape[1]
    cout = params['w_short'].shape[0]

    x3 = x.reshape(n, cin, hw)                 # free: NCHW -> channel-major (C, HW)

    in_specs = ([pl.BlockSpec((1, cin, hw), lambda i: (i, 0, 0))]
                + [_const_spec(m) for m in mpts]
                + [_const_spec(u) for u in ups]
                + [_const_spec(g)]
                + [_const_spec(params[k]) for k in
                   ('s_scale', 'b_scale', 'w_scale',
                    's_proc', 'b_proc', 'w_proc',
                    's_comp', 'b_comp', 'w_comp',
                    's_short', 'b_short', 'w_short')])

    out3 = pl.pallas_call(
        _dappm_kernel,
        out_shape=jax.ShapeDtypeStruct((n, cout, hw), jnp.float32),
        grid=(n,),
        in_specs=in_specs,
        out_specs=pl.BlockSpec((1, cout, hw), lambda i: (i, 0, 0)),
        compiler_params=pltpu.CompilerParams(
            dimension_semantics=("parallel",),
            vmem_limit_bytes=32 * 1024 * 1024),
    )(x3, *mpts, *ups, g,
      params['s_scale'], params['b_scale'], params['w_scale'],
      params['s_proc'], params['b_proc'], params['w_proc'],
      params['s_comp'], params['b_comp'], params['w_comp'],
      params['s_short'], params['b_short'], params['w_short'])

    return out3.reshape(n, cout, h, w)         # free: channel-major -> NCHW


# ------------------------- pure-JAX f32 reference ----------------------------

def dappm_reference(x, params, consts):
    mpts, ups, g = consts
    n, cin, h, w = x.shape
    hw = h * w
    f32 = jnp.float32
    x3 = x.reshape(n, cin, hw).astype(f32)
    mpts = [m.astype(f32) for m in mpts]
    ups = [u.astype(f32) for u in ups]
    g = g.astype(f32)
    ss, sb = params['s_scale'].astype(f32), params['b_scale'].astype(f32)
    ws = params['w_scale'].astype(f32)
    ps, pb = params['s_proc'].astype(f32), params['b_proc'].astype(f32)
    wp = params['w_proc'].astype(f32)
    cs, cb = params['s_comp'].astype(f32), params['b_comp'].astype(f32)
    wc = params['w_comp'].astype(f32)
    hs, hb = params['s_short'].astype(f32), params['b_short'].astype(f32)
    wh = params['w_short'].astype(f32)
    cout = wh.shape[0]

    def one(xi):
        acc = wh @ jnp.maximum(xi * hs + hb, 0.0)
        y = ws[0] @ jnp.maximum(xi * ss[0] + sb[0], 0.0)
        acc = acc + wc[0] @ jnp.maximum(y * cs[0] + cb[0], 0.0)
        for lvl in range(4):
            pooled = xi @ mpts[lvl]
            z = ws[lvl + 1] @ jnp.maximum(pooled * ss[lvl + 1] + sb[lvl + 1], 0.0)
            t = jnp.maximum((z @ ups[lvl] + y) * ps[lvl] + pb[lvl], 0.0)
            th = (t @ g[0], t, t @ g[1])
            rows = [sum(wp[lvl * 9 + dy * 3 + dx] @ th[dx] for dx in range(3))
                    for dy in range(3)]
            y = rows[1] + rows[0] @ g[2] + rows[2] @ g[3]
            acc = acc + wc[lvl + 1] @ jnp.maximum(y * cs[lvl + 1] + cb[lvl + 1], 0.0)
        return acc

    return jax.vmap(one)(x3).reshape(n, cout, h, w)


# --------------------------------- main --------------------------------------

if __name__ == "__main__":
    key = jax.random.PRNGKey(0)
    kx, kp = jax.random.split(key)

    N, CIN, BP, COUT, H, W = 2, 16, 16, 32, 16, 16
    x = jax.random.normal(kx, (N, CIN, H, W), jnp.float32)
    params = make_params(kp, CIN, BP, COUT)
    consts = build_spatial_constants(H, W)

    fwd = jax.jit(dappm_forward)
    out = jax.block_until_ready(fwd(x, params, consts))

    assert out.shape == (N, COUT, H, W), out.shape
    assert bool(jnp.all(jnp.isfinite(out)))

    ref = dappm_reference(x, params, consts)
    np.testing.assert_allclose(np.asarray(out), np.asarray(ref), rtol=0.1, atol=0.1)

    print("KERNEL_OK")
</pallas_src>

<mosaic_0001>
module attributes {stable_mosaic.version = 11 : i64} {
  func.func @_dappm_kernel(%arg0: i32, %arg1: memref<1x16x256xf32, #tpu.memory_space<vmem>>, %arg2: memref<256x128xbf16, #tpu.memory_space<vmem>>, %arg3: memref<256x32xbf16, #tpu.memory_space<vmem>>, %arg4: memref<256x8xbf16, #tpu.memory_space<vmem>>, %arg5: memref<256x8xbf16, #tpu.memory_space<vmem>>, %arg6: memref<128x256xbf16, #tpu.memory_space<vmem>>, %arg7: memref<32x256xbf16, #tpu.memory_space<vmem>>, %arg8: memref<8x256xbf16, #tpu.memory_space<vmem>>, %arg9: memref<8x256xbf16, #tpu.memory_space<vmem>>, %arg10: memref<4x256x256xbf16, #tpu.memory_space<vmem>>, %arg11: memref<5x16x1xf32, #tpu.memory_space<vmem>>, %arg12: memref<5x16x1xf32, #tpu.memory_space<vmem>>, %arg13: memref<5x16x16xbf16, #tpu.memory_space<vmem>>, %arg14: memref<4x16x1xf32, #tpu.memory_space<vmem>>, %arg15: memref<4x16x1xf32, #tpu.memory_space<vmem>>, %arg16: memref<36x16x16xbf16, #tpu.memory_space<vmem>>, %arg17: memref<5x16x1xf32, #tpu.memory_space<vmem>>, %arg18: memref<5x16x1xf32, #tpu.memory_space<vmem>>, %arg19: memref<5x32x16xbf16, #tpu.memory_space<vmem>>, %arg20: memref<16x1xf32, #tpu.memory_space<vmem>>, %arg21: memref<16x1xf32, #tpu.memory_space<vmem>>, %arg22: memref<32x16xbf16, #tpu.memory_space<vmem>>, %arg23: memref<1x32x256xf32, #tpu.memory_space<vmem>>) attributes {dimension_semantics = [#tpu.dimension_semantics<parallel>], iteration_bounds = array<i64: 2>, scalar_prefetch = 0 : i64, scratch_operands = 0 : i64, tpu.core_type = #tpu.core_type<tc>, window_params = [{transform_indices = @transform_0, window_bounds = array<i64: 1, 16, 256>}, {pipeline_mode = #tpu.pipeline_mode<synchronous>, transform_indices = @transform_1, window_bounds = array<i64: 256, 128>}, {pipeline_mode = #tpu.pipeline_mode<synchronous>, transform_indices = @transform_2, window_bounds = array<i64: 256, 32>}, {pipeline_mode = #tpu.pipeline_mode<synchronous>, transform_indices = @transform_3, window_bounds = array<i64: 256, 8>}, {pipeline_mode = #tpu.pipeline_mode<synchronous>, transform_indices = @transform_4, window_bounds = array<i64: 256, 8>}, {pipeline_mode = #tpu.pipeline_mode<synchronous>, transform_indices = @transform_5, window_bounds = array<i64: 128, 256>}, {pipeline_mode = #tpu.pipeline_mode<synchronous>, transform_indices = @transform_6, window_bounds = array<i64: 32, 256>}, {pipeline_mode = #tpu.pipeline_mode<synchronous>, transform_indices = @transform_7, window_bounds = array<i64: 8, 256>}, {pipeline_mode = #tpu.pipeline_mode<synchronous>, transform_indices = @transform_8, window_bounds = array<i64: 8, 256>}, {pipeline_mode = #tpu.pipeline_mode<synchronous>, transform_indices = @transform_9, window_bounds = array<i64: 4, 256, 256>}, {pipeline_mode = #tpu.pipeline_mode<synchronous>, transform_indices = @transform_10, window_bounds = array<i64: 5, 16, 1>}, {pipeline_mode = #tpu.pipeline_mode<synchronous>, transform_indices = @transform_11, window_bounds = array<i64: 5, 16, 1>}, {pipeline_mode = #tpu.pipeline_mode<synchronous>, transform_indices = @transform_12, window_bounds = array<i64: 5, 16, 16>}, {pipeline_mode = #tpu.pipeline_mode<synchronous>, transform_indices = @transform_13, window_bounds = array<i64: 4, 16, 1>}, {pipeline_mode = #tpu.pipeline_mode<synchronous>, transform_indices = @transform_14, window_bounds = array<i64: 4, 16, 1>}, {pipeline_mode = #tpu.pipeline_mode<synchronous>, transform_indices = @transform_15, window_bounds = array<i64: 36, 16, 16>}, {pipeline_mode = #tpu.pipeline_mode<synchronous>, transform_indices = @transform_16, window_bounds = array<i64: 5, 16, 1>}, {pipeline_mode = #tpu.pipeline_mode<synchronous>, transform_indices = @transform_17, window_bounds = array<i64: 5, 16, 1>}, {pipeline_mode = #tpu.pipeline_mode<synchronous>, transform_indices = @transform_18, window_bounds = array<i64: 5, 32, 16>}, {pipeline_mode = #tpu.pipeline_mode<synchronous>, transform_indices = @transform_19, window_bounds = array<i64: 16, 1>}, {pipeline_mode = #tpu.pipeline_mode<synchronous>, transform_indices = @transform_20, window_bounds = array<i64: 16, 1>}, {pipeline_mode = #tpu.pipeline_mode<synchronous>, transform_indices = @transform_21, window_bounds = array<i64: 32, 16>}, {transform_indices = @transform_22, window_bounds = array<i64: 1, 32, 256>}]} {
    %c0 = arith.constant 0 : index
    %c0_0 = arith.constant 0 : index
    %c0_1 = arith.constant 0 : index
    %0 = vector.load %arg1[%c0, %c0_0, %c0_1] : memref<1x16x256xf32, #tpu.memory_space<vmem>>, vector<1x16x256xf32>
    %1 = vector.shape_cast %0 : vector<1x16x256xf32> to vector<16x256xf32>
    %2 = arith.truncf %1 : vector<16x256xf32> to vector<16x256xbf16>
    %c0_2 = arith.constant 0 : index
    %c0_3 = arith.constant 0 : index
    %3 = vector.load %arg20[%c0_2, %c0_3] : memref<16x1xf32, #tpu.memory_space<vmem>>, vector<16x1xf32>
    %4 = vector.broadcast %3 : vector<16x1xf32> to vector<16x256xf32>
    %5 = arith.mulf %1, %4 : vector<16x256xf32>
    %c0_4 = arith.constant 0 : index
    %c0_5 = arith.constant 0 : index
    %6 = vector.load %arg21[%c0_4, %c0_5] : memref<16x1xf32, #tpu.memory_space<vmem>>, vector<16x1xf32>
    %7 = vector.broadcast %6 : vector<16x1xf32> to vector<16x256xf32>
    %8 = arith.addf %5, %7 : vector<16x256xf32>
    %cst = arith.constant 0.000000e+00 : f32
    %9 = vector.broadcast %cst : f32 to vector<16x256xf32>
    %10 = arith.maximumf %8, %9 : vector<16x256xf32>
    %c0_6 = arith.constant 0 : index
    %c0_7 = arith.constant 0 : index
    %11 = vector.load %arg22[%c0_6, %c0_7] : memref<32x16xbf16, #tpu.memory_space<vmem>>, vector<32x16xbf16>
    %12 = arith.truncf %10 : vector<16x256xf32> to vector<16x256xbf16>
    %cst_8 = arith.constant dense<0.000000e+00> : vector<32x256xf32>
    %13 = tpu.matmul %11, %12, %cst_8 {dimension_numbers = #tpu.dot_dimension_numbers<[1], [0], [0], [1], [0, 0, 1, 1], [], []>} : vector<32x16xbf16>, vector<16x256xbf16>, vector<32x256xf32> -> vector<32x256xf32>
    %c0_9 = arith.constant 0 : index
    %c0_10 = arith.constant 0 : index
    %c0_11 = arith.constant 0 : index
    %14 = vector.load %arg11[%c0_9, %c0_10, %c0_11] : memref<5x16x1xf32, #tpu.memory_space<vmem>>, vector<1x16x1xf32>
    %15 = vector.shape_cast %14 : vector<1x16x1xf32> to vector<16x1xf32>
    %16 = vector.broadcast %15 : vector<16x1xf32> to vector<16x256xf32>
    %17 = arith.mulf %1, %16 : vector<16x256xf32>
    %c0_12 = arith.constant 0 : index
    %c0_13 = arith.constant 0 : index
    %c0_14 = arith.constant 0 : index
    %18 = vector.load %arg12[%c0_12, %c0_13, %c0_14] : memref<5x16x1xf32, #tpu.memory_space<vmem>>, vector<1x16x1xf32>
    %19 = vector.shape_cast %18 : vector<1x16x1xf32> to vector<16x1xf32>
    %20 = vector.broadcast %19 : vector<16x1xf32> to vector<16x256xf32>
    %21 = arith.addf %17, %20 : vector<16x256xf32>
    %cst_15 = arith.constant 0.000000e+00 : f32
    %22 = vector.broadcast %cst_15 : f32 to vector<16x256xf32>
    %23 = arith.maximumf %21, %22 : vector<16x256xf32>
    %c0_16 = arith.constant 0 : index
    %c0_17 = arith.constant 0 : index
    %c0_18 = arith.constant 0 : index
    %24 = vector.load %arg13[%c0_16, %c0_17, %c0_18] : memref<5x16x16xbf16, #tpu.memory_space<vmem>>, vector<1x16x16xbf16>
    %25 = vector.shape_cast %24 : vector<1x16x16xbf16> to vector<16x16xbf16>
    %26 = arith.truncf %23 : vector<16x256xf32> to vector<16x256xbf16>
    %cst_19 = arith.constant dense<0.000000e+00> : vector<16x256xf32>
    %27 = tpu.matmul %25, %26, %cst_19 {dimension_numbers = #tpu.dot_dimension_numbers<[1], [0], [0], [1], [0, 0, 1, 1], [], []>} : vector<16x16xbf16>, vector<16x256xbf16>, vector<16x256xf32> -> vector<16x256xf32>
    %c0_20 = arith.constant 0 : index
    %c0_21 = arith.constant 0 : index
    %c0_22 = arith.constant 0 : index
    %28 = vector.load %arg17[%c0_20, %c0_21, %c0_22] : memref<5x16x1xf32, #tpu.memory_space<vmem>>, vector<1x16x1xf32>
    %29 = vector.shape_cast %28 : vector<1x16x1xf32> to vector<16x1xf32>
    %30 = vector.broadcast %29 : vector<16x1xf32> to vector<16x256xf32>
    %31 = arith.mulf %27, %30 : vector<16x256xf32>
    %c0_23 = arith.constant 0 : index
    %c0_24 = arith.constant 0 : index
    %c0_25 = arith.constant 0 : index
    %32 = vector.load %arg18[%c0_23, %c0_24, %c0_25] : memref<5x16x1xf32, #tpu.memory_space<vmem>>, vector<1x16x1xf32>
    %33 = vector.shape_cast %32 : vector<1x16x1xf32> to vector<16x1xf32>
    %34 = vector.broadcast %33 : vector<16x1xf32> to vector<16x256xf32>
    %35 = arith.addf %31, %34 : vector<16x256xf32>
    %cst_26 = arith.constant 0.000000e+00 : f32
    %36 = vector.broadcast %cst_26 : f32 to vector<16x256xf32>
    %37 = arith.maximumf %35, %36 : vector<16x256xf32>
    %c0_27 = arith.constant 0 : index
    %c0_28 = arith.constant 0 : index
    %c0_29 = arith.constant 0 : index
    %38 = vector.load %arg19[%c0_27, %c0_28, %c0_29] : memref<5x32x16xbf16, #tpu.memory_space<vmem>>, vector<1x32x16xbf16>
    %39 = vector.shape_cast %38 : vector<1x32x16xbf16> to vector<32x16xbf16>
    %40 = arith.truncf %37 : vector<16x256xf32> to vector<16x256xbf16>
    %cst_30 = arith.constant dense<0.000000e+00> : vector<32x256xf32>
    %41 = tpu.matmul %39, %40, %cst_30 {dimension_numbers = #tpu.dot_dimension_numbers<[1], [0], [0], [1], [0, 0, 1, 1], [], []>} : vector<32x16xbf16>, vector<16x256xbf16>, vector<32x256xf32> -> vector<32x256xf32>
    %42 = arith.addf %13, %41 : vector<32x256xf32>
    %c0_31 = arith.constant 0 : index
    %c0_32 = arith.constant 0 : index
    %43 = vector.load %arg2[%c0_31, %c0_32] : memref<256x128xbf16, #tpu.memory_space<vmem>>, vector<256x128xbf16>
    %cst_33 = arith.constant dense<0.000000e+00> : vector<16x128xf32>
    %44 = tpu.matmul %2, %43, %cst_33 {dimension_numbers = #tpu.dot_dimension_numbers<[1], [0], [0], [1], [0, 0, 1, 1], [], []>} : vector<16x256xbf16>, vector<256x128xbf16>, vector<16x128xf32> -> vector<16x128xf32>
    %c1 = arith.constant 1 : index
    %c0_34 = arith.constant 0 : index
    %c0_35 = arith.constant 0 : index
    %45 = vector.load %arg11[%c1, %c0_34, %c0_35] : memref<5x16x1xf32, #tpu.memory_space<vmem>>, vector<1x16x1xf32>
    %46 = vector.shape_cast %45 : vector<1x16x1xf32> to vector<16x1xf32>
    %47 = vector.broadcast %46 : vector<16x1xf32> to vector<16x128xf32>
    %48 = arith.mulf %44, %47 : vector<16x128xf32>
    %c1_36 = arith.constant 1 : index
    %c0_37 = arith.constant 0 : index
    %c0_38 = arith.constant 0 : index
    %49 = vector.load %arg12[%c1_36, %c0_37, %c0_38] : memref<5x16x1xf32, #tpu.memory_space<vmem>>, vector<1x16x1xf32>
    %50 = vector.shape_cast %49 : vector<1x16x1xf32> to vector<16x1xf32>
    %51 = vector.broadcast %50 : vector<16x1xf32> to vector<16x128xf32>
    %52 = arith.addf %48, %51 : vector<16x128xf32>
    %cst_39 = arith.constant 0.000000e+00 : f32
    %53 = vector.broadcast %cst_39 : f32 to vector<16x128xf32>
    %54 = arith.maximumf %52, %53 : vector<16x128xf32>
    %c1_40 = arith.constant 1 : index
    %c0_41 = arith.constant 0 : index
    %c0_42 = arith.constant 0 : index
    %55 = vector.load %arg13[%c1_40, %c0_41, %c0_42] : memref<5x16x16xbf16, #tpu.memory_space<vmem>>, vector<1x16x16xbf16>
    %56 = vector.shape_cast %55 : vector<1x16x16xbf16> to vector<16x16xbf16>
    %57 = arith.truncf %54 : vector<16x128xf32> to vector<16x128xbf16>
    %cst_43 = arith.constant dense<0.000000e+00> : vector<16x128xf32>
    %58 = tpu.matmul %56, %57, %cst_43 {dimension_numbers = #tpu.dot_dimension_numbers<[1], [0], [0], [1], [0, 0, 1, 1], [], []>} : vector<16x16xbf16>, vector<16x128xbf16>, vector<16x128xf32> -> vector<16x128xf32>
    %59 = arith.truncf %58 : vector<16x128xf32> to vector<16x128xbf16>
    %c0_44 = arith.constant 0 : index
    %c0_45 = arith.constant 0 : index
    %60 = vector.load %arg6[%c0_44, %c0_45] : memref<128x256xbf16, #tpu.memory_space<vmem>>, vector<128x256xbf16>
    %cst_46 = arith.constant dense<0.000000e+00> : vector<16x256xf32>
    %61 = tpu.matmul %59, %60, %cst_46 {dimension_numbers = #tpu.dot_dimension_numbers<[1], [0], [0], [1], [0, 0, 1, 1], [], []>} : vector<16x128xbf16>, vector<128x256xbf16>, vector<16x256xf32> -> vector<16x256xf32>
    %62 = arith.addf %61, %27 : vector<16x256xf32>
    %c0_47 = arith.constant 0 : index
    %c0_48 = arith.constant 0 : index
    %c0_49 = arith.constant 0 : index
    %63 = vector.load %arg14[%c0_47, %c0_48, %c0_49] : memref<4x16x1xf32, #tpu.memory_space<vmem>>, vector<1x16x1xf32>
    %64 = vector.shape_cast %63 : vector<1x16x1xf32> to vector<16x1xf32>
    %65 = vector.broadcast %64 : vector<16x1xf32> to vector<16x256xf32>
    %66 = arith.mulf %62, %65 : vector<16x256xf32>
    %c0_50 = arith.constant 0 : index
    %c0_51 = arith.constant 0 : index
    %c0_52 = arith.constant 0 : index
    %67 = vector.load %arg15[%c0_50, %c0_51, %c0_52] : memref<4x16x1xf32, #tpu.memory_space<vmem>>, vector<1x16x1xf32>
    %68 = vector.shape_cast %67 : vector<1x16x1xf32> to vector<16x1xf32>
    %69 = vector.broadcast %68 : vector<16x1xf32> to vector<16x256xf32>
    %70 = arith.addf %66, %69 : vector<16x256xf32>
    %cst_53 = arith.constant 0.000000e+00 : f32
    %71 = vector.broadcast %cst_53 : f32 to vector<16x256xf32>
    %72 = arith.maximumf %70, %71 : vector<16x256xf32>
    %73 = arith.truncf %72 : vector<16x256xf32> to vector<16x256xbf16>
    %c0_54 = arith.constant 0 : index
    %c0_55 = arith.constant 0 : index
    %c0_56 = arith.constant 0 : index
    %74 = vector.load %arg10[%c0_54, %c0_55, %c0_56] : memref<4x256x256xbf16, #tpu.memory_space<vmem>>, vector<1x256x256xbf16>
    %75 = vector.shape_cast %74 : vector<1x256x256xbf16> to vector<256x256xbf16>
    %cst_57 = arith.constant dense<0.000000e+00> : vector<16x256xf32>
    %76 = tpu.matmul %73, %75, %cst_57 {dimension_numbers = #tpu.dot_dimension_numbers<[1], [0], [0], [1], [0, 0, 1, 1], [], []>} : vector<16x256xbf16>, vector<256x256xbf16>, vector<16x256xf32> -> vector<16x256xf32>
    %77 = arith.truncf %76 : vector<16x256xf32> to vector<16x256xbf16>
    %c1_58 = arith.constant 1 : index
    %c0_59 = arith.constant 0 : index
    %c0_60 = arith.constant 0 : index
    %78 = vector.load %arg10[%c1_58, %c0_59, %c0_60] : memref<4x256x256xbf16, #tpu.memory_space<vmem>>, vector<1x256x256xbf16>
    %79 = vector.shape_cast %78 : vector<1x256x256xbf16> to vector<256x256xbf16>
    %cst_61 = arith.constant dense<0.000000e+00> : vector<16x256xf32>
    %80 = tpu.matmul %73, %79, %cst_61 {dimension_numbers = #tpu.dot_dimension_numbers<[1], [0], [0], [1], [0, 0, 1, 1], [], []>} : vector<16x256xbf16>, vector<256x256xbf16>, vector<16x256xf32> -> vector<16x256xf32>
    %81 = arith.truncf %80 : vector<16x256xf32> to vector<16x256xbf16>
    %c0_62 = arith.constant 0 : index
    %c0_63 = arith.constant 0 : index
    %c0_64 = arith.constant 0 : index
    %82 = vector.load %arg16[%c0_62, %c0_63, %c0_64] : memref<36x16x16xbf16, #tpu.memory_space<vmem>>, vector<1x16x16xbf16>
    %83 = vector.shape_cast %82 : vector<1x16x16xbf16> to vector<16x16xbf16>
    %cst_65 = arith.constant dense<0.000000e+00> : vector<16x256xf32>
    %84 = tpu.matmul %83, %77, %cst_65 {dimension_numbers = #tpu.dot_dimension_numbers<[1], [0], [0], [1], [0, 0, 1, 1], [], []>} : vector<16x16xbf16>, vector<16x256xbf16>, vector<16x256xf32> -> vector<16x256xf32>
    %c1_66 = arith.constant 1 : index
    %c0_67 = arith.constant 0 : index
    %c0_68 = arith.constant 0 : index
    %85 = vector.load %arg16[%c1_66, %c0_67, %c0_68] : memref<36x16x16xbf16, #tpu.memory_space<vmem>>, vector<1x16x16xbf16>
    %86 = vector.shape_cast %85 : vector<1x16x16xbf16> to vector<16x16xbf16>
    %cst_69 = arith.constant dense<0.000000e+00> : vector<16x256xf32>
    %87 = tpu.matmul %86, %73, %cst_69 {dimension_numbers = #tpu.dot_dimension_numbers<[1], [0], [0], [1], [0, 0, 1, 1], [], []>} : vector<16x16xbf16>, vector<16x256xbf16>, vector<16x256xf32> -> vector<16x256xf32>
    %88 = arith.addf %84, %87 : vector<16x256xf32>
    %c2 = arith.constant 2 : index
    %c0_70 = arith.constant 0 : index
    %c0_71 = arith.constant 0 : index
    %89 = vector.load %arg16[%c2, %c0_70, %c0_71] : memref<36x16x16xbf16, #tpu.memory_space<vmem>>, vector<1x16x16xbf16>
    %90 = vector.shape_cast %89 : vector<1x16x16xbf16> to vector<16x16xbf16>
    %cst_72 = arith.constant dense<0.000000e+00> : vector<16x256xf32>
    %91 = tpu.matmul %90, %81, %cst_72 {dimension_numbers = #tpu.dot_dimension_numbers<[1], [0], [0], [1], [0, 0, 1, 1], [], []>} : vector<16x16xbf16>, vector<16x256xbf16>, vector<16x256xf32> -> vector<16x256xf32>
    %92 = arith.addf %88, %91 : vector<16x256xf32>
    %c3 = arith.constant 3 : index
    %c0_73 = arith.constant 0 : index
    %c0_74 = arith.constant 0 : index
    %93 = vector.load %arg16[%c3, %c0_73, %c0_74] : memref<36x16x16xbf16, #tpu.memory_space<vmem>>, vector<1x16x16xbf16>
    %94 = vector.shape_cast %93 : vector<1x16x16xbf16> to vector<16x16xbf16>
    %cst_75 = arith.constant dense<0.000000e+00> : vector<16x256xf32>
    %95 = tpu.matmul %94, %77, %cst_75 {dimension_numbers = #tpu.dot_dimension_numbers<[1], [0], [0], [1], [0, 0, 1, 1], [], []>} : vector<16x16xbf16>, vector<16x256xbf16>, vector<16x256xf32> -> vector<16x256xf32>
    %c4 = arith.constant 4 : index
    %c0_76 = arith.constant 0 : index
    %c0_77 = arith.constant 0 : index
    %96 = vector.load %arg16[%c4, %c0_76, %c0_77] : memref<36x16x16xbf16, #tpu.memory_space<vmem>>, vector<1x16x16xbf16>
    %97 = vector.shape_cast %96 : vector<1x16x16xbf16> to vector<16x16xbf16>
    %cst_78 = arith.constant dense<0.000000e+00> : vector<16x256xf32>
    %98 = tpu.matmul %97, %73, %cst_78 {dimension_numbers = #tpu.dot_dimension_numbers<[1], [0], [0], [1], [0, 0, 1, 1], [], []>} : vector<16x16xbf16>, vector<16x256xbf16>, vector<16x256xf32> -> vector<16x256xf32>
    %99 = arith.addf %95, %98 : vector<16x256xf32>
    %c5 = arith.constant 5 : index
    %c0_79 = arith.constant 0 : index
    %c0_80 = arith.constant 0 : index
    %100 = vector.load %arg16[%c5, %c0_79, %c0_80] : memref<36x16x16xbf16, #tpu.memory_space<vmem>>, vector<1x16x16xbf16>
    %101 = vector.shape_cast %100 : vector<1x16x16xbf16> to vector<16x16xbf16>
    %cst_81 = arith.constant dense<0.000000e+00> : vector<16x256xf32>
    %102 = tpu.matmul %101, %81, %cst_81 {dimension_numbers = #tpu.dot_dimension_numbers<[1], [0], [0], [1], [0, 0, 1, 1], [], []>} : vector<16x16xbf16>, vector<16x256xbf16>, vector<16x256xf32> -> vector<16x256xf32>
    %103 = arith.addf %99, %102 : vector<16x256xf32>
    %c6 = arith.constant 6 : index
    %c0_82 = arith.constant 0 : index
    %c0_83 = arith.constant 0 : index
    %104 = vector.load %arg16[%c6, %c0_82, %c0_83] : memref<36x16x16xbf16, #tpu.memory_space<vmem>>, vector<1x16x16xbf16>
    %105 = vector.shape_cast %104 : vector<1x16x16xbf16> to vector<16x16xbf16>
    %cst_84 = arith.constant dense<0.000000e+00> : vector<16x256xf32>
    %106 = tpu.matmul %105, %77, %cst_84 {dimension_numbers = #tpu.dot_dimension_numbers<[1], [0], [0], [1], [0, 0, 1, 1], [], []>} : vector<16x16xbf16>, vector<16x256xbf16>, vector<16x256xf32> -> vector<16x256xf32>
    %c7 = arith.constant 7 : index
    %c0_85 = arith.constant 0 : index
    %c0_86 = arith.constant 0 : index
    %107 = vector.load %arg16[%c7, %c0_85, %c0_86] : memref<36x16x16xbf16, #tpu.memory_space<vmem>>, vector<1x16x16xbf16>
    %108 = vector.shape_cast %107 : vector<1x16x16xbf16> to vector<16x16xbf16>
    %cst_87 = arith.constant dense<0.000000e+00> : vector<16x256xf32>
    %109 = tpu.matmul %108, %73, %cst_87 {dimension_numbers = #tpu.dot_dimension_numbers<[1], [0], [0], [1], [0, 0, 1, 1], [], []>} : vector<16x16xbf16>, vector<16x256xbf16>, vector<16x256xf32> -> vector<16x256xf32>
    %110 = arith.addf %106, %109 : vector<16x256xf32>
    %c8 = arith.constant 8 : index
    %c0_88 = arith.constant 0 : index
    %c0_89 = arith.constant 0 : index
    %111 = vector.load %arg16[%c8, %c0_88, %c0_89] : memref<36x16x16xbf16, #tpu.memory_space<vmem>>, vector<1x16x16xbf16>
    %112 = vector.shape_cast %111 : vector<1x16x16xbf16> to vector<16x16xbf16>
    %cst_90 = arith.constant dense<0.000000e+00> : vector<16x256xf32>
    %113 = tpu.matmul %112, %81, %cst_90 {dimension_numbers = #tpu.dot_dimension_numbers<[1], [0], [0], [1], [0, 0, 1, 1], [], []>} : vector<16x16xbf16>, vector<16x256xbf16>, vector<16x256xf32> -> vector<16x256xf32>
    %114 = arith.addf %110, %113 : vector<16x256xf32>
    %115 = arith.truncf %92 : vector<16x256xf32> to vector<16x256xbf16>
    %c2_91 = arith.constant 2 : index
    %c0_92 = arith.constant 0 : index
    %c0_93 = arith.constant 0 : index
    %116 = vector.load %arg10[%c2_91, %c0_92, %c0_93] : memref<4x256x256xbf16, #tpu.memory_space<vmem>>, vector<1x256x256xbf16>
    %117 = vector.shape_cast %116 : vector<1x256x256xbf16> to vector<256x256xbf16>
    %cst_94 = arith.constant dense<0.000000e+00> : vector<16x256xf32>
    %118 = tpu.matmul %115, %117, %cst_94 {dimension_numbers = #tpu.dot_dimension_numbers<[1], [0], [0], [1], [0, 0, 1, 1], [], []>} : vector<16x256xbf16>, vector<256x256xbf16>, vector<16x256xf32> -> vector<16x256xf32>
    %119 = arith.addf %103, %118 : vector<16x256xf32>
    %120 = arith.truncf %114 : vector<16x256xf32> to vector<16x256xbf16>
    %c3_95 = arith.constant 3 : index
    %c0_96 = arith.constant 0 : index
    %c0_97 = arith.constant 0 : index
    %121 = vector.load %arg10[%c3_95, %c0_96, %c0_97] : memref<4x256x256xbf16, #tpu.memory_space<vmem>>, vector<1x256x256xbf16>
    %122 = vector.shape_cast %121 : vector<1x256x256xbf16> to vector<256x256xbf16>
    %cst_98 = arith.constant dense<0.000000e+00> : vector<16x256xf32>
    %123 = tpu.matmul %120, %122, %cst_98 {dimension_numbers = #tpu.dot_dimension_numbers<[1], [0], [0], [1], [0, 0, 1, 1], [], []>} : vector<16x256xbf16>, vector<256x256xbf16>, vector<16x256xf32> -> vector<16x256xf32>
    %124 = arith.addf %119, %123 : vector<16x256xf32>
    %c1_99 = arith.constant 1 : index
    %c0_100 = arith.constant 0 : index
    %c0_101 = arith.constant 0 : index
    %125 = vector.load %arg17[%c1_99, %c0_100, %c0_101] : memref<5x16x1xf32, #tpu.memory_space<vmem>>, vector<1x16x1xf32>
    %126 = vector.shape_cast %125 : vector<1x16x1xf32> to vector<16x1xf32>
    %127 = vector.broadcast %126 : vector<16x1xf32> to vector<16x256xf32>
    %128 = arith.mulf %124, %127 : vector<16x256xf32>
    %c1_102 = arith.constant 1 : index
    %c0_103 = arith.constant 0 : index
    %c0_104 = arith.constant 0 : index
    %129 = vector.load %arg18[%c1_102, %c0_103, %c0_104] : memref<5x16x1xf32, #tpu.memory_space<vmem>>, vector<1x16x1xf32>
    %130 = vector.shape_cast %129 : vector<1x16x1xf32> to vector<16x1xf32>
    %131 = vector.broadcast %130 : vector<16x1xf32> to vector<16x256xf32>
    %132 = arith.addf %128, %131 : vector<16x256xf32>
    %cst_105 = arith.constant 0.000000e+00 : f32
    %133 = vector.broadcast %cst_105 : f32 to vector<16x256xf32>
    %134 = arith.maximumf %132, %133 : vector<16x256xf32>
    %c1_106 = arith.constant 1 : index
    %c0_107 = arith.constant 0 : index
    %c0_108 = arith.constant 0 : index
    %135 = vector.load %arg19[%c1_106, %c0_107, %c0_108] : memref<5x32x16xbf16, #tpu.memory_space<vmem>>, vector<1x32x16xbf16>
    %136 = vector.shape_cast %135 : vector<1x32x16xbf16> to vector<32x16xbf16>
    %137 = arith.truncf %134 : vector<16x256xf32> to vector<16x256xbf16>
    %cst_109 = arith.constant dense<0.000000e+00> : vector<32x256xf32>
    %138 = tpu.matmul %136, %137, %cst_109 {dimension_numbers = #tpu.dot_dimension_numbers<[1], [0], [0], [1], [0, 0, 1, 1], [], []>} : vector<32x16xbf16>, vector<16x256xbf16>, vector<32x256xf32> -> vector<32x256xf32>
    %139 = arith.addf %42, %138 : vector<32x256xf32>
    %c0_110 = arith.constant 0 : index
    %c0_111 = arith.constant 0 : index
    %140 = vector.load %arg3[%c0_110, %c0_111] : memref<256x32xbf16, #tpu.memory_space<vmem>>, vector<256x32xbf16>
    %cst_112 = arith.constant dense<0.000000e+00> : vector<16x32xf32>
    %141 = tpu.matmul %2, %140, %cst_112 {dimension_numbers = #tpu.dot_dimension_numbers<[1], [0], [0], [1], [0, 0, 1, 1], [], []>} : vector<16x256xbf16>, vector<256x32xbf16>, vector<16x32xf32> -> vector<16x32xf32>
    %c2_113 = arith.constant 2 : index
    %c0_114 = arith.constant 0 : index
    %c0_115 = arith.constant 0 : index
    %142 = vector.load %arg11[%c2_113, %c0_114, %c0_115] : memref<5x16x1xf32, #tpu.memory_space<vmem>>, vector<1x16x1xf32>
    %143 = vector.shape_cast %142 : vector<1x16x1xf32> to vector<16x1xf32>
    %144 = vector.broadcast %143 : vector<16x1xf32> to vector<16x32xf32>
    %145 = arith.mulf %141, %144 : vector<16x32xf32>
    %c2_116 = arith.constant 2 : index
    %c0_117 = arith.constant 0 : index
    %c0_118 = arith.constant 0 : index
    %146 = vector.load %arg12[%c2_116, %c0_117, %c0_118] : memref<5x16x1xf32, #tpu.memory_space<vmem>>, vector<1x16x1xf32>
    %147 = vector.shape_cast %146 : vector<1x16x1xf32> to vector<16x1xf32>
    %148 = vector.broadcast %147 : vector<16x1xf32> to vector<16x32xf32>
    %149 = arith.addf %145, %148 : vector<16x32xf32>
    %cst_119 = arith.constant 0.000000e+00 : f32
    %150 = vector.broadcast %cst_119 : f32 to vector<16x32xf32>
    %151 = arith.maximumf %149, %150 : vector<16x32xf32>
    %c2_120 = arith.constant 2 : index
    %c0_121 = arith.constant 0 : index
    %c0_122 = arith.constant 0 : index
    %152 = vector.load %arg13[%c2_120, %c0_121, %c0_122] : memref<5x16x16xbf16, #tpu.memory_space<vmem>>, vector<1x16x16xbf16>
    %153 = vector.shape_cast %152 : vector<1x16x16xbf16> to vector<16x16xbf16>
    %154 = arith.truncf %151 : vector<16x32xf32> to vector<16x32xbf16>
    %cst_123 = arith.constant dense<0.000000e+00> : vector<16x32xf32>
    %155 = tpu.matmul %153, %154, %cst_123 {dimension_numbers = #tpu.dot_dimension_numbers<[1], [0], [0], [1], [0, 0, 1, 1], [], []>} : vector<16x16xbf16>, vector<16x32xbf16>, vector<16x32xf32> -> vector<16x32xf32>
    %156 = arith.truncf %155 : vector<16x32xf32> to vector<16x32xbf16>
    %c0_124 = arith.constant 0 : index
    %c0_125 = arith.constant 0 : index
    %157 = vector.load %arg7[%c0_124, %c0_125] : memref<32x256xbf16, #tpu.memory_space<vmem>>, vector<32x256xbf16>
    %cst_126 = arith.constant dense<0.000000e+00> : vector<16x256xf32>
    %158 = tpu.matmul %156, %157, %cst_126 {dimension_numbers = #tpu.dot_dimension_numbers<[1], [0], [0], [1], [0, 0, 1, 1], [], []>} : vector<16x32xbf16>, vector<32x256xbf16>, vector<16x256xf32> -> vector<16x256xf32>
    %159 = arith.addf %158, %124 : vector<16x256xf32>
    %c1_127 = arith.constant 1 : index
    %c0_128 = arith.constant 0 : index
    %c0_129 = arith.constant 0 : index
    %160 = vector.load %arg14[%c1_127, %c0_128, %c0_129] : memref<4x16x1xf32, #tpu.memory_space<vmem>>, vector<1x16x1xf32>
    %161 = vector.shape_cast %160 : vector<1x16x1xf32> to vector<16x1xf32>
    %162 = vector.broadcast %161 : vector<16x1xf32> to vector<16x256xf32>
    %163 = arith.mulf %159, %162 : vector<16x256xf32>
    %c1_130 = arith.constant 1 : index
    %c0_131 = arith.constant 0 : index
    %c0_132 = arith.constant 0 : index
    %164 = vector.load %arg15[%c1_130, %c0_131, %c0_132] : memref<4x16x1xf32, #tpu.memory_space<vmem>>, vector<1x16x1xf32>
    %165 = vector.shape_cast %164 : vector<1x16x1xf32> to vector<16x1xf32>
    %166 = vector.broadcast %165 : vector<16x1xf32> to vector<16x256xf32>
    %167 = arith.addf %163, %166 : vector<16x256xf32>
    %cst_133 = arith.constant 0.000000e+00 : f32
    %168 = vector.broadcast %cst_133 : f32 to vector<16x256xf32>
    %169 = arith.maximumf %167, %168 : vector<16x256xf32>
    %170 = arith.truncf %169 : vector<16x256xf32> to vector<16x256xbf16>
    %c0_134 = arith.constant 0 : index
    %c0_135 = arith.constant 0 : index
    %c0_136 = arith.constant 0 : index
    %171 = vector.load %arg10[%c0_134, %c0_135, %c0_136] : memref<4x256x256xbf16, #tpu.memory_space<vmem>>, vector<1x256x256xbf16>
    %172 = vector.shape_cast %171 : vector<1x256x256xbf16> to vector<256x256xbf16>
    %cst_137 = arith.constant dense<0.000000e+00> : vector<16x256xf32>
    %173 = tpu.matmul %170, %172, %cst_137 {dimension_numbers = #tpu.dot_dimension_numbers<[1], [0], [0], [1], [0, 0, 1, 1], [], []>} : vector<16x256xbf16>, vector<256x256xbf16>, vector<16x256xf32> -> vector<16x256xf32>
    %174 = arith.truncf %173 : vector<16x256xf32> to vector<16x256xbf16>
    %c1_138 = arith.constant 1 : index
    %c0_139 = arith.constant 0 : index
    %c0_140 = arith.constant 0 : index
    %175 = vector.load %arg10[%c1_138, %c0_139, %c0_140] : memref<4x256x256xbf16, #tpu.memory_space<vmem>>, vector<1x256x256xbf16>
    %176 = vector.shape_cast %175 : vector<1x256x256xbf16> to vector<256x256xbf16>
    %cst_141 = arith.constant dense<0.000000e+00> : vector<16x256xf32>
    %177 = tpu.matmul %170, %176, %cst_141 {dimension_numbers = #tpu.dot_dimension_numbers<[1], [0], [0], [1], [0, 0, 1, 1], [], []>} : vector<16x256xbf16>, vector<256x256xbf16>, vector<16x256xf32> -> vector<16x256xf32>
    %178 = arith.truncf %177 : vector<16x256xf32> to vector<16x256xbf16>
    %c9 = arith.constant 9 : index
    %c0_142 = arith.constant 0 : index
    %c0_143 = arith.constant 0 : index
    %179 = vector.load %arg16[%c9, %c0_142, %c0_143] : memref<36x16x16xbf16, #tpu.memory_space<vmem>>, vector<1x16x16xbf16>
    %180 = vector.shape_cast %179 : vector<1x16x16xbf16> to vector<16x16xbf16>
    %cst_144 = arith.constant dense<0.000000e+00> : vector<16x256xf32>
    %181 = tpu.matmul %180, %174, %cst_144 {dimension_numbers = #tpu.dot_dimension_numbers<[1], [0], [0], [1], [0, 0, 1, 1], [], []>} : vector<16x16xbf16>, vector<16x256xbf16>, vector<16x256xf32> -> vector<16x256xf32>
    %c10 = arith.constant 10 : index
    %c0_145 = arith.constant 0 : index
    %c0_146 = arith.constant 0 : index
    %182 = vector.load %arg16[%c10, %c0_145, %c0_146] : memref<36x16x16xbf16, #tpu.memory_space<vmem>>, vector<1x16x16xbf16>
    %183 = vector.shape_cast %182 : vector<1x16x16xbf16> to vector<16x16xbf16>
    %cst_147 = arith.constant dense<0.000000e+00> : vector<16x256xf32>
    %184 = tpu.matmul %183, %170, %cst_147 {dimension_numbers = #tpu.dot_dimension_numbers<[1], [0], [0], [1], [0, 0, 1, 1], [], []>} : vector<16x16xbf16>, vector<16x256xbf16>, vector<16x256xf32> -> vector<16x256xf32>
    %185 = arith.addf %181, %184 : vector<16x256xf32>
    %c11 = arith.constant 11 : index
    %c0_148 = arith.constant 0 : index
    %c0_149 = arith.constant 0 : index
    %186 = vector.load %arg16[%c11, %c0_148, %c0_149] : memref<36x16x16xbf16, #tpu.memory_space<vmem>>, vector<1x16x16xbf16>
    %187 = vector.shape_cast %186 : vector<1x16x16xbf16> to vector<16x16xbf16>
    %cst_150 = arith.constant dense<0.000000e+00> : vector<16x256xf32>
    %188 = tpu.matmul %187, %178, %cst_150 {dimension_numbers = #tpu.dot_dimension_numbers<[1], [0], [0], [1], [0, 0, 1, 1], [], []>} : vector<16x16xbf16>, vector<16x256xbf16>, vector<16x256xf32> -> vector<16x256xf32>
    %189 = arith.addf %185, %188 : vector<16x256xf32>
    %c12 = arith.constant 12 : index
    %c0_151 = arith.constant 0 : index
    %c0_152 = arith.constant 0 : index
    %190 = vector.load %arg16[%c12, %c0_151, %c0_152] : memref<36x16x16xbf16, #tpu.memory_space<vmem>>, vector<1x16x16xbf16>
    %191 = vector.shape_cast %190 : vector<1x16x16xbf16> to vector<16x16xbf16>
    %cst_153 = arith.constant dense<0.000000e+00> : vector<16x256xf32>
    %192 = tpu.matmul %191, %174, %cst_153 {dimension_numbers = #tpu.dot_dimension_numbers<[1], [0], [0], [1], [0, 0, 1, 1], [], []>} : vector<16x16xbf16>, vector<16x256xbf16>, vector<16x256xf32> -> vector<16x256xf32>
    %c13 = arith.constant 13 : index
    %c0_154 = arith.constant 0 : index
    %c0_155 = arith.constant 0 : index
    %193 = vector.load %arg16[%c13, %c0_154, %c0_155] : memref<36x16x16xbf16, #tpu.memory_space<vmem>>, vector<1x16x16xbf16>
    %194 = vector.shape_cast %193 : vector<1x16x16xbf16> to vector<16x16xbf16>
    %cst_156 = arith.constant dense<0.000000e+00> : vector<16x256xf32>
    %195 = tpu.matmul %194, %170, %cst_156 {dimension_numbers = #tpu.dot_dimension_numbers<[1], [0], [0], [1], [0, 0, 1, 1], [], []>} : vector<16x16xbf16>, vector<16x256xbf16>, vector<16x256xf32> -> vector<16x256xf32>
    %196 = arith.addf %192, %195 : vector<16x256xf32>
    %c14 = arith.constant 14 : index
    %c0_157 = arith.constant 0 : index
    %c0_158 = arith.constant 0 : index
    %197 = vector.load %arg16[%c14, %c0_157, %c0_158] : memref<36x16x16xbf16, #tpu.memory_space<vmem>>, vector<1x16x16xbf16>
    %198 = vector.shape_cast %197 : vector<1x16x16xbf16> to vector<16x16xbf16>
    %cst_159 = arith.constant dense<0.000000e+00> : vector<16x256xf32>
    %199 = tpu.matmul %198, %178, %cst_159 {dimension_numbers = #tpu.dot_dimension_numbers<[1], [0], [0], [1], [0, 0, 1, 1], [], []>} : vector<16x16xbf16>, vector<16x256xbf16>, vector<16x256xf32> -> vector<16x256xf32>
    %200 = arith.addf %196, %199 : vector<16x256xf32>
    %c15 = arith.constant 15 : index
    %c0_160 = arith.constant 0 : index
    %c0_161 = arith.constant 0 : index
    %201 = vector.load %arg16[%c15, %c0_160, %c0_161] : memref<36x16x16xbf16, #tpu.memory_space<vmem>>, vector<1x16x16xbf16>
    %202 = vector.shape_cast %201 : vector<1x16x16xbf16> to vector<16x16xbf16>
    %cst_162 = arith.constant dense<0.000000e+00> : vector<16x256xf32>
    %203 = tpu.matmul %202, %174, %cst_162 {dimension_numbers = #tpu.dot_dimension_numbers<[1], [0], [0], [1], [0, 0, 1, 1], [], []>} : vector<16x16xbf16>, vector<16x256xbf16>, vector<16x256xf32> -> vector<16x256xf32>
    %c16 = arith.constant 16 : index
    %c0_163 = arith.constant 0 : index
    %c0_164 = arith.constant 0 : index
    %204 = vector.load %arg16[%c16, %c0_163, %c0_164] : memref<36x16x16xbf16, #tpu.memory_space<vmem>>, vector<1x16x16xbf16>
    %205 = vector.shape_cast %204 : vector<1x16x16xbf16> to vector<16x16xbf16>
    %cst_165 = arith.constant dense<0.000000e+00> : vector<16x256xf32>
    %206 = tpu.matmul %205, %170, %cst_165 {dimension_numbers = #tpu.dot_dimension_numbers<[1], [0], [0], [1], [0, 0, 1, 1], [], []>} : vector<16x16xbf16>, vector<16x256xbf16>, vector<16x256xf32> -> vector<16x256xf32>
    %207 = arith.addf %203, %206 : vector<16x256xf32>
    %c17 = arith.constant 17 : index
    %c0_166 = arith.constant 0 : index
    %c0_167 = arith.constant 0 : index
    %208 = vector.load %arg16[%c17, %c0_166, %c0_167] : memref<36x16x16xbf16, #tpu.memory_space<vmem>>, vector<1x16x16xbf16>
    %209 = vector.shape_cast %208 : vector<1x16x16xbf16> to vector<16x16xbf16>
    %cst_168 = arith.constant dense<0.000000e+00> : vector<16x256xf32>
    %210 = tpu.matmul %209, %178, %cst_168 {dimension_numbers = #tpu.dot_dimension_numbers<[1], [0], [0], [1], [0, 0, 1, 1], [], []>} : vector<16x16xbf16>, vector<16x256xbf16>, vector<16x256xf32> -> vector<16x256xf32>
    %211 = arith.addf %207, %210 : vector<16x256xf32>
    %212 = arith.truncf %189 : vector<16x256xf32> to vector<16x256xbf16>
    %c2_169 = arith.constant 2 : index
    %c0_170 = arith.constant 0 : index
    %c0_171 = arith.constant 0 : index
    %213 = vector.load %arg10[%c2_169, %c0_170, %c0_171] : memref<4x256x256xbf16, #tpu.memory_space<vmem>>, vector<1x256x256xbf16>
    %214 = vector.shape_cast %213 : vector<1x256x256xbf16> to vector<256x256xbf16>
    %cst_172 = arith.constant dense<0.000000e+00> : vector<16x256xf32>
    %215 = tpu.matmul %212, %214, %cst_172 {dimension_numbers = #tpu.dot_dimension_numbers<[1], [0], [0], [1], [0, 0, 1, 1], [], []>} : vector<16x256xbf16>, vector<256x256xbf16>, vector<16x256xf32> -> vector<16x256xf32>
    %216 = arith.addf %200, %215 : vector<16x256xf32>
    %217 = arith.truncf %211 : vector<16x256xf32> to vector<16x256xbf16>
    %c3_173 = arith.constant 3 : index
    %c0_174 = arith.constant 0 : index
    %c0_175 = arith.constant 0 : index
    %218 = vector.load %arg10[%c3_173, %c0_174, %c0_175] : memref<4x256x256xbf16, #tpu.memory_space<vmem>>, vector<1x256x256xbf16>
    %219 = vector.shape_cast %218 : vector<1x256x256xbf16> to vector<256x256xbf16>
    %cst_176 = arith.constant dense<0.000000e+00> : vector<16x256xf32>
    %220 = tpu.matmul %217, %219, %cst_176 {dimension_numbers = #tpu.dot_dimension_numbers<[1], [0], [0], [1], [0, 0, 1, 1], [], []>} : vector<16x256xbf16>, vector<256x256xbf16>, vector<16x256xf32> -> vector<16x256xf32>
    %221 = arith.addf %216, %220 : vector<16x256xf32>
    %c2_177 = arith.constant 2 : index
    %c0_178 = arith.constant 0 : index
    %c0_179 = arith.constant 0 : index
    %222 = vector.load %arg17[%c2_177, %c0_178, %c0_179] : memref<5x16x1xf32, #tpu.memory_space<vmem>>, vector<1x16x1xf32>
    %223 = vector.shape_cast %222 : vector<1x16x1xf32> to vector<16x1xf32>
    %224 = vector.broadcast %223 : vector<16x1xf32> to vector<16x256xf32>
    %225 = arith.mulf %221, %224 : vector<16x256xf32>
    %c2_180 = arith.constant 2 : index
    %c0_181 = arith.constant 0 : index
    %c0_182 = arith.constant 0 : index
    %226 = vector.load %arg18[%c2_180, %c0_181, %c0_182] : memref<5x16x1xf32, #tpu.memory_space<vmem>>, vector<1x16x1xf32>
    %227 = vector.shape_cast %226 : vector<1x16x1xf32> to vector<16x1xf32>
    %228 = vector.broadcast %227 : vector<16x1xf32> to vector<16x256xf32>
    %229 = arith.addf %225, %228 : vector<16x256xf32>
    %cst_183 = arith.constant 0.000000e+00 : f32
    %230 = vector.broadcast %cst_183 : f32 to vector<16x256xf32>
    %231 = arith.maximumf %229, %230 : vector<16x256xf32>
    %c2_184 = arith.constant 2 : index
    %c0_185 = arith.constant 0 : index
    %c0_186 = arith.constant 0 : index
    %232 = vector.load %arg19[%c2_184, %c0_185, %c0_186] : memref<5x32x16xbf16, #tpu.memory_space<vmem>>, vector<1x32x16xbf16>
    %233 = vector.shape_cast %232 : vector<1x32x16xbf16> to vector<32x16xbf16>
    %234 = arith.truncf %231 : vector<16x256xf32> to vector<16x256xbf16>
    %cst_187 = arith.constant dense<0.000000e+00> : vector<32x256xf32>
    %235 = tpu.matmul %233, %234, %cst_187 {dimension_numbers = #tpu.dot_dimension_numbers<[1], [0], [0], [1], [0, 0, 1, 1], [], []>} : vector<32x16xbf16>, vector<16x256xbf16>, vector<32x256xf32> -> vector<32x256xf32>
    %236 = arith.addf %139, %235 : vector<32x256xf32>
    %c0_188 = arith.constant 0 : index
    %c0_189 = arith.constant 0 : index
    %237 = vector.load %arg4[%c0_188, %c0_189] : memref<256x8xbf16, #tpu.memory_space<vmem>>, vector<256x8xbf16>
    %cst_190 = arith.constant dense<0.000000e+00> : vector<16x8xf32>
    %238 = tpu.matmul %2, %237, %cst_190 {dimension_numbers = #tpu.dot_dimension_numbers<[1], [0], [0], [1], [0, 0, 1, 1], [], []>} : vector<16x256xbf16>, vector<256x8xbf16>, vector<16x8xf32> -> vector<16x8xf32>
    %c3_191 = arith.constant 3 : index
    %c0_192 = arith.constant 0 : index
    %c0_193 = arith.constant 0 : index
    %239 = vector.load %arg11[%c3_191, %c0_192, %c0_193] : memref<5x16x1xf32, #tpu.memory_space<vmem>>, vector<1x16x1xf32>
    %240 = vector.shape_cast %239 : vector<1x16x1xf32> to vector<16x1xf32>
    %241 = vector.broadcast %240 : vector<16x1xf32> to vector<16x8xf32>
    %242 = arith.mulf %238, %241 : vector<16x8xf32>
    %c3_194 = arith.constant 3 : index
    %c0_195 = arith.constant 0 : index
    %c0_196 = arith.constant 0 : index
    %243 = vector.load %arg12[%c3_194, %c0_195, %c0_196] : memref<5x16x1xf32, #tpu.memory_space<vmem>>, vector<1x16x1xf32>
    %244 = vector.shape_cast %243 : vector<1x16x1xf32> to vector<16x1xf32>
    %245 = vector.broadcast %244 : vector<16x1xf32> to vector<16x8xf32>
    %246 = arith.addf %242, %245 : vector<16x8xf32>
    %cst_197 = arith.constant 0.000000e+00 : f32
    %247 = vector.broadcast %cst_197 : f32 to vector<16x8xf32>
    %248 = arith.maximumf %246, %247 : vector<16x8xf32>
    %c3_198 = arith.constant 3 : index
    %c0_199 = arith.constant 0 : index
    %c0_200 = arith.constant 0 : index
    %249 = vector.load %arg13[%c3_198, %c0_199, %c0_200] : memref<5x16x16xbf16, #tpu.memory_space<vmem>>, vector<1x16x16xbf16>
    %250 = vector.shape_cast %249 : vector<1x16x16xbf16> to vector<16x16xbf16>
    %251 = arith.truncf %248 : vector<16x8xf32> to vector<16x8xbf16>
    %cst_201 = arith.constant dense<0.000000e+00> : vector<16x8xf32>
    %252 = tpu.matmul %250, %251, %cst_201 {dimension_numbers = #tpu.dot_dimension_numbers<[1], [0], [0], [1], [0, 0, 1, 1], [], []>} : vector<16x16xbf16>, vector<16x8xbf16>, vector<16x8xf32> -> vector<16x8xf32>
    %253 = arith.truncf %252 : vector<16x8xf32> to vector<16x8xbf16>
    %c0_202 = arith.constant 0 : index
    %c0_203 = arith.constant 0 : index
    %254 = vector.load %arg8[%c0_202, %c0_203] : memref<8x256xbf16, #tpu.memory_space<vmem>>, vector<8x256xbf16>
    %cst_204 = arith.constant dense<0.000000e+00> : vector<16x256xf32>
    %255 = tpu.matmul %253, %254, %cst_204 {dimension_numbers = #tpu.dot_dimension_numbers<[1], [0], [0], [1], [0, 0, 1, 1], [], []>} : vector<16x8xbf16>, vector<8x256xbf16>, vector<16x256xf32> -> vector<16x256xf32>
    %256 = arith.addf %255, %221 : vector<16x256xf32>
    %c2_205 = arith.constant 2 : index
    %c0_206 = arith.constant 0 : index
    %c0_207 = arith.constant 0 : index
    %257 = vector.load %arg14[%c2_205, %c0_206, %c0_207] : memref<4x16x1xf32, #tpu.memory_space<vmem>>, vector<1x16x1xf32>
    %258 = vector.shape_cast %257 : vector<1x16x1xf32> to vector<16x1xf32>
    %259 = vector.broadcast %258 : vector<16x1xf32> to vector<16x256xf32>
    %260 = arith.mulf %256, %259 : vector<16x256xf32>
    %c2_208 = arith.constant 2 : index
    %c0_209 = arith.constant 0 : index
    %c0_210 = arith.constant 0 : index
    %261 = vector.load %arg15[%c2_208, %c0_209, %c0_210] : memref<4x16x1xf32, #tpu.memory_space<vmem>>, vector<1x16x1xf32>
    %262 = vector.shape_cast %261 : vector<1x16x1xf32> to vector<16x1xf32>
    %263 = vector.broadcast %262 : vector<16x1xf32> to vector<16x256xf32>
    %264 = arith.addf %260, %263 : vector<16x256xf32>
    %cst_211 = arith.constant 0.000000e+00 : f32
    %265 = vector.broadcast %cst_211 : f32 to vector<16x256xf32>
    %266 = arith.maximumf %264, %265 : vector<16x256xf32>
    %267 = arith.truncf %266 : vector<16x256xf32> to vector<16x256xbf16>
    %c0_212 = arith.constant 0 : index
    %c0_213 = arith.constant 0 : index
    %c0_214 = arith.constant 0 : index
    %268 = vector.load %arg10[%c0_212, %c0_213, %c0_214] : memref<4x256x256xbf16, #tpu.memory_space<vmem>>, vector<1x256x256xbf16>
    %269 = vector.shape_cast %268 : vector<1x256x256xbf16> to vector<256x256xbf16>
    %cst_215 = arith.constant dense<0.000000e+00> : vector<16x256xf32>
    %270 = tpu.matmul %267, %269, %cst_215 {dimension_numbers = #tpu.dot_dimension_numbers<[1], [0], [0], [1], [0, 0, 1, 1], [], []>} : vector<16x256xbf16>, vector<256x256xbf16>, vector<16x256xf32> -> vector<16x256xf32>
    %271 = arith.truncf %270 : vector<16x256xf32> to vector<16x256xbf16>
    %c1_216 = arith.constant 1 : index
    %c0_217 = arith.constant 0 : index
    %c0_218 = arith.constant 0 : index
    %272 = vector.load %arg10[%c1_216, %c0_217, %c0_218] : memref<4x256x256xbf16, #tpu.memory_space<vmem>>, vector<1x256x256xbf16>
    %273 = vector.shape_cast %272 : vector<1x256x256xbf16> to vector<256x256xbf16>
    %cst_219 = arith.constant dense<0.000000e+00> : vector<16x256xf32>
    %274 = tpu.matmul %267, %273, %cst_219 {dimension_numbers = #tpu.dot_dimension_numbers<[1], [0], [0], [1], [0, 0, 1, 1], [], []>} : vector<16x256xbf16>, vector<256x256xbf16>, vector<16x256xf32> -> vector<16x256xf32>
    %275 = arith.truncf %274 : vector<16x256xf32> to vector<16x256xbf16>
    %c18 = arith.constant 18 : index
    %c0_220 = arith.constant 0 : index
    %c0_221 = arith.constant 0 : index
    %276 = vector.load %arg16[%c18, %c0_220, %c0_221] : memref<36x16x16xbf16, #tpu.memory_space<vmem>>, vector<1x16x16xbf16>
    %277 = vector.shape_cast %276 : vector<1x16x16xbf16> to vector<16x16xbf16>
    %cst_222 = arith.constant dense<0.000000e+00> : vector<16x256xf32>
    %278 = tpu.matmul %277, %271, %cst_222 {dimension_numbers = #tpu.dot_dimension_numbers<[1], [0], [0], [1], [0, 0, 1, 1], [], []>} : vector<16x16xbf16>, vector<16x256xbf16>, vector<16x256xf32> -> vector<16x256xf32>
    %c19 = arith.constant 19 : index
    %c0_223 = arith.constant 0 : index
    %c0_224 = arith.constant 0 : index
    %279 = vector.load %arg16[%c19, %c0_223, %c0_224] : memref<36x16x16xbf16, #tpu.memory_space<vmem>>, vector<1x16x16xbf16>
    %280 = vector.shape_cast %279 : vector<1x16x16xbf16> to vector<16x16xbf16>
    %cst_225 = arith.constant dense<0.000000e+00> : vector<16x256xf32>
    %281 = tpu.matmul %280, %267, %cst_225 {dimension_numbers = #tpu.dot_dimension_numbers<[1], [0], [0], [1], [0, 0, 1, 1], [], []>} : vector<16x16xbf16>, vector<16x256xbf16>, vector<16x256xf32> -> vector<16x256xf32>
    %282 = arith.addf %278, %281 : vector<16x256xf32>
    %c20 = arith.constant 20 : index
    %c0_226 = arith.constant 0 : index
    %c0_227 = arith.constant 0 : index
    %283 = vector.load %arg16[%c20, %c0_226, %c0_227] : memref<36x16x16xbf16, #tpu.memory_space<vmem>>, vector<1x16x16xbf16>
    %284 = vector.shape_cast %283 : vector<1x16x16xbf16> to vector<16x16xbf16>
    %cst_228 = arith.constant dense<0.000000e+00> : vector<16x256xf32>
    %285 = tpu.matmul %284, %275, %cst_228 {dimension_numbers = #tpu.dot_dimension_numbers<[1], [0], [0], [1], [0, 0, 1, 1], [], []>} : vector<16x16xbf16>, vector<16x256xbf16>, vector<16x256xf32> -> vector<16x256xf32>
    %286 = arith.addf %282, %285 : vector<16x256xf32>
    %c21 = arith.constant 21 : index
    %c0_229 = arith.constant 0 : index
    %c0_230 = arith.constant 0 : index
    %287 = vector.load %arg16[%c21, %c0_229, %c0_230] : memref<36x16x16xbf16, #tpu.memory_space<vmem>>, vector<1x16x16xbf16>
    %288 = vector.shape_cast %287 : vector<1x16x16xbf16> to vector<16x16xbf16>
    %cst_231 = arith.constant dense<0.000000e+00> : vector<16x256xf32>
    %289 = tpu.matmul %288, %271, %cst_231 {dimension_numbers = #tpu.dot_dimension_numbers<[1], [0], [0], [1], [0, 0, 1, 1], [], []>} : vector<16x16xbf16>, vector<16x256xbf16>, vector<16x256xf32> -> vector<16x256xf32>
    %c22 = arith.constant 22 : index
    %c0_232 = arith.constant 0 : index
    %c0_233 = arith.constant 0 : index
    %290 = vector.load %arg16[%c22, %c0_232, %c0_233] : memref<36x16x16xbf16, #tpu.memory_space<vmem>>, vector<1x16x16xbf16>
    %291 = vector.shape_cast %290 : vector<1x16x16xbf16> to vector<16x16xbf16>
    %cst_234 = arith.constant dense<0.000000e+00> : vector<16x256xf32>
    %292 = tpu.matmul %291, %267, %cst_234 {dimension_numbers = #tpu.dot_dimension_numbers<[1], [0], [0], [1], [0, 0, 1, 1], [], []>} : vector<16x16xbf16>, vector<16x256xbf16>, vector<16x256xf32> -> vector<16x256xf32>
    %293 = arith.addf %289, %292 : vector<16x256xf32>
    %c23 = arith.constant 23 : index
    %c0_235 = arith.constant 0 : index
    %c0_236 = arith.constant 0 : index
    %294 = vector.load %arg16[%c23, %c0_235, %c0_236] : memref<36x16x16xbf16, #tpu.memory_space<vmem>>, vector<1x16x16xbf16>
    %295 = vector.shape_cast %294 : vector<1x16x16xbf16> to vector<16x16xbf16>
    %cst_237 = arith.constant dense<0.000000e+00> : vector<16x256xf32>
    %296 = tpu.matmul %295, %275, %cst_237 {dimension_numbers = #tpu.dot_dimension_numbers<[1], [0], [0], [1], [0, 0, 1, 1], [], []>} : vector<16x16xbf16>, vector<16x256xbf16>, vector<16x256xf32> -> vector<16x256xf32>
    %297 = arith.addf %293, %296 : vector<16x256xf32>
    %c24 = arith.constant 24 : index
    %c0_238 = arith.constant 0 : index
    %c0_239 = arith.constant 0 : index
    %298 = vector.load %arg16[%c24, %c0_238, %c0_239] : memref<36x16x16xbf16, #tpu.memory_space<vmem>>, vector<1x16x16xbf16>
    %299 = vector.shape_cast %298 : vector<1x16x16xbf16> to vector<16x16xbf16>
    %cst_240 = arith.constant dense<0.000000e+00> : vector<16x256xf32>
    %300 = tpu.matmul %299, %271, %cst_240 {dimension_numbers = #tpu.dot_dimension_numbers<[1], [0], [0], [1], [0, 0, 1, 1], [], []>} : vector<16x16xbf16>, vector<16x256xbf16>, vector<16x256xf32> -> vector<16x256xf32>
    %c25 = arith.constant 25 : index
    %c0_241 = arith.constant 0 : index
    %c0_242 = arith.constant 0 : index
    %301 = vector.load %arg16[%c25, %c0_241, %c0_242] : memref<36x16x16xbf16, #tpu.memory_space<vmem>>, vector<1x16x16xbf16>
    %302 = vector.shape_cast %301 : vector<1x16x16xbf16> to vector<16x16xbf16>
    %cst_243 = arith.constant dense<0.000000e+00> : vector<16x256xf32>
    %303 = tpu.matmul %302, %267, %cst_243 {dimension_numbers = #tpu.dot_dimension_numbers<[1], [0], [0], [1], [0, 0, 1, 1], [], []>} : vector<16x16xbf16>, vector<16x256xbf16>, vector<16x256xf32> -> vector<16x256xf32>
    %304 = arith.addf %300, %303 : vector<16x256xf32>
    %c26 = arith.constant 26 : index
    %c0_244 = arith.constant 0 : index
    %c0_245 = arith.constant 0 : index
    %305 = vector.load %arg16[%c26, %c0_244, %c0_245] : memref<36x16x16xbf16, #tpu.memory_space<vmem>>, vector<1x16x16xbf16>
    %306 = vector.shape_cast %305 : vector<1x16x16xbf16> to vector<16x16xbf16>
    %cst_246 = arith.constant dense<0.000000e+00> : vector<16x256xf32>
    %307 = tpu.matmul %306, %275, %cst_246 {dimension_numbers = #tpu.dot_dimension_numbers<[1], [0], [0], [1], [0, 0, 1, 1], [], []>} : vector<16x16xbf16>, vector<16x256xbf16>, vector<16x256xf32> -> vector<16x256xf32>
    %308 = arith.addf %304, %307 : vector<16x256xf32>
    %309 = arith.truncf %286 : vector<16x256xf32> to vector<16x256xbf16>
    %c2_247 = arith.constant 2 : index
    %c0_248 = arith.constant 0 : index
    %c0_249 = arith.constant 0 : index
    %310 = vector.load %arg10[%c2_247, %c0_248, %c0_249] : memref<4x256x256xbf16, #tpu.memory_space<vmem>>, vector<1x256x256xbf16>
    %311 = vector.shape_cast %310 : vector<1x256x256xbf16> to vector<256x256xbf16>
    %cst_250 = arith.constant dense<0.000000e+00> : vector<16x256xf32>
    %312 = tpu.matmul %309, %311, %cst_250 {dimension_numbers = #tpu.dot_dimension_numbers<[1], [0], [0], [1], [0, 0, 1, 1], [], []>} : vector<16x256xbf16>, vector<256x256xbf16>, vector<16x256xf32> -> vector<16x256xf32>
    %313 = arith.addf %297, %312 : vector<16x256xf32>
    %314 = arith.truncf %308 : vector<16x256xf32> to vector<16x256xbf16>
    %c3_251 = arith.constant 3 : index
    %c0_252 = arith.constant 0 : index
    %c0_253 = arith.constant 0 : index
    %315 = vector.load %arg10[%c3_251, %c0_252, %c0_253] : memref<4x256x256xbf16, #tpu.memory_space<vmem>>, vector<1x256x256xbf16>
    %316 = vector.shape_cast %315 : vector<1x256x256xbf16> to vector<256x256xbf16>
    %cst_254 = arith.constant dense<0.000000e+00> : vector<16x256xf32>
    %317 = tpu.matmul %314, %316, %cst_254 {dimension_numbers = #tpu.dot_dimension_numbers<[1], [0], [0], [1], [0, 0, 1, 1], [], []>} : vector<16x256xbf16>, vector<256x256xbf16>, vector<16x256xf32> -> vector<16x256xf32>
    %318 = arith.addf %313, %317 : vector<16x256xf32>
    %c3_255 = arith.constant 3 : index
    %c0_256 = arith.constant 0 : index
    %c0_257 = arith.constant 0 : index
    %319 = vector.load %arg17[%c3_255, %c0_256, %c0_257] : memref<5x16x1xf32, #tpu.memory_space<vmem>>, vector<1x16x1xf32>
    %320 = vector.shape_cast %319 : vector<1x16x1xf32> to vector<16x1xf32>
    %321 = vector.broadcast %320 : vector<16x1xf32> to vector<16x256xf32>
    %322 = arith.mulf %318, %321 : vector<16x256xf32>
    %c3_258 = arith.constant 3 : index
    %c0_259 = arith.constant 0 : index
    %c0_260 = arith.constant 0 : index
    %323 = vector.load %arg18[%c3_258, %c0_259, %c0_260] : memref<5x16x1xf32, #tpu.memory_space<vmem>>, vector<1x16x1xf32>
    %324 = vector.shape_cast %323 : vector<1x16x1xf32> to vector<16x1xf32>
    %325 = vector.broadcast %324 : vector<16x1xf32> to vector<16x256xf32>
    %326 = arith.addf %322, %325 : vector<16x256xf32>
    %cst_261 = arith.constant 0.000000e+00 : f32
    %327 = vector.broadcast %cst_261 : f32 to vector<16x256xf32>
    %328 = arith.maximumf %326, %327 : vector<16x256xf32>
    %c3_262 = arith.constant 3 : index
    %c0_263 = arith.constant 0 : index
    %c0_264 = arith.constant 0 : index
    %329 = vector.load %arg19[%c3_262, %c0_263, %c0_264] : memref<5x32x16xbf16, #tpu.memory_space<vmem>>, vector<1x32x16xbf16>
    %330 = vector.shape_cast %329 : vector<1x32x16xbf16> to vector<32x16xbf16>
    %331 = arith.truncf %328 : vector<16x256xf32> to vector<16x256xbf16>
    %cst_265 = arith.constant dense<0.000000e+00> : vector<32x256xf32>
    %332 = tpu.matmul %330, %331, %cst_265 {dimension_numbers = #tpu.dot_dimension_numbers<[1], [0], [0], [1], [0, 0, 1, 1], [], []>} : vector<32x16xbf16>, vector<16x256xbf16>, vector<32x256xf32> -> vector<32x256xf32>
    %333 = arith.addf %236, %332 : vector<32x256xf32>
    %c0_266 = arith.constant 0 : index
    %c0_267 = arith.constant 0 : index
    %334 = vector.load %arg5[%c0_266, %c0_267] : memref<256x8xbf16, #tpu.memory_space<vmem>>, vector<256x8xbf16>
    %cst_268 = arith.constant dense<0.000000e+00> : vector<16x8xf32>
    %335 = tpu.matmul %2, %334, %cst_268 {dimension_numbers = #tpu.dot_dimension_numbers<[1], [0], [0], [1], [0, 0, 1, 1], [], []>} : vector<16x256xbf16>, vector<256x8xbf16>, vector<16x8xf32> -> vector<16x8xf32>
    %c4_269 = arith.constant 4 : index
    %c0_270 = arith.constant 0 : index
    %c0_271 = arith.constant 0 : index
    %336 = vector.load %arg11[%c4_269, %c0_270, %c0_271] : memref<5x16x1xf32, #tpu.memory_space<vmem>>, vector<1x16x1xf32>
    %337 = vector.shape_cast %336 : vector<1x16x1xf32> to vector<16x1xf32>
    %338 = vector.broadcast %337 : vector<16x1xf32> to vector<16x8xf32>
    %339 = arith.mulf %335, %338 : vector<16x8xf32>
    %c4_272 = arith.constant 4 : index
    %c0_273 = arith.constant 0 : index
    %c0_274 = arith.constant 0 : index
    %340 = vector.load %arg12[%c4_272, %c0_273, %c0_274] : memref<5x16x1xf32, #tpu.memory_space<vmem>>, vector<1x16x1xf32>
    %341 = vector.shape_cast %340 : vector<1x16x1xf32> to vector<16x1xf32>
    %342 = vector.broadcast %341 : vector<16x1xf32> to vector<16x8xf32>
    %343 = arith.addf %339, %342 : vector<16x8xf32>
    %cst_275 = arith.constant 0.000000e+00 : f32
    %344 = vector.broadcast %cst_275 : f32 to vector<16x8xf32>
    %345 = arith.maximumf %343, %344 : vector<16x8xf32>
    %c4_276 = arith.constant 4 : index
    %c0_277 = arith.constant 0 : index
    %c0_278 = arith.constant 0 : index
    %346 = vector.load %arg13[%c4_276, %c0_277, %c0_278] : memref<5x16x16xbf16, #tpu.memory_space<vmem>>, vector<1x16x16xbf16>
    %347 = vector.shape_cast %346 : vector<1x16x16xbf16> to vector<16x16xbf16>
    %348 = arith.truncf %345 : vector<16x8xf32> to vector<16x8xbf16>
    %cst_279 = arith.constant dense<0.000000e+00> : vector<16x8xf32>
    %349 = tpu.matmul %347, %348, %cst_279 {dimension_numbers = #tpu.dot_dimension_numbers<[1], [0], [0], [1], [0, 0, 1, 1], [], []>} : vector<16x16xbf16>, vector<16x8xbf16>, vector<16x8xf32> -> vector<16x8xf32>
    %350 = arith.truncf %349 : vector<16x8xf32> to vector<16x8xbf16>
    %c0_280 = arith.constant 0 : index
    %c0_281 = arith.constant 0 : index
    %351 = vector.load %arg9[%c0_280, %c0_281] : memref<8x256xbf16, #tpu.memory_space<vmem>>, vector<8x256xbf16>
    %cst_282 = arith.constant dense<0.000000e+00> : vector<16x256xf32>
    %352 = tpu.matmul %350, %351, %cst_282 {dimension_numbers = #tpu.dot_dimension_numbers<[1], [0], [0], [1], [0, 0, 1, 1], [], []>} : vector<16x8xbf16>, vector<8x256xbf16>, vector<16x256xf32> -> vector<16x256xf32>
    %353 = arith.addf %352, %318 : vector<16x256xf32>
    %c3_283 = arith.constant 3 : index
    %c0_284 = arith.constant 0 : index
    %c0_285 = arith.constant 0 : index
    %354 = vector.load %arg14[%c3_283, %c0_284, %c0_285] : memref<4x16x1xf32, #tpu.memory_space<vmem>>, vector<1x16x1xf32>
    %355 = vector.shape_cast %354 : vector<1x16x1xf32> to vector<16x1xf32>
    %356 = vector.broadcast %355 : vector<16x1xf32> to vector<16x256xf32>
    %357 = arith.mulf %353, %356 : vector<16x256xf32>
    %c3_286 = arith.constant 3 : index
    %c0_287 = arith.constant 0 : index
    %c0_288 = arith.constant 0 : index
    %358 = vector.load %arg15[%c3_286, %c0_287, %c0_288] : memref<4x16x1xf32, #tpu.memory_space<vmem>>, vector<1x16x1xf32>
    %359 = vector.shape_cast %358 : vector<1x16x1xf32> to vector<16x1xf32>
    %360 = vector.broadcast %359 : vector<16x1xf32> to vector<16x256xf32>
    %361 = arith.addf %357, %360 : vector<16x256xf32>
    %cst_289 = arith.constant 0.000000e+00 : f32
    %362 = vector.broadcast %cst_289 : f32 to vector<16x256xf32>
    %363 = arith.maximumf %361, %362 : vector<16x256xf32>
    %364 = arith.truncf %363 : vector<16x256xf32> to vector<16x256xbf16>
    %c0_290 = arith.constant 0 : index
    %c0_291 = arith.constant 0 : index
    %c0_292 = arith.constant 0 : index
    %365 = vector.load %arg10[%c0_290, %c0_291, %c0_292] : memref<4x256x256xbf16, #tpu.memory_space<vmem>>, vector<1x256x256xbf16>
    %366 = vector.shape_cast %365 : vector<1x256x256xbf16> to vector<256x256xbf16>
    %cst_293 = arith.constant dense<0.000000e+00> : vector<16x256xf32>
    %367 = tpu.matmul %364, %366, %cst_293 {dimension_numbers = #tpu.dot_dimension_numbers<[1], [0], [0], [1], [0, 0, 1, 1], [], []>} : vector<16x256xbf16>, vector<256x256xbf16>, vector<16x256xf32> -> vector<16x256xf32>
    %368 = arith.truncf %367 : vector<16x256xf32> to vector<16x256xbf16>
    %c1_294 = arith.constant 1 : index
    %c0_295 = arith.constant 0 : index
    %c0_296 = arith.constant 0 : index
    %369 = vector.load %arg10[%c1_294, %c0_295, %c0_296] : memref<4x256x256xbf16, #tpu.memory_space<vmem>>, vector<1x256x256xbf16>
    %370 = vector.shape_cast %369 : vector<1x256x256xbf16> to vector<256x256xbf16>
    %cst_297 = arith.constant dense<0.000000e+00> : vector<16x256xf32>
    %371 = tpu.matmul %364, %370, %cst_297 {dimension_numbers = #tpu.dot_dimension_numbers<[1], [0], [0], [1], [0, 0, 1, 1], [], []>} : vector<16x256xbf16>, vector<256x256xbf16>, vector<16x256xf32> -> vector<16x256xf32>
    %372 = arith.truncf %371 : vector<16x256xf32> to vector<16x256xbf16>
    %c27 = arith.constant 27 : index
    %c0_298 = arith.constant 0 : index
    %c0_299 = arith.constant 0 : index
    %373 = vector.load %arg16[%c27, %c0_298, %c0_299] : memref<36x16x16xbf16, #tpu.memory_space<vmem>>, vector<1x16x16xbf16>
    %374 = vector.shape_cast %373 : vector<1x16x16xbf16> to vector<16x16xbf16>
    %cst_300 = arith.constant dense<0.000000e+00> : vector<16x256xf32>
    %375 = tpu.matmul %374, %368, %cst_300 {dimension_numbers = #tpu.dot_dimension_numbers<[1], [0], [0], [1], [0, 0, 1, 1], [], []>} : vector<16x16xbf16>, vector<16x256xbf16>, vector<16x256xf32> -> vector<16x256xf32>
    %c28 = arith.constant 28 : index
    %c0_301 = arith.constant 0 : index
    %c0_302 = arith.constant 0 : index
    %376 = vector.load %arg16[%c28, %c0_301, %c0_302] : memref<36x16x16xbf16, #tpu.memory_space<vmem>>, vector<1x16x16xbf16>
    %377 = vector.shape_cast %376 : vector<1x16x16xbf16> to vector<16x16xbf16>
    %cst_303 = arith.constant dense<0.000000e+00> : vector<16x256xf32>
    %378 = tpu.matmul %377, %364, %cst_303 {dimension_numbers = #tpu.dot_dimension_numbers<[1], [0], [0], [1], [0, 0, 1, 1], [], []>} : vector<16x16xbf16>, vector<16x256xbf16>, vector<16x256xf32> -> vector<16x256xf32>
    %379 = arith.addf %375, %378 : vector<16x256xf32>
    %c29 = arith.constant 29 : index
    %c0_304 = arith.constant 0 : index
    %c0_305 = arith.constant 0 : index
    %380 = vector.load %arg16[%c29, %c0_304, %c0_305] : memref<36x16x16xbf16, #tpu.memory_space<vmem>>, vector<1x16x16xbf16>
    %381 = vector.shape_cast %380 : vector<1x16x16xbf16> to vector<16x16xbf16>
    %cst_306 = arith.constant dense<0.000000e+00> : vector<16x256xf32>
    %382 = tpu.matmul %381, %372, %cst_306 {dimension_numbers = #tpu.dot_dimension_numbers<[1], [0], [0], [1], [0, 0, 1, 1], [], []>} : vector<16x16xbf16>, vector<16x256xbf16>, vector<16x256xf32> -> vector<16x256xf32>
    %383 = arith.addf %379, %382 : vector<16x256xf32>
    %c30 = arith.constant 30 : index
    %c0_307 = arith.constant 0 : index
    %c0_308 = arith.constant 0 : index
    %384 = vector.load %arg16[%c30, %c0_307, %c0_308] : memref<36x16x16xbf16, #tpu.memory_space<vmem>>, vector<1x16x16xbf16>
    %385 = vector.shape_cast %384 : vector<1x16x16xbf16> to vector<16x16xbf16>
    %cst_309 = arith.constant dense<0.000000e+00> : vector<16x256xf32>
    %386 = tpu.matmul %385, %368, %cst_309 {dimension_numbers = #tpu.dot_dimension_numbers<[1], [0], [0], [1], [0, 0, 1, 1], [], []>} : vector<16x16xbf16>, vector<16x256xbf16>, vector<16x256xf32> -> vector<16x256xf32>
    %c31 = arith.constant 31 : index
    %c0_310 = arith.constant 0 : index
    %c0_311 = arith.constant 0 : index
    %387 = vector.load %arg16[%c31, %c0_310, %c0_311] : memref<36x16x16xbf16, #tpu.memory_space<vmem>>, vector<1x16x16xbf16>
    %388 = vector.shape_cast %387 : vector<1x16x16xbf16> to vector<16x16xbf16>
    %cst_312 = arith.constant dense<0.000000e+00> : vector<16x256xf32>
    %389 = tpu.matmul %388, %364, %cst_312 {dimension_numbers = #tpu.dot_dimension_numbers<[1], [0], [0], [1], [0, 0, 1, 1], [], []>} : vector<16x16xbf16>, vector<16x256xbf16>, vector<16x256xf32> -> vector<16x256xf32>
    %390 = arith.addf %386, %389 : vector<16x256xf32>
    %c32 = arith.constant 32 : index
    %c0_313 = arith.constant 0 : index
    %c0_314 = arith.constant 0 : index
    %391 = vector.load %arg16[%c32, %c0_313, %c0_314] : memref<36x16x16xbf16, #tpu.memory_space<vmem>>, vector<1x16x16xbf16>
    %392 = vector.shape_cast %391 : vector<1x16x16xbf16> to vector<16x16xbf16>
    %cst_315 = arith.constant dense<0.000000e+00> : vector<16x256xf32>
    %393 = tpu.matmul %392, %372, %cst_315 {dimension_numbers = #tpu.dot_dimension_numbers<[1], [0], [0], [1], [0, 0, 1, 1], [], []>} : vector<16x16xbf16>, vector<16x256xbf16>, vector<16x256xf32> -> vector<16x256xf32>
    %394 = arith.addf %390, %393 : vector<16x256xf32>
    %c33 = arith.constant 33 : index
    %c0_316 = arith.constant 0 : index
    %c0_317 = arith.constant 0 : index
    %395 = vector.load %arg16[%c33, %c0_316, %c0_317] : memref<36x16x16xbf16, #tpu.memory_space<vmem>>, vector<1x16x16xbf16>
    %396 = vector.shape_cast %395 : vector<1x16x16xbf16> to vector<16x16xbf16>
    %cst_318 = arith.constant dense<0.000000e+00> : vector<16x256xf32>
    %397 = tpu.matmul %396, %368, %cst_318 {dimension_numbers = #tpu.dot_dimension_numbers<[1], [0], [0], [1], [0, 0, 1, 1], [], []>} : vector<16x16xbf16>, vector<16x256xbf16>, vector<16x256xf32> -> vector<16x256xf32>
    %c34 = arith.constant 34 : index
    %c0_319 = arith.constant 0 : index
    %c0_320 = arith.constant 0 : index
    %398 = vector.load %arg16[%c34, %c0_319, %c0_320] : memref<36x16x16xbf16, #tpu.memory_space<vmem>>, vector<1x16x16xbf16>
    %399 = vector.shape_cast %398 : vector<1x16x16xbf16> to vector<16x16xbf16>
    %cst_321 = arith.constant dense<0.000000e+00> : vector<16x256xf32>
    %400 = tpu.matmul %399, %364, %cst_321 {dimension_numbers = #tpu.dot_dimension_numbers<[1], [0], [0], [1], [0, 0, 1, 1], [], []>} : vector<16x16xbf16>, vector<16x256xbf16>, vector<16x256xf32> -> vector<16x256xf32>
    %401 = arith.addf %397, %400 : vector<16x256xf32>
    %c35 = arith.constant 35 : index
    %c0_322 = arith.constant 0 : index
    %c0_323 = arith.constant 0 : index
    %402 = vector.load %arg16[%c35, %c0_322, %c0_323] : memref<36x16x16xbf16, #tpu.memory_space<vmem>>, vector<1x16x16xbf16>
    %403 = vector.shape_cast %402 : vector<1x16x16xbf16> to vector<16x16xbf16>
    %cst_324 = arith.constant dense<0.000000e+00> : vector<16x256xf32>
    %404 = tpu.matmul %403, %372, %cst_324 {dimension_numbers = #tpu.dot_dimension_numbers<[1], [0], [0], [1], [0, 0, 1, 1], [], []>} : vector<16x16xbf16>, vector<16x256xbf16>, vector<16x256xf32> -> vector<16x256xf32>
    %405 = arith.addf %401, %404 : vector<16x256xf32>
    %406 = arith.truncf %383 : vector<16x256xf32> to vector<16x256xbf16>
    %c2_325 = arith.constant 2 : index
    %c0_326 = arith.constant 0 : index
    %c0_327 = arith.constant 0 : index
    %407 = vector.load %arg10[%c2_325, %c0_326, %c0_327] : memref<4x256x256xbf16, #tpu.memory_space<vmem>>, vector<1x256x256xbf16>
    %408 = vector.shape_cast %407 : vector<1x256x256xbf16> to vector<256x256xbf16>
    %cst_328 = arith.constant dense<0.000000e+00> : vector<16x256xf32>
    %409 = tpu.matmul %406, %408, %cst_328 {dimension_numbers = #tpu.dot_dimension_numbers<[1], [0], [0], [1], [0, 0, 1, 1], [], []>} : vector<16x256xbf16>, vector<256x256xbf16>, vector<16x256xf32> -> vector<16x256xf32>
    %410 = arith.addf %394, %409 : vector<16x256xf32>
    %411 = arith.truncf %405 : vector<16x256xf32> to vector<16x256xbf16>
    %c3_329 = arith.constant 3 : index
    %c0_330 = arith.constant 0 : index
    %c0_331 = arith.constant 0 : index
    %412 = vector.load %arg10[%c3_329, %c0_330, %c0_331] : memref<4x256x256xbf16, #tpu.memory_space<vmem>>, vector<1x256x256xbf16>
    %413 = vector.shape_cast %412 : vector<1x256x256xbf16> to vector<256x256xbf16>
    %cst_332 = arith.constant dense<0.000000e+00> : vector<16x256xf32>
    %414 = tpu.matmul %411, %413, %cst_332 {dimension_numbers = #tpu.dot_dimension_numbers<[1], [0], [0], [1], [0, 0, 1, 1], [], []>} : vector<16x256xbf16>, vector<256x256xbf16>, vector<16x256xf32> -> vector<16x256xf32>
    %415 = arith.addf %410, %414 : vector<16x256xf32>
    %c4_333 = arith.constant 4 : index
    %c0_334 = arith.constant 0 : index
    %c0_335 = arith.constant 0 : index
    %416 = vector.load %arg17[%c4_333, %c0_334, %c0_335] : memref<5x16x1xf32, #tpu.memory_space<vmem>>, vector<1x16x1xf32>
    %417 = vector.shape_cast %416 : vector<1x16x1xf32> to vector<16x1xf32>
    %418 = vector.broadcast %417 : vector<16x1xf32> to vector<16x256xf32>
    %419 = arith.mulf %415, %418 : vector<16x256xf32>
    %c4_336 = arith.constant 4 : index
    %c0_337 = arith.constant 0 : index
    %c0_338 = arith.constant 0 : index
    %420 = vector.load %arg18[%c4_336, %c0_337, %c0_338] : memref<5x16x1xf32, #tpu.memory_space<vmem>>, vector<1x16x1xf32>
    %421 = vector.shape_cast %420 : vector<1x16x1xf32> to vector<16x1xf32>
    %422 = vector.broadcast %421 : vector<16x1xf32> to vector<16x256xf32>
    %423 = arith.addf %419, %422 : vector<16x256xf32>
    %cst_339 = arith.constant 0.000000e+00 : f32
    %424 = vector.broadcast %cst_339 : f32 to vector<16x256xf32>
    %425 = arith.maximumf %423, %424 : vector<16x256xf32>
    %c4_340 = arith.constant 4 : index
    %c0_341 = arith.constant 0 : index
    %c0_342 = arith.constant 0 : index
    %426 = vector.load %arg19[%c4_340, %c0_341, %c0_342] : memref<5x32x16xbf16, #tpu.memory_space<vmem>>, vector<1x32x16xbf16>
    %427 = vector.shape_cast %426 : vector<1x32x16xbf16> to vector<32x16xbf16>
    %428 = arith.truncf %425 : vector<16x256xf32> to vector<16x256xbf16>
    %cst_343 = arith.constant dense<0.000000e+00> : vector<32x256xf32>
    %429 = tpu.matmul %427, %428, %cst_343 {dimension_numbers = #tpu.dot_dimension_numbers<[1], [0], [0], [1], [0, 0, 1, 1], [], []>} : vector<32x16xbf16>, vector<16x256xbf16>, vector<32x256xf32> -> vector<32x256xf32>
    %430 = arith.addf %333, %429 : vector<32x256xf32>
    %c0_344 = arith.constant 0 : index
    %c0_345 = arith.constant 0 : index
    %c0_346 = arith.constant 0 : index
    %431 = vector.load %arg23[%c0_344, %c0_345, %c0_346] : memref<1x32x256xf32, #tpu.memory_space<vmem>>, vector<1x32x256xf32>
    %432 = vector.shape_cast %431 : vector<1x32x256xf32> to vector<32x256xf32>
    %433 = vector.shape_cast %430 : vector<32x256xf32> to vector<1x32x256xf32>
    tpu.vector_store %arg23[%c0_344, %c0_345, %c0_346], %433 {strides = array<i32>} : memref<1x32x256xf32, #tpu.memory_space<vmem>>, vector<1x32x256xf32>,
    return
  }
  func.func @transform_0(%arg0: i32) -> (i32, i32, i32) {
    %c0_i32 = arith.constant 0 : i32
    %c0_i32_0 = arith.constant 0 : i32
    %c0_i32_1 = arith.constant 0 : i32
    return %arg0, %c0_i32, %c0_i32_0 : i32, i32, i32
  }
  func.func @transform_1(%arg0: i32) -> (i32, i32) {
    %c0_i32 = arith.constant 0 : i32
    %c0_i32_0 = arith.constant 0 : i32
    %c0_i32_1 = arith.constant 0 : i32
    return %c0_i32, %c0_i32_0 : i32, i32
  }
  func.func @transform_2(%arg0: i32) -> (i32, i32) {
    %c0_i32 = arith.constant 0 : i32
    %c0_i32_0 = arith.constant 0 : i32
    %c0_i32_1 = arith.constant 0 : i32
    return %c0_i32, %c0_i32_0 : i32, i32
  }
  func.func @transform_3(%arg0: i32) -> (i32, i32) {
    %c0_i32 = arith.constant 0 : i32
    %c0_i32_0 = arith.constant 0 : i32
    %c0_i32_1 = arith.constant 0 : i32
    return %c0_i32, %c0_i32_0 : i32, i32
  }
  func.func @transform_4(%arg0: i32) -> (i32, i32) {
    %c0_i32 = arith.constant 0 : i32
    %c0_i32_0 = arith.constant 0 : i32
    %c0_i32_1 = arith.constant 0 : i32
    return %c0_i32, %c0_i32_0 : i32, i32
  }
  func.func @transform_5(%arg0: i32) -> (i32, i32) {
    %c0_i32 = arith.constant 0 : i32
    %c0_i32_0 = arith.constant 0 : i32
    %c0_i32_1 = arith.constant 0 : i32
    return %c0_i32, %c0_i32_0 : i32, i32
  }
  func.func @transform_6(%arg0: i32) -> (i32, i32) {
    %c0_i32 = arith.constant 0 : i32
    %c0_i32_0 = arith.constant 0 : i32
    %c0_i32_1 = arith.constant 0 : i32
    return %c0_i32, %c0_i32_0 : i32, i32
  }
  func.func @transform_7(%arg0: i32) -> (i32, i32) {
    %c0_i32 = arith.constant 0 : i32
    %c0_i32_0 = arith.constant 0 : i32
    %c0_i32_1 = arith.constant 0 : i32
    return %c0_i32, %c0_i32_0 : i32, i32
  }
  func.func @transform_8(%arg0: i32) -> (i32, i32) {
    %c0_i32 = arith.constant 0 : i32
    %c0_i32_0 = arith.constant 0 : i32
    %c0_i32_1 = arith.constant 0 : i32
    return %c0_i32, %c0_i32_0 : i32, i32
  }
  func.func @transform_9(%arg0: i32) -> (i32, i32, i32) {
    %c0_i32 = arith.constant 0 : i32
    %c0_i32_0 = arith.constant 0 : i32
    %c0_i32_1 = arith.constant 0 : i32
    %c0_i32_2 = arith.constant 0 : i32
    return %c0_i32, %c0_i32_0, %c0_i32_1 : i32, i32, i32
  }
  func.func @transform_10(%arg0: i32) -> (i32, i32, i32) {
    %c0_i32 = arith.constant 0 : i32
    %c0_i32_0 = arith.constant 0 : i32
    %c0_i32_1 = arith.constant 0 : i32
    %c0_i32_2 = arith.constant 0 : i32
    return %c0_i32, %c0_i32_0, %c0_i32_1 : i32, i32, i32
  }
  func.func @transform_11(%arg0: i32) -> (i32, i32, i32) {
    %c0_i32 = arith.constant 0 : i32
    %c0_i32_0 = arith.constant 0 : i32
    %c0_i32_1 = arith.constant 0 : i32
    %c0_i32_2 = arith.constant 0 : i32
    return %c0_i32, %c0_i32_0, %c0_i32_1 : i32, i32, i32
  }
  func.func @transform_12(%arg0: i32) -> (i32, i32, i32) {
    %c0_i32 = arith.constant 0 : i32
    %c0_i32_0 = arith.constant 0 : i32
    %c0_i32_1 = arith.constant 0 : i32
    %c0_i32_2 = arith.constant 0 : i32
    return %c0_i32, %c0_i32_0, %c0_i32_1 : i32, i32, i32
  }
  func.func @transform_13(%arg0: i32) -> (i32, i32, i32) {
    %c0_i32 = arith.constant 0 : i32
    %c0_i32_0 = arith.constant 0 : i32
    %c0_i32_1 = arith.constant 0 : i32
    %c0_i32_2 = arith.constant 0 : i32
    return %c0_i32, %c0_i32_0, %c0_i32_1 : i32, i32, i32
  }
  func.func @transform_14(%arg0: i32) -> (i32, i32, i32) {
    %c0_i32 = arith.constant 0 : i32
    %c0_i32_0 = arith.constant 0 : i32
    %c0_i32_1 = arith.constant 0 : i32
    %c0_i32_2 = arith.constant 0 : i32
    return %c0_i32, %c0_i32_0, %c0_i32_1 : i32, i32, i32
  }
  func.func @transform_15(%arg0: i32) -> (i32, i32, i32) {
    %c0_i32 = arith.constant 0 : i32
    %c0_i32_0 = arith.constant 0 : i32
    %c0_i32_1 = arith.constant 0 : i32
    %c0_i32_2 = arith.constant 0 : i32
    return %c0_i32, %c0_i32_0, %c0_i32_1 : i32, i32, i32
  }
  func.func @transform_16(%arg0: i32) -> (i32, i32, i32) {
    %c0_i32 = arith.constant 0 : i32
    %c0_i32_0 = arith.constant 0 : i32
    %c0_i32_1 = arith.constant 0 : i32
    %c0_i32_2 = arith.constant 0 : i32
    return %c0_i32, %c0_i32_0, %c0_i32_1 : i32, i32, i32
  }
  func.func @transform_17(%arg0: i32) -> (i32, i32, i32) {
    %c0_i32 = arith.constant 0 : i32
    %c0_i32_0 = arith.constant 0 : i32
    %c0_i32_1 = arith.constant 0 : i32
    %c0_i32_2 = arith.constant 0 : i32
    return %c0_i32, %c0_i32_0, %c0_i32_1 : i32, i32, i32
  }
  func.func @transform_18(%arg0: i32) -> (i32, i32, i32) {
    %c0_i32 = arith.constant 0 : i32
    %c0_i32_0 = arith.constant 0 : i32
    %c0_i32_1 = arith.constant 0 : i32
    %c0_i32_2 = arith.constant 0 : i32
    return %c0_i32, %c0_i32_0, %c0_i32_1 : i32, i32, i32
  }
  func.func @transform_19(%arg0: i32) -> (i32, i32) {
    %c0_i32 = arith.constant 0 : i32
    %c0_i32_0 = arith.constant 0 : i32
    %c0_i32_1 = arith.constant 0 : i32
    return %c0_i32, %c0_i32_0 : i32, i32
  }
  func.func @transform_20(%arg0: i32) -> (i32, i32) {
    %c0_i32 = arith.constant 0 : i32
    %c0_i32_0 = arith.constant 0 : i32
    %c0_i32_1 = arith.constant 0 : i32
    return %c0_i32, %c0_i32_0 : i32, i32
  }
  func.func @transform_21(%arg0: i32) -> (i32, i32) {
    %c0_i32 = arith.constant 0 : i32
    %c0_i32_0 = arith.constant 0 : i32
    %c0_i32_1 = arith.constant 0 : i32
    return %c0_i32, %c0_i32_0 : i32, i32
  }
  func.func @transform_22(%arg0: i32) -> (i32, i32, i32) {
    %c0_i32 = arith.constant 0 : i32
    %c0_i32_0 = arith.constant 0 : i32
    %c0_i32_1 = arith.constant 0 : i32
    return %arg0, %c0_i32, %c0_i32_0 : i32, i32, i32
  }
}

</mosaic_0001>

<bundles_post_ra>
// kernel: dappm_forward.1
= control target key start
LH: loop header
LB: loop body
LE: loop exit
PB: predicated region body
PF: predicated region fallthrough
CT: control target
= control target key end

     0   :  { %s10685_s0 = inlined_call_operand.vmem [shape: f32[2,16,256], index: 0, kind: input, shape index: {}]   ;;  %s10686_s1 = inlined_call_operand.vmem [shape: bf16[256,128], index: 1, kind: input, shape index: {}]   ;;  %s10687_s2 = inlined_call_operand.vmem [shape: bf16[256,32], index: 2, kind: input, shape index: {}]   ;;  %s10688_s3 = inlined_call_operand.vmem [shape: bf16[256,8], index: 3, kind: input, shape index: {}]   ;;  %s10689_s4 = inlined_call_operand.vmem [shape: bf16[256,8], index: 4, kind: input, shape index: {}]   ;;  %s10690_s5 = inlined_call_operand.vmem [shape: bf16[128,256], index: 5, kind: input, shape index: {}]   ;;  %s10691_s6 = inlined_call_operand.vmem [shape: bf16[32,256], index: 6, kind: input, shape index: {}]   ;;  %s10692_s7 = inlined_call_operand.vmem [shape: bf16[8,256], index: 7, kind: input, shape index: {}]   ;;  %s10693_s8 = inlined_call_operand.vmem [shape: bf16[8,256], index: 8, kind: input, shape index: {}]   ;;  %s10694_s9 = inlined_call_operand.vmem [shape: bf16[4,256,256], index: 9, kind: input, shape index: {}]   ;;  %s10695_s10 = inlined_call_operand.vmem [shape: f32[5,16,1], index: 10, kind: input, shape index: {}]   ;;  %s10696_s11 = inlined_call_operand.vmem [shape: f32[5,16,1], index: 11, kind: input, shape index: {}]   ;;  %s10697_s12 = inlined_call_operand.vmem [shape: bf16[5,16,16], index: 12, kind: input, shape index: {}]   ;;  %s10698_s13 = inlined_call_operand.vmem [shape: f32[4,16,1], index: 13, kind: input, shape index: {}]   ;;  %s10699_s14 = inlined_call_operand.vmem [shape: f32[4,16,1], index: 14, kind: input, shape index: {}]   ;;  %s10700_s15 = inlined_call_operand.vmem [shape: bf16[36,16,16], index: 15, kind: input, shape index: {}]   ;;  %s10701_s16 = inlined_call_operand.vmem [shape: f32[5,16,1], index: 16, kind: input, shape index: {}]   ;;  %s10702_s17 = inlined_call_operand.vmem [shape: f32[5,16,1], index: 17, kind: input, shape index: {}]   ;;  %s10703_s18 = inlined_call_operand.vmem [shape: bf16[5,32,16], index: 18, kind: input, shape index: {}]   ;;  %s10704_s19 = inlined_call_operand.vmem [shape: f32[16,1], index: 19, kind: input, shape index: {}]   ;;  %s10705_s20 = inlined_call_operand.vmem [shape: f32[16,1], index: 20, kind: input, shape index: {}]   ;;  %s10706_s21 = inlined_call_operand.vmem [shape: bf16[32,16], index: 21, kind: input, shape index: {}]   ;;  %s10707_s22 = inlined_call_operand.vmem [shape: f32[2,32,256], index: 22, kind: output, shape index: {}]  }
   0x1   :  { %10878 = sst [smem:[#allocation95_spill]] %s10685_s0 }
   0x2   :  { %10879 = sst [smem:[#allocation96_spill]] %s10686_s1 }
   0x3   :  { %10880 = sst [smem:[#allocation97_spill]] %s10687_s2 }
   0x4   :  { %10881 = sst [smem:[#allocation98_spill]] %s10688_s3  ;;  %s7904_s3 = smov 0  }
   0x5   :  { %10882 = sst [smem:[#allocation99_spill]] %s10689_s4 }
   0x6   :  { %10883 = sst [smem:[#allocation100_spill]] %s10690_s5 }
   0x7   :  { %10884 = sst [smem:[#allocation101_spill]] %s10691_s6 }
   0x8 LB: > { %s6576_s28 = sadd.s32 4294967295, %s7784_s3   ;;  %p6580_p0 = scmp.ge.s32.totalorder %s7784_s3, 1  ;;  %s7784_s3 = sphi %s7904_s3, %s32_s3  }
   0x9   : > { %p612_p1 = scmp.lt.s32.totalorder %s7784_s3, 3 }
   0xb   : > { %p613_p2 = pnand %p6580_p0, %p612_p1 }
   0xd   : > { %616 = sbr.rel (%p613_p2) target bundleno = 5153 (0x1421), region = 108 }
  0x12   : > { %v749_v0 = vld [vmem:[%s10696_s11] sm:$0xff]  ;;  %v10716_v2 = vmov 0   ;;  %v750_v3 = vld [vmem:[%s10696_s11 + $0x8] sm:$0xff]  ;;  %v6612_v13 = vld [vmem:[%s10695_s10 + $0x18] sm:$0xff]  ;;  %p674_p3 = scmp.lt.s32.totalorder %s6576_s28, 1  ;;  %s10885_s24 = sld [smem:[#allocation95_spill]] }
  0x13   : > { %v733_v1 = vld [vmem:[%s10695_s10] sm:$0xff]  ;;  %7282 = vset.pattern.permute.xlu1 %v10716_v2  ;;  %7281 = vset.pattern.permute.xlu0 %v10716_v2  ;;  %v734_v4 = vld [vmem:[%s10695_s10 + $0x8] sm:$0xff]  ;;  %v6611_v14 = vld [vmem:[%s10695_s10 + $0x10] sm:$0xff]  ;;  %vm778_vm0 = vcmask 130048   ;;  %s10886_s0 = sld [smem:[#allocation96_spill]]  ;;  %vm7788_vm1 = vmmov 0  }
  0x14   : > { %753 = vperm.xlu1 %7282, %v749_v0   ;;  %737 = vperm.xlu0 %7281, %v733_v1   ;;  %v826_v5 = vld [vmem:[%s10701_s16 + $0x8] sm:$0xff]  ;;  %v825_v6 = vld [vmem:[%s10701_s16] sm:$0xff]  ;;  %v6614_v15 = vld [vmem:[%s10696_s11 + $0x18] sm:$0xff]  ;;  %s11245_s28 = smov (!%p674_p3, %s6576_s28), 1  ;;  %s10895_s1 = sld [smem:[#allocation100_spill]]  ;;  %vm3294_vm2 = vcmask 261120  }
  0x15   : > { %814 = vmatprep.mubr.bf16.mxu0 %v10716_v2  ;;  %915 = vmatprep.mubr.bf16.mxu1 %v10716_v2  ;;  %v842_v7 = vld [vmem:[%s10702_s17 + $0x8] sm:$0xff]  ;;  %v841_v8 = vld [vmem:[%s10702_s17] sm:$0xff]  ;;  %v6613_v16 = vld [vmem:[%s10696_s11 + $0x10] sm:$0xff]  ;;  %s7148_s23 = sshll.u32 %s11245_s28, 5  ;;  %s10981_s5 = sld [smem:[#allocation97_spill]]  ;;  %vm4454_vm3 = vcmask 1043456  }
  0x16   : > { %v692_v9 = vld [vmem:[%s10704_s19 + $0x8] sm:$0xff]  ;;  %v691_v10 = vld [vmem:[%s10704_s19] sm:$0xff]  ;;  %v6894_v21 = vld [vmem:[%s10701_s16 + $0x18] sm:$0xff]  ;;  %s10989_s30 = sld [smem:[#allocation101_spill]]  ;;  %vm4450_vm4 = vcmask 64512   ;;  %s7149_s29 = sshll.u32 %s11245_s28, 6 }
  0x17   : > { %v708_v11 = vld [vmem:[%s10705_s20 + $0x8] sm:$0xff]  ;;  %v707_v12 = vld [vmem:[%s10705_s20] sm:$0xff]  ;;  %v6893_v22 = vld [vmem:[%s10701_s16 + $0x10] sm:$0xff]  ;;  %s11159_s4 = sld [smem:[#allocation99_spill]]  ;;  %s683_s25 = scalar_lea.vmem %s10707_s22, %s7149_s29 }
  0x18   : > { %758 = vperm.xlu1 %7282, %v750_v3   ;;  %742 = vperm.xlu0 %7281, %v734_v4   ;;  %v1400_v17 = vld [vmem:[%s10698_s13 + $0x8] sm:$0xff]  ;;  %v1399_v18 = vld [vmem:[%s10698_s13] sm:$0xff]  ;;  %v6896_v23 = vld [vmem:[%s10702_s17 + $0x18] sm:$0xff]  ;;  %s678_s6 = scalar_lea.vmem %s10885_s24, %s7148_s23  ;;  %s11075_s23 = sld [smem:[#allocation98_spill]] }
  0x19   : > { %v1416_v19 = vld [vmem:[%s10699_s14 + $0x8] sm:$0xff]  ;;  %v1415_v20 = vld [vmem:[%s10699_s14] sm:$0xff]  ;;  %v6895_v24 = vld [vmem:[%s10702_s17 + $0x10] sm:$0xff] }
  0x1a   : > { %v6922_v25 = vld [vmem:[%s10695_s10 + $0x28] sm:$0xff]  ;;  %v6921_v26 = vld [vmem:[%s10695_s10 + $0x20] sm:$0xff]  ;;  %v6935_v29 = vld [vmem:[%s10698_s13 + $0x18] sm:$0xff] }
  0x1b   : > { %v6924_v27 = vld [vmem:[%s10696_s11 + $0x28] sm:$0xff]  ;;  %v6923_v28 = vld [vmem:[%s10696_s11 + $0x20] sm:$0xff]  ;;  %v6934_v30 = vld [vmem:[%s10698_s13 + $0x10] sm:$0xff] }
  0x1c   : > { %834 = vperm.xlu1 %7282, %v826_v5   ;;  %829 = vperm.xlu0 %7281, %v825_v6   ;;  %v6937_v31 = vld [vmem:[%s10699_s14 + $0x18] sm:$0xff]  ;;  %v6936_v32 = vld [vmem:[%s10699_s14 + $0x10] sm:$0xff]  ;;  %v6975_v33 = vld [vmem:[%s10701_s16 + $0x28] sm:$0xff] }
  0x1d   : > { %v6974_v34 = vld [vmem:[%s10701_s16 + $0x20] sm:$0xff]  ;;  %v6977_v35 = vld [vmem:[%s10702_s17 + $0x28] sm:$0xff]  ;;  %v7003_v37 = vld [vmem:[%s10695_s10 + $0x38] sm:$0xff] }
  0x1e   : > { %v6976_v36 = vld [vmem:[%s10702_s17 + $0x20] sm:$0xff]  ;;  %v7002_v38 = vld [vmem:[%s10695_s10 + $0x30] sm:$0xff]  ;;  %v7005_v39 = vld [vmem:[%s10696_s11 + $0x38] sm:$0xff] }
  0x1f   : > { %v7004_v40 = vld [vmem:[%s10696_s11 + $0x30] sm:$0xff]  ;;  %v7015_v41 = vld [vmem:[%s10698_s13 + $0x28] sm:$0xff]  ;;  %v7014_v42 = vld [vmem:[%s10698_s13 + $0x20] sm:$0xff] }
  0x20   : > { %850 = vperm.xlu1 %7282, %v842_v7   ;;  %845 = vperm.xlu0 %7281, %v841_v8   ;;  %v7017_v43 = vld [vmem:[%s10699_s14 + $0x28] sm:$0xff]  ;;  %v7016_v44 = vld [vmem:[%s10699_s14 + $0x20] sm:$0xff]  ;;  %v7055_v45 = vld [vmem:[%s10701_s16 + $0x38] sm:$0xff] }
  0x21   : > { %v7054_v46 = vld [vmem:[%s10701_s16 + $0x30] sm:$0xff]  ;;  %v7057_v47 = vld [vmem:[%s10702_s17 + $0x38] sm:$0xff]  ;;  %v7083_v49 = vld [vmem:[%s10695_s10 + $0x48] sm:$0xff] }
  0x22   : > { %v7056_v48 = vld [vmem:[%s10702_s17 + $0x30] sm:$0xff]  ;;  %v7082_v50 = vld [vmem:[%s10695_s10 + $0x40] sm:$0xff]  ;;  %v7085_v51 = vld [vmem:[%s10696_s11 + $0x48] sm:$0xff] }
  0x23   : > { %v7084_v52 = vld [vmem:[%s10696_s11 + $0x40] sm:$0xff]  ;;  %v7095_v53 = vld [vmem:[%s10698_s13 + $0x38] sm:$0xff]  ;;  %v7094_v54 = vld [vmem:[%s10698_s13 + $0x30] sm:$0xff] }
  0x24   : > { %700 = vperm.xlu1 %7282, %v692_v9   ;;  %695 = vperm.xlu0 %7281, %v691_v10   ;;  %v7097_v55 = vld [vmem:[%s10699_s14 + $0x38] sm:$0xff]  ;;  %v7096_v56 = vld [vmem:[%s10699_s14 + $0x30] sm:$0xff]  ;;  %v7135_v57 = vld [vmem:[%s10701_s16 + $0x48] sm:$0xff] }
  0x25   : > { %v7134_v58 = vld [vmem:[%s10701_s16 + $0x40] sm:$0xff]  ;;  %v7137_v59 = vld [vmem:[%s10702_s17 + $0x48] sm:$0xff]  ;;  %v8110_v1 = vld [vmem:[%s678_s6 + $0x10] sm:$0xff] }
  0x26   : > { %v7136_v60 = vld [vmem:[%s10702_s17 + $0x40] sm:$0xff]  ;;  %v8108_v62 = vld [vmem:[%s678_s6 + $0x8] sm:$0xff]  ;;  %v8112_v3 = vld [vmem:[%s678_s6 + $0x18] sm:$0xff] }
  0x27   : > { %v8106_v61 = vld [vmem:[%s678_s6] sm:$0xff] }
  0x28   : > { %716 = vperm.xlu1 %7282, %v708_v11   ;;  %711 = vperm.xlu0 %7281, %v707_v12  }
  0x2c   : > { %1184 = vperm.xlu1 %7282, %v6612_v13   ;;  %1179 = vperm.xlu0 %7281, %v6611_v14  }
  0x30   : > { %1199 = vperm.xlu1 %7282, %v6614_v15   ;;  %1194 = vperm.xlu0 %7281, %v6613_v16  }
  0x34   : > { %1408 = vperm.xlu1 %7282, %v1400_v17   ;;  %1403 = vperm.xlu0 %7281, %v1399_v18  }
  0x38   : > { %1424 = vperm.xlu1 %7282, %v1416_v19   ;;  %1419 = vperm.xlu0 %7281, %v1415_v20  }
  0x3c   : > { %2903 = vperm.xlu1 %7282, %v6894_v21   ;;  %2898 = vperm.xlu0 %7281, %v6893_v22   ;;  %v7283_v22 = vld [vmem:[%s10697_s12] sm:$0xff]  }
  0x40   : > { %2920 = vperm.xlu1 %7282, %v6896_v23   ;;  %2915 = vperm.xlu0 %7281, %v6895_v24  }
  0x44   : > { %3194 = vperm.xlu1 %7282, %v6922_v25   ;;  %3189 = vperm.xlu0 %7281, %v6921_v26  }
  0x48   : > { %3209 = vperm.xlu1 %7282, %v6924_v27   ;;  %3204 = vperm.xlu0 %7281, %v6923_v28  }
  0x4c   : > { %3351 = vperm.xlu1 %7282, %v6935_v29   ;;  %3346 = vperm.xlu0 %7281, %v6934_v30  }
  0x50   : > { %3368 = vperm.xlu1 %7282, %v6937_v31   ;;  %3363 = vperm.xlu0 %7281, %v6936_v32  }
  0x54   : > { %4077 = vperm.xlu1 %7282, %v6975_v33   ;;  %4072 = vperm.xlu0 %7281, %v6974_v34  }
  0x58   : > { %4094 = vperm.xlu1 %7282, %v6977_v35   ;;  %4089 = vperm.xlu0 %7281, %v6976_v36  }
  0x5c   : > { %4368 = vperm.xlu1 %7282, %v7003_v37   ;;  %4363 = vperm.xlu0 %7281, %v7002_v38  }
  0x60   : > { %4383 = vperm.xlu1 %7282, %v7005_v39   ;;  %4378 = vperm.xlu0 %7281, %v7004_v40  }
  0x64   : > { %4514 = vperm.xlu1 %7282, %v7015_v41   ;;  %4509 = vperm.xlu0 %7281, %v7014_v42  }
  0x68   : > { %4531 = vperm.xlu1 %7282, %v7017_v43   ;;  %4526 = vperm.xlu0 %7281, %v7016_v44   ;;  %v7285_v43 = vld [vmem:[%s10706_s21] sm:$0xff]   ;;  %v7297_v44 = vld [vmem:[%s10706_s21 + $0x8] sm:$0xff]  }
  0x6c   : > { %5240 = vperm.xlu1 %7282, %v7055_v45   ;;  %5235 = vperm.xlu0 %7281, %v7054_v46  }
  0x70   : > { %5257 = vperm.xlu1 %7282, %v7057_v47   ;;  %5252 = vperm.xlu0 %7281, %v7056_v48  }
  0x74   : > { %5531 = vperm.xlu1 %7282, %v7083_v49   ;;  %5526 = vperm.xlu0 %7281, %v7082_v50  }
  0x78   : > { %5546 = vperm.xlu1 %7282, %v7085_v51   ;;  %5541 = vperm.xlu0 %7281, %v7084_v52  }
  0x7c   : > { %5675 = vperm.xlu1 %7282, %v7095_v53   ;;  %5670 = vperm.xlu0 %7281, %v7094_v54  }
  0x80   : > { %5692 = vperm.xlu1 %7282, %v7097_v55   ;;  %5687 = vperm.xlu0 %7281, %v7096_v56  }
  0x84   : > { %6401 = vperm.xlu1 %7282, %v7135_v57   ;;  %6396 = vperm.xlu0 %7281, %v7134_v58  }
  0x88   : > { %6418 = vperm.xlu1 %7282, %v7137_v59   ;;  %6413 = vperm.xlu0 %7281, %v7136_v60  }
  0x8f   : > { %v754_v63 = vpop.permute.xlu1 %753  ;;  %v738_v0 = vpop.permute.xlu0 %737 }
  0x90   : > { %v745_v4 = vmul.f32 %v738_v0, %v8106_v61  ;;  %v746_v5 = vmul.f32 %v738_v0, %v8108_v62  ;;  %v7286_v0 = vld [vmem:[%s10886_s0 + $0x78] sm:$0xff]  }
  0x92   : > { %v761_v6 = vadd.f32 %v754_v63, %v745_v4  ;;  %v762_v7 = vadd.f32 %v754_v63, %v746_v5  ;;  %v7284_v5 = vld [vmem:[%s10703_s18] sm:$0xff]  }
  0x93   : > { %v759_v8 = vpop.permute.xlu1 %758  ;;  %v743_v9 = vpop.permute.xlu0 %742 }
  0x94   : > { %v747_v10 = vmul.f32 %v743_v9, %v8110_v1  ;;  %v748_v11 = vmul.f32 %v743_v9, %v8112_v3  ;;  %v766_v12 = vmax.f32 %v762_v7, 0.0  ;;  %v765_v13 = vmax.f32 %v761_v6, 0.0  ;;  %v7287_v6 = vld [vmem:[%s10886_s0 + $0x38] sm:$0xff]   ;;  %v7288_v7 = vld [vmem:[%s10886_s0 + $0x70] sm:$0xff]   ;;  %v7290_v9 = vld [vmem:[%s10886_s0 + $0x68] sm:$0xff]  }
  0x96   : > { %v763_v14 = vadd.f32 %v759_v8, %v747_v10  ;;  %v764_v15 = vadd.f32 %v759_v8, %v748_v11  ;;  %v7289_v8 = vld [vmem:[%s10886_s0 + $0x30] sm:$0xff]   ;;  %v7296_v10 = vld [vmem:[%s10703_s18 + $0x8] sm:$0xff]   ;;  %v8173_v11 = vpack.c.bf16 %v8112_v3, %v8108_v62 }
  0x97   : > { %v835_v16 = vpop.permute.xlu1 %834  ;;  %v830_v17 = vpop.permute.xlu0 %829 }
  0x98   : > { %v768_v18 = vmax.f32 %v764_v15, 0.0  ;;  %v767_v19 = vmax.f32 %v763_v14, 0.0  ;;  %v7293_v14 = vld [vmem:[%s10886_s0 + $0x20] sm:$0xff]   ;;  %v7298_v15 = vld [vmem:[%s10886_s0 + $0x50] sm:$0xff]  }
  0x9a   : > { %v772_v20 = vpack.c.bf16 %v768_v18, %v766_v12  ;;  %v771_v21 = vpack.c.bf16 %v767_v19, %v765_v13  ;;  %v7291_v12 = vld [vmem:[%s10886_s0 + $0x28] sm:$0xff]   ;;  %v7292_v13 = vld [vmem:[%s10886_s0 + $0x60] sm:$0xff]  }
  0x9b   : > { %v851_v23 = vpop.permute.xlu1 %850  ;;  %v846_v24 = vpop.permute.xlu0 %845  ;;  %v7301_v18 = vld [vmem:[%s10886_s0 + $0x8] sm:$0xff]   ;;  %v7302_v19 = vld [vmem:[%s10886_s0 + $0x40] sm:$0xff]  }
  0x9c   : > { %796 = vmatprep.subr.bf16.mxu0 %v772_v20  ;;  %v7303_v20 = vld [vmem:[%s10886_s0] sm:$0xff]  }
  0x9d   : > { %797 = vmatpush1.bf16.msra.mxu0 %v771_v21  ;;  %v8212_v21 = vpack.c.bf16 %v8110_v1, %v8106_v61 }
  0x9f   : > { %v701_v25 = vpop.permute.xlu1 %700  ;;  %v696_v26 = vpop.permute.xlu0 %695 }
  0xa0   : > { %6586 = vmatmul.mubr.msk.bf16.vlgmr.msra.gmra.mxu0 %vm778_vm0, %v7283_v22  ;;  %v705_v27 = vmul.f32 %v701_v25, %v8110_v1  ;;  %v706_v28 = vmul.f32 %v701_v25, %v8112_v3  ;;  %v703_v29 = vmul.f32 %v696_v26, %v8106_v61  ;;  %v704_v30 = vmul.f32 %v696_v26, %v8108_v62  ;;  %v7294_v62 = vld [vmem:[%s10886_s0 + $0x58] sm:$0xff]  }
  0xa1   : > { %984 = vmatprep.mubr.bf16.mxu0 %v10716_v2  ;;  %v7295_v3 = vld [vmem:[%s10886_s0 + $0x18] sm:$0xff]   ;;  %v10714_v22 = vmov 0.0  }
  0xa3   : > { %v717_v31 = vpop.permute.xlu1 %716  ;;  %v712_v32 = vpop.permute.xlu0 %711 }
  0xa4   : > { %v721_v33 = vadd.f32 %v717_v31, %v705_v27  ;;  %v722_v34 = vadd.f32 %v717_v31, %v706_v28  ;;  %v719_v35 = vadd.f32 %v712_v32, %v703_v29  ;;  %v720_v36 = vadd.f32 %v712_v32, %v704_v30 }
  0xa6   : > { %v725_v37 = vmax.f32 %v721_v33, 0.0  ;;  %v726_v38 = vmax.f32 %v722_v34, 0.0  ;;  %v723_v39 = vmax.f32 %v719_v35, 0.0  ;;  %v724_v40 = vmax.f32 %v720_v36, 0.0 }
  0xa7   : > { %v1180_v30 = vpop.permute.xlu0 %1179  ;;  %v1185_v33 = vpop.permute.xlu1 %1184 }
  0xa8   : > { %v731_v41 = vpack.c.bf16 %v725_v37, %v723_v39  ;;  %v732_v42 = vpack.c.bf16 %v726_v38, %v724_v40 }
  0xaa   : > { %966 = vmatprep.subr.bf16.mxu0 %v732_v42 }
  0xab   : > { %967 = vmatpush1.bf16.msra.mxu0 %v731_v41  ;;  %v1195_v38 = vpop.permute.xlu0 %1194  ;;  %v1200_v41 = vpop.permute.xlu1 %1199 }
  0xac   : > { %7246 = vmatprep.subr.bf16.mxu0 %v10714_v22 }
  0xae   : > { %6593 = vmatmul.mubr.msk.bf16.vlgmr.msra.gmra.mxu0 %vm778_vm0, %v7285_v43 }
  0xaf   : > { %994 = vmatprep.mubr.bf16.mxu0 %v10716_v2 }
  0xb6   : > { %6594 = vmatmul.mubr.msk.bf16.gmra.mxu0 %vm778_vm0, %v7297_v44 }
  0xb7   : > { %7248 = vmatprep.mubr.msk.bf16.mxu0 %vm7788_vm1, %v10714_v22 }
 0x160   : > { %v8136_v45 = vpop.f32.mrf.mxu0 }
 0x161   : > { %v837_v48 = vmul.f32 %v830_v17, %v8136_v45 }
 0x162   : > { %v8138_v46 = vpop.f32.mrf.mxu0 }
 0x163   : > { %v838_v47 = vmul.f32 %v830_v17, %v8138_v46  ;;  %v853_v55 = vadd.f32 %v846_v24, %v837_v48  ;;  %v7300_v17 = vld [vmem:[%s10886_s0 + $0x48] sm:$0xff]  }
 0x164   : > { %v8142_v49 = vpop.f32.mrf.mxu0 }
 0x165   : > { %v839_v50 = vmul.f32 %v835_v16, %v8142_v49  ;;  %v854_v54 = vadd.f32 %v846_v24, %v838_v47  ;;  %v857_v60 = vmax.f32 %v853_v55, 0.0  ;;  %v7307_v47 = vld [vmem:[%s10895_s1 + $0x74] ss:$8 sps:$4 sm:$0xff]  }
 0x166   : > { %v8145_v51 = vpop.f32.mrf.mxu0  ;;  %v7313_v55 = vld [vmem:[%s10895_s1 + $0x54] ss:$8 sps:$4 sm:$0xff]  }
 0x167   : > { %v855_v52 = vadd.f32 %v851_v23, %v839_v50  ;;  %v840_v53 = vmul.f32 %v835_v16, %v8145_v51  ;;  %v858_v58 = vmax.f32 %v854_v54, 0.0  ;;  %v7299_v16 = vld [vmem:[%s10886_s0 + $0x10] sm:$0xff]   ;;  %v7304_v50 = vld [vmem:[%s10697_s12 + $0x8] sm:$0xff]  }
 0x168   : > { %v7308_v54 = vld [vmem:[%s10895_s1 + $0x60] ss:$8 sps:$4 sm:$0xff]  }
 0x169   : > { %v856_v56 = vadd.f32 %v851_v23, %v840_v53  ;;  %v859_v57 = vmax.f32 %v855_v52, 0.0  ;;  %v7305_v52 = vld [vmem:[%s10895_s1 + $0x70] ss:$8 sps:$4 sm:$0xff]   ;;  %v7310_v53 = vld [vmem:[%s10895_s1 + $0x64] ss:$8 sps:$4 sm:$0xff]  }
 0x16b   : > { %v860_v59 = vmax.f32 %v856_v56, 0.0  ;;  %v865_v4 = vpack.c.bf16 %v859_v57, %v857_v60  ;;  %v7311_v56 = vld [vmem:[%s10895_s1 + $0x50] ss:$8 sps:$4 sm:$0xff]   ;;  %v7316_v57 = vld [vmem:[%s10895_s1 + $0x44] ss:$8 sps:$4 sm:$0xff]  }
 0x16c   : > { %v7317_v60 = vld [vmem:[%s10895_s1 + $0x30] ss:$8 sps:$4 sm:$0xff]  }
 0x16d   : > { %v866_v63 = vpack.c.bf16 %v860_v59, %v858_v58  ;;  %v7314_v58 = vld [vmem:[%s10895_s1 + $0x40] ss:$8 sps:$4 sm:$0xff]   ;;  %v7319_v59 = vld [vmem:[%s10895_s1 + $0x34] ss:$8 sps:$4 sm:$0xff]  }
 0x16f   : > { %897 = vmatprep.subr.bf16.mxu1 %v866_v63  ;;  %v7322_v63 = vld [vmem:[%s10895_s1 + $0x24] ss:$8 sps:$4 sm:$0xff]  }
 0x170   : > { %898 = vmatpush1.bf16.msra.mxu1 %v865_v4  ;;  %v7325_v4 = vld [vmem:[%s10895_s1 + $0x14] ss:$8 sps:$4 sm:$0xff]  }
 0x171   : > { %7150 = vmatprep.subr.bf16.mxu1 %v7286_v0  ;;  %v7320_v0 = vld [vmem:[%s10895_s1 + $0x20] ss:$8 sps:$4 sm:$0xff]  }
 0x173   : > { %6589 = vmatmul.mubr.msk.bf16.vlgmr.msra.gmra.mxu1 %vm778_vm0, %v7284_v5  ;;  %v7323_v5 = vld [vmem:[%s10895_s1 + $0x10] ss:$8 sps:$4 sm:$0xff]  }
 0x174   : > { %7151 = vmatpush3.bf16.msra.mxu1 %v7287_v6  ;;  %925 = vmatprep.mubr.bf16.mxu1 %v10716_v2  ;;  %v7328_v6 = vld [vmem:[%s10895_s1 + $0x4] ss:$8 sps:$4 sm:$0xff]  }
 0x175   : > { %7152 = vmatprep.subr.bf16.mxu1 %v7288_v7  ;;  %v7326_v7 = vld [vmem:[%s10895_s1] ss:$8 sps:$4 sm:$0xff]  }
 0x178   : > { %7153 = vmatpush3.bf16.msra.mxu1 %v7289_v8  ;;  %v7329_v8 = vld [vmem:[%s10694_s9 + $0x74] ss:$8 sps:$4 sm:$0xff]  }
 0x179   : > { %7154 = vmatprep.subr.bf16.mxu1 %v7290_v9  ;;  %v8293_v9 = vld [vmem:[%s10694_s9 + $0x174] ss:$8 sps:$4 sm:$0xff]  }
 0x17b   : > { %6590 = vmatmul.mubr.msk.bf16.gmra.mxu1 %vm778_vm0, %v7296_v10  ;;  %v7333_v10 = vld [vmem:[%s10694_s9 + $0x70] ss:$8 sps:$4 sm:$0xff]  }
 0x17c   : > { %7155 = vmatpush3.bf16.msra.mxu1 %v7291_v12  ;;  %1165 = vmatprep.mubr.bf16.mxu1 %v8173_v11  ;;  %v7335_v12 = vld [vmem:[%s10694_s9 + $0x64] ss:$8 sps:$4 sm:$0xff]  }
 0x17d   : > { %7156 = vmatprep.subr.bf16.mxu1 %v7292_v13  ;;  %v7339_v13 = vld [vmem:[%s10694_s9 + $0x60] ss:$8 sps:$4 sm:$0xff]  }
 0x180   : > { %7157 = vmatpush3.bf16.msra.mxu1 %v7293_v14  ;;  %v7341_v14 = vld [vmem:[%s10694_s9 + $0x54] ss:$8 sps:$4 sm:$0xff]  }
 0x181   : > { %7158 = vmatprep.subr.bf16.mxu1 %v7294_v62  ;;  %v7345_v62 = vld [vmem:[%s10694_s9 + $0x50] ss:$8 sps:$4 sm:$0xff]  }
 0x184   : > { %7159 = vmatpush3.bf16.msra.mxu1 %v7295_v3  ;;  %v7347_v3 = vld [vmem:[%s10694_s9 + $0x44] ss:$8 sps:$4 sm:$0xff]  }
 0x185   : > { %7160 = vmatprep.subr.bf16.mxu1 %v7298_v15  ;;  %v7351_v15 = vld [vmem:[%s10694_s9 + $0x40] ss:$8 sps:$4 sm:$0xff]  }
 0x188   : > { %7161 = vmatpush3.bf16.msra.mxu1 %v7299_v16  ;;  %v7353_v16 = vld [vmem:[%s10694_s9 + $0x34] ss:$8 sps:$4 sm:$0xff]  }
 0x189   : > { %7162 = vmatprep.subr.bf16.mxu1 %v7300_v17  ;;  %v7357_v17 = vld [vmem:[%s10694_s9 + $0x30] ss:$8 sps:$4 sm:$0xff]  }
 0x18c   : > { %7163 = vmatpush3.bf16.msra.mxu1 %v7301_v18  ;;  %v7359_v18 = vld [vmem:[%s10694_s9 + $0x24] ss:$8 sps:$4 sm:$0xff]  }
 0x18d   : > { %7164 = vmatprep.subr.bf16.mxu1 %v7302_v19  ;;  %v7363_v19 = vld [vmem:[%s10694_s9 + $0x20] ss:$8 sps:$4 sm:$0xff]  }
 0x190   : > { %7165 = vmatpush3.bf16.msra.mxu1 %v7303_v20  ;;  %v7365_v20 = vld [vmem:[%s10694_s9 + $0x14] ss:$8 sps:$4 sm:$0xff]  }
 0x191   : > { %1629 = vmatprep.subr.bf16.mxu1 %v7329_v8  ;;  %v8443_v8 = vld [vmem:[%s10694_s9 + $0x120] ss:$8 sps:$4 sm:$0xff]  }
 0x193   : > { %1166 = vmatmul.mubr.bf16.vlgmr.msra.gmra.mxu1 %v8212_v21 }
 0x194   : > { %1630 = vmatpush1.bf16.msra.mxu1 %v7333_v10  ;;  %v8449_v10 = vld [vmem:[%s10694_s9 + $0x114] ss:$8 sps:$4 sm:$0xff]  }
 0x195   : > { %1631 = vmatprep.subr.bf16.mxu1 %v7335_v12  ;;  %v8455_v12 = vld [vmem:[%s10694_s9 + $0x110] ss:$8 sps:$4 sm:$0xff]  }
 0x198   : > { %1632 = vmatpush1.bf16.msra.mxu1 %v7339_v13  ;;  %v8461_v13 = vld [vmem:[%s10694_s9 + $0x104] ss:$8 sps:$4 sm:$0xff]  }
 0x199   : > { %1633 = vmatprep.subr.bf16.mxu1 %v7341_v14  ;;  %v8467_v14 = vld [vmem:[%s10694_s9 + $0x100] ss:$8 sps:$4 sm:$0xff]  }
 0x19c   : > { %1634 = vmatpush1.bf16.msra.mxu1 %v7345_v62  ;;  %v8473_v62 = vld [vmem:[%s10694_s9 + $0x1f4] ss:$8 sps:$4 sm:$0xff]  }
 0x19d   : > { %1635 = vmatprep.subr.bf16.mxu1 %v7347_v3  ;;  %v8479_v3 = vld [vmem:[%s10694_s9 + $0x1f0] ss:$8 sps:$4 sm:$0xff]  }
 0x1a0   : > { %1636 = vmatpush1.bf16.msra.mxu1 %v7351_v15  ;;  %v8485_v15 = vld [vmem:[%s10694_s9 + $0x1e4] ss:$8 sps:$4 sm:$0xff]  }
 0x1a1   : > { %1637 = vmatprep.subr.bf16.mxu1 %v7353_v16  ;;  %v8491_v16 = vld [vmem:[%s10694_s9 + $0x1e0] ss:$8 sps:$4 sm:$0xff]  }
 0x1a4   : > { %1638 = vmatpush1.bf16.msra.mxu1 %v7357_v17  ;;  %v8497_v17 = vld [vmem:[%s10694_s9 + $0x1d4] ss:$8 sps:$4 sm:$0xff]  }
 0x1a5   : > { %1639 = vmatprep.subr.bf16.mxu1 %v7359_v18  ;;  %v8503_v18 = vld [vmem:[%s10694_s9 + $0x1d0] ss:$8 sps:$4 sm:$0xff]  }
 0x1a8   : > { %1640 = vmatpush1.bf16.msra.mxu1 %v7363_v19  ;;  %v8509_v19 = vld [vmem:[%s10694_s9 + $0x1c4] ss:$8 sps:$4 sm:$0xff]  }
 0x1a9   : > { %1641 = vmatprep.subr.bf16.mxu1 %v7365_v20  ;;  %v8515_v20 = vld [vmem:[%s10694_s9 + $0x1c0] ss:$8 sps:$4 sm:$0xff]  }
 0x233   : > { %v8218_v23 = vpop.f32.mrf.mxu1 }
 0x234   : > { %10887 = vst [vmem:[#allocation2_spill] sm:$0xff] %v8218_v23 }
 0x235   : > { %v8220_v24 = vpop.f32.mrf.mxu1 }
 0x236   : > { %10888 = vst [vmem:[#allocation3_spill] sm:$0xff] %v8220_v24 }
 0x237   : > { %v8222_v25 = vpop.f32.mrf.mxu1 }
 0x238   : > { %10889 = vst [vmem:[#allocation4_spill] sm:$0xff] %v8222_v25 }
 0x239   : > { %v8224_v26 = vpop.f32.mrf.mxu1 }
 0x23a   : > { %10890 = vst [vmem:[#allocation5_spill] sm:$0xff] %v8224_v26 }
 0x23b   : > { %v8226_v61 = vpop.f32.mrf.mxu1 }
 0x23c   : > { %10891 = vst [vmem:[#allocation6_spill] sm:$0xff] %v8226_v61 }
 0x23d   : > { %v8228_v1 = vpop.f32.mrf.mxu1 }
 0x23e   : > { %10892 = vst [vmem:[#allocation7_spill] sm:$0xff] %v8228_v1 }
 0x23f   : > { %v8230_v27 = vpop.f32.mrf.mxu1 }
 0x240   : > { %10893 = vst [vmem:[#allocation8_spill] sm:$0xff] %v8230_v27 }
 0x241   : > { %v8232_v28 = vpop.f32.mrf.mxu1 }
 0x242   : > { %10894 = vst [vmem:[#allocation9_spill] sm:$0xff] %v8232_v28 }
 0x253   : > { %v7166_v29 = vpop.f32.mrf.mxu1 }
 0x255   : > { %v7167_v31 = vpop.f32.mrf.mxu1 }
 0x256   : > { %v7168_v32 = vadd.f32 %v7167_v31, %v7166_v29  ;;  %v7369_v29 = vld [vmem:[%s10694_s9 + $0x10] ss:$8 sps:$4 sm:$0xff]   ;;  %v7375_v31 = vld [vmem:[%s10694_s9] ss:$8 sps:$4 sm:$0xff]  }
 0x257   : > { %v7169_v34 = vpop.f32.mrf.mxu1  ;;  %1642 = vmatpush1.bf16.msra.mxu1 %v7369_v29  ;;  %v8522_v29 = vld [vmem:[%s10694_s9 + $0xb4] ss:$8 sps:$4 sm:$0xff]  }
 0x258   : > { %v1187_v35 = vmul.f32 %v7168_v32, %v1180_v30  ;;  %v7371_v30 = vld [vmem:[%s10694_s9 + $0x4] ss:$8 sps:$4 sm:$0xff]   ;;  %v7377_v32 = vld [vmem:[%s10694_s9 + $0xf4] ss:$8 sps:$4 sm:$0xff]   ;;  %10904 = vst [vmem:[#allocation18_spill] sm:$0xff] %v8522_v29 }
 0x259   : > { %v7170_v36 = vpop.f32.mrf.mxu1  ;;  %1643 = vmatprep.subr.bf16.mxu1 %v7371_v30  ;;  %v8527_v30 = vld [vmem:[%s10694_s9 + $0x1b4] ss:$8 sps:$4 sm:$0xff]  }
 0x25a   : > { %v7171_v37 = vadd.f32 %v7170_v36, %v7169_v34  ;;  %v1202_v39 = vadd.f32 %v1195_v38, %v1187_v35  ;;  %v7383_v34 = vld [vmem:[%s10694_s9 + $0xe4] ss:$8 sps:$4 sm:$0xff]   ;;  %v7387_v35 = vld [vmem:[%s10694_s9 + $0xe0] ss:$8 sps:$4 sm:$0xff]   ;;  %v7389_v36 = vld [vmem:[%s10694_s9 + $0xd4] ss:$8 sps:$4 sm:$0xff]  }
 0x25b   : > { %1644 = vmatpush1.bf16.msra.mxu1 %v7375_v31  ;;  %v7395_v38 = vld [vmem:[%s10694_s9 + $0xc4] ss:$8 sps:$4 sm:$0xff]   ;;  %v8532_v31 = vld [vmem:[%s10694_s9 + $0xb0] ss:$8 sps:$4 sm:$0xff]  }
 0x25c   : > { %v1188_v40 = vmul.f32 %v7171_v37, %v1185_v33  ;;  %v1204_v43 = vmax.f32 %v1202_v39, 0.0  ;;  %v7381_v33 = vld [vmem:[%s10694_s9 + $0xf0] ss:$8 sps:$4 sm:$0xff]   ;;  %1645 = vmatprep.subr.bf16.mxu1 %v7377_v32  ;;  %v7399_v39 = vld [vmem:[%s10694_s9 + $0xc0] ss:$8 sps:$4 sm:$0xff]   ;;  %10905 = vst [vmem:[#allocation19_spill] sm:$0xff] %v8532_v31 }
 0x25d   : > { %v7393_v37 = vld [vmem:[%s10694_s9 + $0xd0] ss:$8 sps:$4 sm:$0xff]  }
 0x25e   : > { %v1203_v42 = vadd.f32 %v1200_v41, %v1188_v40  ;;  %v8365_v40 = vpop.f32.mrf.mxu0  ;;  %v8537_v32 = vld [vmem:[%s10694_s9 + $0x1b0] ss:$8 sps:$4 sm:$0xff]  }
 0x25f   : > { %1646 = vmatpush2.bf16.msra.mxu1 %v7381_v33  ;;  %10896 = vst [vmem:[#allocation10_spill] sm:$0xff] %v8365_v40  ;;  %v8546_v33 = vld [vmem:[%s10694_s9 + $0xa4] ss:$8 sps:$4 sm:$0xff]  }
 0x260   : > { %v1205_v44 = vmax.f32 %v1203_v42, 0.0  ;;  %1647 = vmatprep.subr.bf16.mxu1 %v7383_v34  ;;  %v8367_v41 = vpop.f32.mrf.mxu0  ;;  %10906 = vst [vmem:[#allocation20_spill] sm:$0xff] %v8546_v33  ;;  %v8551_v34 = vld [vmem:[%s10694_s9 + $0x1a4] ss:$8 sps:$4 sm:$0xff]  }
 0x261   : > { %10897 = vst [vmem:[#allocation11_spill] sm:$0xff] %v8367_v41 }
 0x262   : > { %v1209_v48 = vpack.c.bf16 %v1205_v44, %v1204_v43  ;;  %v8369_v42 = vpop.f32.mrf.mxu0 }
 0x263   : > { %1648 = vmatpush2.bf16.msra.mxu1 %v7387_v35  ;;  %10898 = vst [vmem:[#allocation12_spill] sm:$0xff] %v8369_v42  ;;  %v8556_v35 = vld [vmem:[%s10694_s9 + $0xa0] ss:$8 sps:$4 sm:$0xff]  }
 0x264   : > { %7247 = vmatpush3.bf16.msra.mxu0 %v1209_v48  ;;  %1649 = vmatprep.subr.bf16.mxu1 %v7389_v36  ;;  %v8371_v43 = vpop.f32.mrf.mxu0  ;;  %10907 = vst [vmem:[#allocation21_spill] sm:$0xff] %v8556_v35  ;;  %v8561_v36 = vld [vmem:[%s10694_s9 + $0x1a0] ss:$8 sps:$4 sm:$0xff]  }
 0x265   : > { %1356 = vmatprep.subr.bf16.mxu0 %v7307_v47  ;;  %10899 = vst [vmem:[#allocation13_spill] sm:$0xff] %v8371_v43  ;;  %v1404_v43 = vpop.permute.xlu0 %1403 }
 0x266   : > { %v8373_v44 = vpop.f32.mrf.mxu0 }
 0x267   : > { %7249 = vmatmul.mubr.msk.bf16.vlgmr.msra.gmra.mxu0 %vm778_vm0, %v7304_v50  ;;  %1650 = vmatpush2.bf16.msra.mxu1 %v7393_v37  ;;  %10900 = vst [vmem:[#allocation14_spill] sm:$0xff] %v8373_v44  ;;  %v8570_v37 = vld [vmem:[%s10694_s9 + $0x94] ss:$8 sps:$4 sm:$0xff]  }
 0x268   : > { %1357 = vmatpush1.bf16.msra.mxu0 %v7305_v52  ;;  %1388 = vmatprep.mubr.bf16.mxu0 %v10716_v2  ;;  %v8375_v47 = vpop.f32.mrf.mxu0  ;;  %10908 = vst [vmem:[#allocation22_spill] sm:$0xff] %v8570_v37  ;;  %v1409_v2 = vpop.permute.xlu1 %1408 }
 0x269   : > { %1358 = vmatprep.subr.bf16.mxu0 %v7310_v53  ;;  %1651 = vmatprep.subr.bf16.mxu1 %v7395_v38  ;;  %10901 = vst [vmem:[#allocation15_spill] sm:$0xff] %v8375_v47  ;;  %v8575_v38 = vld [vmem:[%s10694_s9 + $0x194] ss:$8 sps:$4 sm:$0xff]  }
 0x26a   : > { %v8377_v48 = vpop.f32.mrf.mxu0  ;;  %10909 = vst [vmem:[#allocation23_spill] sm:$0xff] %v8575_v38 }
 0x26b   : > { %1652 = vmatpush2.bf16.msra.mxu1 %v7399_v39  ;;  %10902 = vst [vmem:[#allocation16_spill] sm:$0xff] %v8377_v48  ;;  %v8580_v39 = vld [vmem:[%s10694_s9 + $0x90] ss:$8 sps:$4 sm:$0xff]   ;;  %v1420_v48 = vpop.permute.xlu0 %1419 }
 0x26c   : > { %1359 = vmatpush1.bf16.msra.mxu0 %v7308_v54  ;;  %v8379_v50 = vpop.f32.mrf.mxu0  ;;  %1653 = vmatprep.subr.bf16.mxu1 %v8522_v29  ;;  %10910 = vst [vmem:[#allocation24_spill] sm:$0xff] %v8580_v39 }
 0x26d   : > { %1360 = vmatprep.subr.bf16.mxu0 %v7313_v55  ;;  %10903 = vst [vmem:[#allocation17_spill] sm:$0xff] %v8379_v50  ;;  %v8384_v55 = vld [vmem:[%s10694_s9 + $0x170] ss:$8 sps:$4 sm:$0xff]  }
 0x26f   : > { %1654 = vmatpush2.bf16.msra.mxu1 %v8532_v31 }
 0x270   : > { %1361 = vmatpush1.bf16.msra.mxu0 %v7311_v56  ;;  %1655 = vmatprep.subr.bf16.mxu1 %v8546_v33 }
 0x271   : > { %1362 = vmatprep.subr.bf16.mxu0 %v7316_v57  ;;  %v8389_v57 = vld [vmem:[%s10694_s9 + $0x164] ss:$8 sps:$4 sm:$0xff]  }
 0x273   : > { %1656 = vmatpush2.bf16.msra.mxu1 %v8556_v35 }
 0x274   : > { %1363 = vmatpush1.bf16.msra.mxu0 %v7314_v58  ;;  %1657 = vmatprep.subr.bf16.mxu1 %v8570_v37 }
 0x275   : > { %1364 = vmatprep.subr.bf16.mxu0 %v7319_v59  ;;  %v8395_v59 = vld [vmem:[%s10694_s9 + $0x160] ss:$8 sps:$4 sm:$0xff]  }
 0x277   : > { %1658 = vmatpush2.bf16.msra.mxu1 %v8580_v39 }
 0x278   : > { %1365 = vmatpush1.bf16.msra.mxu0 %v7317_v60  ;;  %v8401_v60 = vld [vmem:[%s10694_s9 + $0x154] ss:$8 sps:$4 sm:$0xff]  }
 0x279   : > { %1366 = vmatprep.subr.bf16.mxu0 %v7322_v63  ;;  %v8407_v63 = vld [vmem:[%s10694_s9 + $0x150] ss:$8 sps:$4 sm:$0xff]  }
 0x27c   : > { %1367 = vmatpush1.bf16.msra.mxu0 %v7320_v0  ;;  %v8413_v0 = vld [vmem:[%s10694_s9 + $0x144] ss:$8 sps:$4 sm:$0xff]  }
 0x27d   : > { %1368 = vmatprep.subr.bf16.mxu0 %v7325_v4  ;;  %v8419_v4 = vld [vmem:[%s10694_s9 + $0x140] ss:$8 sps:$4 sm:$0xff]  }
 0x280   : > { %1369 = vmatpush1.bf16.msra.mxu0 %v7323_v5  ;;  %v8425_v5 = vld [vmem:[%s10694_s9 + $0x134] ss:$8 sps:$4 sm:$0xff]  }
 0x281   : > { %1370 = vmatprep.subr.bf16.mxu0 %v7328_v6  ;;  %v8431_v6 = vld [vmem:[%s10694_s9 + $0x130] ss:$8 sps:$4 sm:$0xff]  }
 0x284   : > { %1371 = vmatpush1.bf16.msra.mxu0 %v7326_v7  ;;  %v8437_v7 = vld [vmem:[%s10694_s9 + $0x124] ss:$8 sps:$4 sm:$0xff]  }
 0x285   : > { %1867 = vmatprep.subr.bf16.mxu0 %v8293_v9 }
 0x327   : > { %v1252_v52 = vpop.f32.mrf.mxu0 }
 0x329   : > { %v7250_v53 = vpop.f32.mrf.mxu0 }
 0x32a   : > { %v8594_v53 = vld [vmem:[%s10694_s9 + $0x84] ss:$8 sps:$4 sm:$0xff]  }
 0x32b   : > { %v1255_v54 = vpop.f32.mrf.mxu0  ;;  %10912 = vst [vmem:[#allocation26_spill] sm:$0xff] %v8594_v53  ;;  %1659 = vmatprep.subr.bf16.mxu1 %v8594_v53 }
 0x32c   : > { %v1259_v56 = vpack.c.bf16 %v1255_v54, %v1252_v52  ;;  %v8585_v52 = vld [vmem:[%s10694_s9 + $0x190] ss:$8 sps:$4 sm:$0xff]   ;;  %v8599_v54 = vld [vmem:[%s10694_s9 + $0x184] ss:$8 sps:$4 sm:$0xff]  }
 0x32d   : > { %v7251_v58 = vpop.f32.mrf.mxu0  ;;  %10911 = vst [vmem:[#allocation25_spill] sm:$0xff] %v8585_v52  ;;  %10913 = vst [vmem:[#allocation27_spill] sm:$0xff] %v8599_v54 }
 0x32e   : > { %1389 = vmatmul.mubr.bf16.vlgmr.msra.gmra.mxu0 %v1259_v56  ;;  %v8604_v56 = vld [vmem:[%s10694_s9 + $0x80] ss:$8 sps:$4 sm:$0xff]  }
 0x32f   : > { %1868 = vmatpush1.bf16.msra.mxu0 %v8384_v55  ;;  %10914 = vst [vmem:[#allocation28_spill] sm:$0xff] %v8604_v56  ;;  %v8609_v58 = vld [vmem:[%s10694_s9 + $0x180] ss:$8 sps:$4 sm:$0xff]   ;;  %1660 = vmatpush2.bf16.msra.mxu1 %v8604_v56  ;;  %v1425_v56 = vpop.permute.xlu1 %1424 }
 0x330   : > { %1869 = vmatprep.subr.bf16.mxu0 %v8389_v57  ;;  %10915 = vst [vmem:[#allocation29_spill] sm:$0xff] %v8609_v58 }
 0x333   : > { %1870 = vmatpush1.bf16.msra.mxu0 %v8395_v59 }
 0x334   : > { %1871 = vmatprep.subr.bf16.mxu0 %v8401_v60 }
 0x337   : > { %1872 = vmatpush1.bf16.msra.mxu0 %v8407_v63 }
 0x338   : > { %1873 = vmatprep.subr.bf16.mxu0 %v8413_v0 }
 0x33b   : > { %1874 = vmatpush1.bf16.msra.mxu0 %v8419_v4 }
 0x33c   : > { %1875 = vmatprep.subr.bf16.mxu0 %v8425_v5 }
 0x33f   : > { %1876 = vmatpush1.bf16.msra.mxu0 %v8431_v6 }
 0x340   : > { %1877 = vmatprep.subr.bf16.mxu0 %v8437_v7 }
 0x343   : > { %1878 = vmatpush1.bf16.msra.mxu0 %v8443_v8 }
 0x344   : > { %1879 = vmatprep.subr.bf16.mxu0 %v8449_v10 }
 0x347   : > { %1880 = vmatpush1.bf16.msra.mxu0 %v8455_v12 }
 0x348   : > { %1881 = vmatprep.subr.bf16.mxu0 %v8461_v13 }
 0x34b   : > { %1882 = vmatpush1.bf16.msra.mxu0 %v8467_v14 }
 0x34c   : > { %1883 = vmatprep.subr.bf16.mxu0 %v8473_v62 }
 0x34f   : > { %1884 = vmatpush2.bf16.msra.mxu0 %v8479_v3 }
 0x350   : > { %1885 = vmatprep.subr.bf16.mxu0 %v8485_v15 }
 0x353   : > { %1886 = vmatpush2.bf16.msra.mxu0 %v8491_v16 }
 0x354   : > { %1887 = vmatprep.subr.bf16.mxu0 %v8497_v17 }
 0x357   : > { %1888 = vmatpush2.bf16.msra.mxu0 %v8503_v18 }
 0x358   : > { %1889 = vmatprep.subr.bf16.mxu0 %v8509_v19 }
 0x35b   : > { %1890 = vmatpush2.bf16.msra.mxu0 %v8515_v20 }
 0x35c   : > { %1891 = vmatprep.subr.bf16.mxu0 %v8527_v30 }
 0x35f   : > { %1892 = vmatpush2.bf16.msra.mxu0 %v8537_v32 }
 0x360   : > { %1893 = vmatprep.subr.bf16.mxu0 %v8551_v34 }
 0x363   : > { %1894 = vmatpush2.bf16.msra.mxu0 %v8561_v36 }
 0x364   : > { %1895 = vmatprep.subr.bf16.mxu0 %v8575_v38 }
 0x367   : > { %1896 = vmatpush2.bf16.msra.mxu0 %v8585_v52 }
 0x368   : > { %1897 = vmatprep.subr.bf16.mxu0 %v8599_v54 }
 0x36b   : > { %1898 = vmatpush2.bf16.msra.mxu0 %v8609_v58 }
 0x3ee   : > { %v1390_v22 = vpop.f32.mrf.mxu0 }
 0x3ef   : > { %v1391_v50 = vadd.f32 %v1390_v22, %v8136_v45 }
 0x3f0   : > { %v1392_v26 = vpop.f32.mrf.mxu0 }
 0x3f1   : > { %v1393_v28 = vadd.f32 %v1392_v26, %v8138_v46  ;;  %v1411_v53 = vmul.f32 %v1404_v43, %v1391_v50 }
 0x3f2   : > { %v1394_v39 = vpop.f32.mrf.mxu0 }
 0x3f3   : > { %v1412_v37 = vmul.f32 %v1404_v43, %v1393_v28  ;;  %v1395_v35 = vadd.f32 %v1394_v39, %v8142_v49  ;;  %v1427_v44 = vadd.f32 %v1420_v48, %v1411_v53  ;;  %v7425_v49 = vld [vmem:[%s10700_s15 + $0x8] sm:$0xff]   ;;  %v8646_v39 = vld [vmem:[%s10694_s9 + $0x274] ss:$8 sps:$4 sm:$0xff]  }
 0x3f4   : > { %v1396_v33 = vpop.f32.mrf.mxu0  ;;  %10917 = vst [vmem:[#allocation30_spill] sm:$0xff] %v8646_v39  ;;  %v7429_v53 = vld [vmem:[%s10700_s15 + $0x10] sm:$0xff]  }
 0x3f5   : > { %v1413_v31 = vmul.f32 %v1409_v2, %v1395_v35  ;;  %v1397_v29 = vadd.f32 %v1396_v33, %v8145_v51  ;;  %v1428_v27 = vadd.f32 %v1420_v48, %v1412_v37  ;;  %v1431_v46 = vmax.f32 %v1427_v44, 0.0  ;;  %v7426_v51 = vld [vmem:[%s10700_s15 + $0x20] sm:$0xff]   ;;  %v7428_v37 = vld [vmem:[%s10700_s15 + $0x28] sm:$0xff]  }
 0x3f6   : > { %v7427_v35 = vld [vmem:[%s10700_s15] sm:$0xff]  }
 0x3f7   : > { %v1429_v47 = vadd.f32 %v1425_v56, %v1413_v31  ;;  %v1414_v1 = vmul.f32 %v1409_v2, %v1397_v29  ;;  %v1432_v42 = vmax.f32 %v1428_v27, 0.0  ;;  %v10916_v2 = vmov 0  }
 0x3f9   : > { %v1430_v61 = vadd.f32 %v1425_v56, %v1414_v1  ;;  %v1433_v45 = vmax.f32 %v1429_v47, 0.0  ;;  %v7432_v56 = vld [vmem:[%s10700_s15 + $0x30] sm:$0xff]  }
 0x3fb   : > { %v1434_v22 = vmax.f32 %v1430_v61, 0.0  ;;  %v8619_v28 = vpack.c.bf16 %v1433_v45, %v1431_v46  ;;  %v8662_v45 = vld [vmem:[%s10694_s9 + $0x270] ss:$8 sps:$4 sm:$0xff]   ;;  %v8676_v46 = vld [vmem:[%s10694_s9 + $0x260] ss:$8 sps:$4 sm:$0xff]  }
 0x3fc   : > { %10918 = vst [vmem:[#allocation31_spill] sm:$0xff] %v8662_v45  ;;  %10920 = vst [vmem:[#allocation33_spill] sm:$0xff] %v8676_v46 }
 0x3fd   : > { %v1436_v26 = vpack.c.bf16 %v1434_v22, %v1432_v42  ;;  %v8667_v22 = vld [vmem:[%s10694_s9 + $0x264] ss:$8 sps:$4 sm:$0xff]  }
 0x3fe   : > { %10919 = vst [vmem:[#allocation32_spill] sm:$0xff] %v8667_v22 }
 0x3ff   : > { %1661 = vmatprep.mubr.bf16.mxu1 %v1436_v26  ;;  %1899 = vmatprep.mubr.bf16.mxu0 %v1436_v26 }
 0x400   : > { %1939 = vmatprep.subr.bf16.mxu1 %v1436_v26  ;;  %2105 = vmatprep.subr.bf16.mxu0 %v1436_v26 }
 0x401   : > { %1662 = vmatmul.mubr.bf16.vlgmr.msra.gmra.mxu1 %v8619_v28  ;;  %1900 = vmatmul.mubr.bf16.vlgmr.msra.gmra.mxu0 %v8619_v28 }
 0x402   : > { %1940 = vmatpush1.bf16.msra.mxu1 %v8619_v28  ;;  %2106 = vmatpush1.bf16.msra.mxu0 %v8619_v28 }
 0x403   : > { %1957 = vmatprep.mubr.bf16.mxu1 %v10916_v2  ;;  %2123 = vmatprep.mubr.bf16.mxu0 %v10916_v2 }
 0x409   : > { %6734 = vmatmul.mubr.msk.bf16.vlgmr.msra.gmra.mxu1 %vm778_vm0, %v7425_v49  ;;  %6746 = vmatmul.mubr.msk.bf16.vlgmr.msra.gmra.mxu0 %vm778_vm0, %v7426_v51  ;;  %v8682_v49 = vld [vmem:[%s10694_s9 + $0x254] ss:$8 sps:$4 sm:$0xff]  }
 0x40a   : > { %2008 = vmatprep.mubr.bf16.mxu1 %v10916_v2  ;;  %2228 = vmatprep.mubr.bf16.mxu0 %v10916_v2  ;;  %10921 = vst [vmem:[#allocation34_spill] sm:$0xff] %v8682_v49  ;;  %v7430_v51 = vld [vmem:[%s10700_s15 + $0x18] sm:$0xff]  }
 0x4c1   : > { %v1663_v61 = vpop.f32.mrf.mxu1  ;;  %v1901_v1 = vpop.f32.mrf.mxu0 }
 0x4c3   : > { %v1665_v27 = vpop.f32.mrf.mxu1  ;;  %v1903_v42 = vpop.f32.mrf.mxu0 }
 0x4c5   : > { %v1667_v43 = vpop.f32.mrf.mxu1  ;;  %v1905_v44 = vpop.f32.mrf.mxu0 }
 0x4c6   : > { %v1672_v31 = vpack.c.bf16 %v1667_v43, %v1663_v61  ;;  %v1910_v33 = vpack.c.bf16 %v1905_v44, %v1901_v1  ;;  %v8697_v61 = vld [vmem:[%s10694_s9 + $0x244] ss:$8 sps:$4 sm:$0xff]   ;;  %v8706_v1 = vld [vmem:[%s10694_s9 + $0x240] ss:$8 sps:$4 sm:$0xff]   ;;  %v8726_v43 = vld [vmem:[%s10694_s9 + $0x374] ss:$8 sps:$4 sm:$0xff]  }
 0x4c7   : > { %v1669_v47 = vpop.f32.mrf.mxu1  ;;  %v1907_v48 = vpop.f32.mrf.mxu0  ;;  %10923 = vst [vmem:[#allocation36_spill] sm:$0xff] %v8697_v61  ;;  %10924 = vst [vmem:[#allocation37_spill] sm:$0xff] %v8706_v1  ;;  %v8732_v44 = vld [vmem:[%s10694_s9 + $0x224] ss:$8 sps:$4 sm:$0xff]  }
 0x4c8   : > { %v1673_v50 = vpack.c.bf16 %v1669_v47, %v1665_v27  ;;  %v1911_v29 = vpack.c.bf16 %v1907_v48, %v1903_v42  ;;  %v8712_v27 = vld [vmem:[%s10694_s9 + $0x234] ss:$8 sps:$4 sm:$0xff]   ;;  %v8721_v42 = vld [vmem:[%s10694_s9 + $0x230] ss:$8 sps:$4 sm:$0xff]   ;;  %10927 = vst [vmem:[#allocation40_spill] sm:$0xff] %v8726_v43  ;;  %10928 = vst [vmem:[#allocation41_spill] sm:$0xff] %v8732_v44 }
 0x4c9   : > { %10925 = vst [vmem:[#allocation38_spill] sm:$0xff] %v8712_v27  ;;  %10926 = vst [vmem:[#allocation39_spill] sm:$0xff] %v8721_v42  ;;  %v8740_v47 = vld [vmem:[%s10694_s9 + $0x220] ss:$8 sps:$4 sm:$0xff]   ;;  %v8747_v48 = vld [vmem:[%s10694_s9 + $0x214] ss:$8 sps:$4 sm:$0xff]  }
 0x4ca   : > { %1990 = vmatprep.subr.bf16.mxu1 %v1673_v50  ;;  %2210 = vmatprep.subr.bf16.mxu0 %v1911_v29  ;;  %10929 = vst [vmem:[#allocation42_spill] sm:$0xff] %v8740_v47  ;;  %10930 = vst [vmem:[#allocation43_spill] sm:$0xff] %v8747_v48 }
 0x4cb   : > { %1991 = vmatpush1.bf16.msra.mxu1 %v1672_v31  ;;  %2211 = vmatpush1.bf16.msra.mxu0 %v1910_v33 }
 0x4cc   : > { %2044 = vmatprep.subr.bf16.mxu1 %v1911_v29  ;;  %2322 = vmatprep.subr.bf16.mxu0 %v1673_v50 }
 0x4ce   : > { %6736 = vmatmul.mubr.msk.bf16.vlgmr.msra.gmra.mxu1 %vm778_vm0, %v7427_v35  ;;  %6752 = vmatmul.mubr.msk.bf16.vlgmr.msra.gmra.mxu0 %vm778_vm0, %v7428_v37  ;;  %v8772_v35 = vld [vmem:[%s10694_s9 + $0x204] ss:$8 sps:$4 sm:$0xff]   ;;  %v8779_v37 = vld [vmem:[%s10694_s9 + $0x360] ss:$8 sps:$4 sm:$0xff]  }
 0x4cf   : > { %2045 = vmatpush1.bf16.msra.mxu1 %v1910_v33  ;;  %2323 = vmatpush1.bf16.msra.mxu0 %v1672_v31  ;;  %10934 = vst [vmem:[#allocation47_spill] sm:$0xff] %v8772_v35  ;;  %10935 = vst [vmem:[#allocation48_spill] sm:$0xff] %v8779_v37 }
 0x4d0   : > { %2156 = vmatprep.subr.bf16.mxu1 %v1673_v50  ;;  %2062 = vmatprep.mubr.bf16.mxu1 %v10916_v2  ;;  %v7433_v50 = vld [vmem:[%s10700_s15 + $0x40] sm:$0xff]  }
 0x4d1   : > { %2340 = vmatprep.mubr.bf16.mxu0 %v10916_v2  ;;  %2604 = vmatprep.subr.bf16.mxu0 %v8646_v39 }
 0x4d6   : > { %6740 = vmatmul.mubr.msk.bf16.vlgmr.msra.gmra.mxu1 %vm778_vm0, %v7429_v53  ;;  %6760 = vmatmul.mubr.msk.bf16.vlgmr.msra.gmra.mxu0 %vm778_vm0, %v7432_v56  ;;  %v8786_v53 = vld [vmem:[%s10694_s9 + $0x200] ss:$8 sps:$4 sm:$0xff]   ;;  %v8791_v56 = vld [vmem:[%s10694_s9 + $0x354] ss:$8 sps:$4 sm:$0xff]  }
 0x4d7   : > { %2157 = vmatpush1.bf16.msra.mxu1 %v1672_v31  ;;  %2174 = vmatprep.mubr.bf16.mxu1 %v10916_v2  ;;  %v8761_v31 = vld [vmem:[%s10694_s9 + $0x210] ss:$8 sps:$4 sm:$0xff]   ;;  %10936 = vst [vmem:[#allocation49_spill] sm:$0xff] %v8786_v53  ;;  %10937 = vst [vmem:[#allocation50_spill] sm:$0xff] %v8791_v56 }
 0x4d8   : > { %2271 = vmatprep.subr.bf16.mxu1 %v1436_v26  ;;  %2605 = vmatpush1.bf16.msra.mxu0 %v8662_v45  ;;  %v8691_v26 = vld [vmem:[%s10694_s9 + $0x250] ss:$8 sps:$4 sm:$0xff]   ;;  %10932 = vst [vmem:[#allocation45_spill] sm:$0xff] %v8761_v31 }
 0x4d9   : > { %2606 = vmatprep.subr.bf16.mxu0 %v8667_v22  ;;  %10922 = vst [vmem:[#allocation35_spill] sm:$0xff] %v8691_v26 }
 0x4dc   : > { %2607 = vmatpush1.bf16.msra.mxu0 %v8676_v46 }
 0x4dd   : > { %2608 = vmatprep.subr.bf16.mxu0 %v8682_v49 }
 0x4de   : > { %6748 = vmatmul.mubr.msk.bf16.vlgmr.msra.gmra.mxu1 %vm778_vm0, %v7430_v51  ;;  %v8797_v51 = vld [vmem:[%s10694_s9 + $0x2f4] ss:$8 sps:$4 sm:$0xff]  }
 0x4df   : > { %2272 = vmatpush1.bf16.msra.mxu1 %v8619_v28  ;;  %2289 = vmatprep.mubr.bf16.mxu1 %v10916_v2  ;;  %v7431_v28 = vld [vmem:[%s10700_s15 + $0x38] sm:$0xff]   ;;  %10938 = vst [vmem:[#allocation51_spill] sm:$0xff] %v8797_v51 }
 0x4e0   : > { %2376 = vmatprep.subr.bf16.mxu1 %v1911_v29  ;;  %2609 = vmatpush1.bf16.msra.mxu0 %v8691_v26  ;;  %v8755_v29 = vld [vmem:[%s10694_s9 + $0x370] ss:$8 sps:$4 sm:$0xff]  }
 0x4e1   : > { %2610 = vmatprep.subr.bf16.mxu0 %v8697_v61  ;;  %10931 = vst [vmem:[#allocation44_spill] sm:$0xff] %v8755_v29 }
 0x4e4   : > { %2611 = vmatpush1.bf16.msra.mxu0 %v8706_v1 }
 0x4e5   : > { %2612 = vmatprep.subr.bf16.mxu0 %v8712_v27 }
 0x4e6   : > { %6758 = vmatmul.mubr.msk.bf16.vlgmr.msra.gmra.mxu1 %vm778_vm0, %v7431_v28  ;;  %v8803_v28 = vld [vmem:[%s10694_s9 + $0x350] ss:$8 sps:$4 sm:$0xff]  }
 0x4e7   : > { %2377 = vmatpush1.bf16.msra.mxu1 %v1910_v33  ;;  %2394 = vmatprep.mubr.bf16.mxu1 %v10916_v2  ;;  %v8766_v33 = vld [vmem:[%s10694_s9 + $0x364] ss:$8 sps:$4 sm:$0xff]   ;;  %10939 = vst [vmem:[#allocation52_spill] sm:$0xff] %v8803_v28 }
 0x4e8   : > { %2613 = vmatpush1.bf16.msra.mxu0 %v8721_v42  ;;  %2846 = vmatprep.subr.bf16.mxu1 %v8726_v43  ;;  %10933 = vst [vmem:[#allocation46_spill] sm:$0xff] %v8766_v33  ;;  %v8877_v42 = vld [vmem:[%s10694_s9 + $0x320] ss:$8 sps:$4 sm:$0xff]  }
 0x4e9   : > { %2614 = vmatprep.subr.bf16.mxu0 %v8732_v44  ;;  %v8863_v44 = vld [vmem:[%s10694_s9 + $0x324] ss:$8 sps:$4 sm:$0xff]   ;;  %10951 = vst [vmem:[#allocation64_spill] sm:$0xff] %v8877_v42 }
 0x4ea   : > { %10949 = vst [vmem:[#allocation62_spill] sm:$0xff] %v8863_v44 }
 0x4ec   : > { %2615 = vmatpush1.bf16.msra.mxu0 %v8740_v47  ;;  %v8845_v47 = vld [vmem:[%s10694_s9 + $0x2d4] ss:$8 sps:$4 sm:$0xff]  }
 0x4ed   : > { %2616 = vmatprep.subr.bf16.mxu0 %v8747_v48  ;;  %v8839_v48 = vld [vmem:[%s10694_s9 + $0x334] ss:$8 sps:$4 sm:$0xff]   ;;  %10946 = vst [vmem:[#allocation59_spill] sm:$0xff] %v8845_v47 }
 0x4ee   : > { %6764 = vmatmul.mubr.msk.bf16.vlgmr.msra.gmra.mxu1 %vm778_vm0, %v7433_v50  ;;  %v8810_v50 = vld [vmem:[%s10694_s9 + $0x2f0] ss:$8 sps:$4 sm:$0xff]   ;;  %10945 = vst [vmem:[#allocation58_spill] sm:$0xff] %v8839_v48 }
 0x4ef   : > { %2847 = vmatpush1.bf16.msra.mxu1 %v8755_v29  ;;  %10940 = vst [vmem:[#allocation53_spill] sm:$0xff] %v8810_v50 }
 0x4f0   : > { %2617 = vmatpush1.bf16.msra.mxu0 %v8761_v31  ;;  %2848 = vmatprep.subr.bf16.mxu1 %v8766_v33  ;;  %v8821_v31 = vld [vmem:[%s10694_s9 + $0x2e4] ss:$8 sps:$4 sm:$0xff]  }
 0x4f1   : > { %2618 = vmatprep.subr.bf16.mxu0 %v8772_v35  ;;  %v8815_v35 = vld [vmem:[%s10694_s9 + $0x344] ss:$8 sps:$4 sm:$0xff]   ;;  %10942 = vst [vmem:[#allocation55_spill] sm:$0xff] %v8821_v31 }
 0x4f2   : > { %10941 = vst [vmem:[#allocation54_spill] sm:$0xff] %v8815_v35 }
 0x4f3   : > { %2849 = vmatpush1.bf16.msra.mxu1 %v8779_v37 }
 0x4f4   : > { %2619 = vmatpush1.bf16.msra.mxu0 %v8786_v53  ;;  %2850 = vmatprep.subr.bf16.mxu1 %v8791_v56  ;;  %v8827_v53 = vld [vmem:[%s10694_s9 + $0x340] ss:$8 sps:$4 sm:$0xff]  }
 0x4f5   : > { %2620 = vmatprep.subr.bf16.mxu0 %v8797_v51  ;;  %10943 = vst [vmem:[#allocation56_spill] sm:$0xff] %v8827_v53  ;;  %v8834_v51 = vld [vmem:[%s10694_s9 + $0x2e0] ss:$8 sps:$4 sm:$0xff]  }
 0x4f6   : > { %10944 = vst [vmem:[#allocation57_spill] sm:$0xff] %v8834_v51 }
 0x4f7   : > { %2851 = vmatpush1.bf16.msra.mxu1 %v8803_v28 }
 0x4f8   : > { %2621 = vmatpush2.bf16.msra.mxu0 %v8810_v50  ;;  %2852 = vmatprep.subr.bf16.mxu1 %v8815_v35  ;;  %v8851_v50 = vld [vmem:[%s10694_s9 + $0x330] ss:$8 sps:$4 sm:$0xff]  }
 0x4f9   : > { %2622 = vmatprep.subr.bf16.mxu0 %v8821_v31  ;;  %10947 = vst [vmem:[#allocation60_spill] sm:$0xff] %v8851_v50  ;;  %v8858_v31 = vld [vmem:[%s10694_s9 + $0x2d0] ss:$8 sps:$4 sm:$0xff]  }
 0x4fa   : > { %10948 = vst [vmem:[#allocation61_spill] sm:$0xff] %v8858_v31 }
 0x4fb   : > { %2853 = vmatpush1.bf16.msra.mxu1 %v8827_v53 }
 0x4fc   : > { %2623 = vmatpush2.bf16.msra.mxu0 %v8834_v51  ;;  %2854 = vmatprep.subr.bf16.mxu1 %v8839_v48  ;;  %v8872_v51 = vld [vmem:[%s10694_s9 + $0x2c4] ss:$8 sps:$4 sm:$0xff]  }
 0x4fd   : > { %2624 = vmatprep.subr.bf16.mxu0 %v8845_v47  ;;  %10950 = vst [vmem:[#allocation63_spill] sm:$0xff] %v8872_v51  ;;  %v8882_v47 = vld [vmem:[%s10694_s9 + $0x2c0] ss:$8 sps:$4 sm:$0xff]  }
 0x4fe   : > { %10952 = vst [vmem:[#allocation65_spill] sm:$0xff] %v8882_v47 }
 0x4ff   : > { %2855 = vmatpush1.bf16.msra.mxu1 %v8851_v50  ;;  %v8900_v50 = vld [vmem:[%s10694_s9 + $0x310] ss:$8 sps:$4 sm:$0xff]  }
 0x500   : > { %2625 = vmatpush2.bf16.msra.mxu0 %v8858_v31  ;;  %2856 = vmatprep.subr.bf16.mxu1 %v8863_v44  ;;  %v8890_v31 = vld [vmem:[%s10694_s9 + $0x314] ss:$8 sps:$4 sm:$0xff]   ;;  %10955 = vst [vmem:[#allocation68_spill] sm:$0xff] %v8900_v50 }
 0x501   : > { %2626 = vmatprep.subr.bf16.mxu0 %v8872_v51  ;;  %10953 = vst [vmem:[#allocation66_spill] sm:$0xff] %v8890_v31  ;;  %v8895_v44 = vld [vmem:[%s10694_s9 + $0x2b4] ss:$8 sps:$4 sm:$0xff]   ;;  %v8914_v51 = vld [vmem:[%s10694_s9 + $0x304] ss:$8 sps:$4 sm:$0xff]  }
 0x502   : > { %10954 = vst [vmem:[#allocation67_spill] sm:$0xff] %v8895_v44  ;;  %10957 = vst [vmem:[#allocation70_spill] sm:$0xff] %v8914_v51 }
 0x503   : > { %2857 = vmatpush1.bf16.msra.mxu1 %v8877_v42  ;;  %v8924_v42 = vld [vmem:[%s10694_s9 + $0x300] ss:$8 sps:$4 sm:$0xff]  }
 0x504   : > { %2627 = vmatpush2.bf16.msra.mxu0 %v8882_v47  ;;  %2858 = vmatprep.subr.bf16.mxu1 %v8890_v31  ;;  %v8906_v47 = vld [vmem:[%s10694_s9 + $0x2b0] ss:$8 sps:$4 sm:$0xff]   ;;  %v8919_v31 = vld [vmem:[%s10694_s9 + $0x2a4] ss:$8 sps:$4 sm:$0xff]   ;;  %10959 = vst [vmem:[#allocation72_spill] sm:$0xff] %v8924_v42 }
 0x505   : > { %10956 = vst [vmem:[#allocation69_spill] sm:$0xff] %v8906_v47  ;;  %2628 = vmatprep.subr.bf16.mxu0 %v8895_v44  ;;  %10958 = vst [vmem:[#allocation71_spill] sm:$0xff] %v8919_v31  ;;  %v8938_v44 = vld [vmem:[%s10694_s9 + $0x3f4] ss:$8 sps:$4 sm:$0xff]  }
 0x506   : > { %10961 = vst [vmem:[#allocation74_spill] sm:$0xff] %v8938_v44 }
 0x507   : > { %2859 = vmatpush1.bf16.msra.mxu1 %v8900_v50  ;;  %v8948_v50 = vld [vmem:[%s10694_s9 + $0x3f0] ss:$8 sps:$4 sm:$0xff]  }
 0x508   : > { %2629 = vmatpush2.bf16.msra.mxu0 %v8906_v47  ;;  %2860 = vmatprep.subr.bf16.mxu1 %v8914_v51  ;;  %v8930_v47 = vld [vmem:[%s10694_s9 + $0x2a0] ss:$8 sps:$4 sm:$0xff]   ;;  %v8943_v51 = vld [vmem:[%s10694_s9 + $0x294] ss:$8 sps:$4 sm:$0xff]   ;;  %10963 = vst [vmem:[#allocation76_spill] sm:$0xff] %v8948_v50 }
 0x509   : > { %10960 = vst [vmem:[#allocation73_spill] sm:$0xff] %v8930_v47  ;;  %2630 = vmatprep.subr.bf16.mxu0 %v8919_v31  ;;  %10962 = vst [vmem:[#allocation75_spill] sm:$0xff] %v8943_v51  ;;  %v8962_v31 = vld [vmem:[%s10694_s9 + $0x3e4] ss:$8 sps:$4 sm:$0xff]  }
 0x50a   : > { %10965 = vst [vmem:[#allocation78_spill] sm:$0xff] %v8962_v31 }
 0x50b   : > { %2861 = vmatpush1.bf16.msra.mxu1 %v8924_v42  ;;  %v8972_v42 = vld [vmem:[%s10694_s9 + $0x3e0] ss:$8 sps:$4 sm:$0xff]  }
 0x50c   : > { %2631 = vmatpush2.bf16.msra.mxu0 %v8930_v47  ;;  %2862 = vmatprep.subr.bf16.mxu1 %v8938_v44  ;;  %v8954_v47 = vld [vmem:[%s10694_s9 + $0x290] ss:$8 sps:$4 sm:$0xff]   ;;  %v8967_v44 = vld [vmem:[%s10694_s9 + $0x284] ss:$8 sps:$4 sm:$0xff]   ;;  %10967 = vst [vmem:[#allocation80_spill] sm:$0xff] %v8972_v42 }
 0x50d   : > { %10964 = vst [vmem:[#allocation77_spill] sm:$0xff] %v8954_v47  ;;  %2632 = vmatprep.subr.bf16.mxu0 %v8943_v51  ;;  %10966 = vst [vmem:[#allocation79_spill] sm:$0xff] %v8967_v44  ;;  %v8986_v51 = vld [vmem:[%s10694_s9 + $0x3d4] ss:$8 sps:$4 sm:$0xff]  }
 0x50e   : > { %10969 = vst [vmem:[#allocation82_spill] sm:$0xff] %v8986_v51 }
 0x50f   : > { %2863 = vmatpush2.bf16.msra.mxu1 %v8948_v50  ;;  %v2125_v50 = vpop.f32.mrf.mxu0 }
 0x510   : > { %2633 = vmatpush2.bf16.msra.mxu0 %v8954_v47  ;;  %2864 = vmatprep.subr.bf16.mxu1 %v8962_v31  ;;  %v8978_v47 = vld [vmem:[%s10694_s9 + $0x280] ss:$8 sps:$4 sm:$0xff]   ;;  %v8991_v31 = vld [vmem:[%s10694_s9 + $0x3d0] ss:$8 sps:$4 sm:$0xff]  }
 0x511   : > { %10968 = vst [vmem:[#allocation81_spill] sm:$0xff] %v8978_v47  ;;  %2634 = vmatprep.subr.bf16.mxu0 %v8967_v44  ;;  %10970 = vst [vmem:[#allocation83_spill] sm:$0xff] %v8991_v31  ;;  %v8998_v44 = vld [vmem:[%s10694_s9 + $0x3c4] ss:$8 sps:$4 sm:$0xff]   ;;  %v2127_v53 = vpop.f32.mrf.mxu0 }
 0x512   : > { %10971 = vst [vmem:[#allocation84_spill] sm:$0xff] %v8998_v44 }
 0x513   : > { %2865 = vmatpush2.bf16.msra.mxu1 %v8972_v42  ;;  %v2129_v1 = vpop.f32.mrf.mxu0 }
 0x514   : > { %2635 = vmatpush2.bf16.msra.mxu0 %v8978_v47  ;;  %2866 = vmatprep.subr.bf16.mxu1 %v8986_v51  ;;  %v9003_v47 = vld [vmem:[%s10694_s9 + $0x3c0] ss:$8 sps:$4 sm:$0xff]   ;;  %v9010_v51 = vld [vmem:[%s10694_s9 + $0x3b4] ss:$8 sps:$4 sm:$0xff]  }
 0x515   : > { %10972 = vst [vmem:[#allocation85_spill] sm:$0xff] %v9003_v47  ;;  %10973 = vst [vmem:[#allocation86_spill] sm:$0xff] %v9010_v51  ;;  %v9058_v61 = vpop.f32.mrf.mxu0 }
 0x516   : > { %10982 = vst [vmem:[#allocation94_spill] sm:$0xff] %v9058_v61 }
 0x517   : > { %2867 = vmatpush2.bf16.msra.mxu1 %v8991_v31  ;;  %v9015_v31 = vld [vmem:[%s10694_s9 + $0x3b0] ss:$8 sps:$4 sm:$0xff]  }
 0x518   : > { %2868 = vmatprep.subr.bf16.mxu1 %v8998_v44  ;;  %10974 = vst [vmem:[#allocation87_spill] sm:$0xff] %v9015_v31  ;;  %v9022_v44 = vld [vmem:[%s10694_s9 + $0x3a4] ss:$8 sps:$4 sm:$0xff]  }
 0x519   : > { %10975 = vst [vmem:[#allocation88_spill] sm:$0xff] %v9022_v44 }
 0x51b   : > { %2869 = vmatpush2.bf16.msra.mxu1 %v9003_v47  ;;  %v9027_v47 = vld [vmem:[%s10694_s9 + $0x3a0] ss:$8 sps:$4 sm:$0xff]  }
 0x51c   : > { %2870 = vmatprep.subr.bf16.mxu1 %v9010_v51  ;;  %10976 = vst [vmem:[#allocation89_spill] sm:$0xff] %v9027_v47  ;;  %v9034_v51 = vld [vmem:[%s10694_s9 + $0x394] ss:$8 sps:$4 sm:$0xff]  }
 0x51d   : > { %10977 = vst [vmem:[#allocation90_spill] sm:$0xff] %v9034_v51 }
 0x51f   : > { %2871 = vmatpush2.bf16.msra.mxu1 %v9015_v31  ;;  %v9039_v31 = vld [vmem:[%s10694_s9 + $0x390] ss:$8 sps:$4 sm:$0xff]  }
 0x520   : > { %2872 = vmatprep.subr.bf16.mxu1 %v9022_v44  ;;  %10978 = vst [vmem:[#allocation91_spill] sm:$0xff] %v9039_v31  ;;  %v9046_v44 = vld [vmem:[%s10694_s9 + $0x384] ss:$8 sps:$4 sm:$0xff]  }
 0x521   : > { %10979 = vst [vmem:[#allocation92_spill] sm:$0xff] %v9046_v44 }
 0x523   : > { %2873 = vmatpush2.bf16.msra.mxu1 %v9027_v47  ;;  %v9051_v47 = vld [vmem:[%s10694_s9 + $0x380] ss:$8 sps:$4 sm:$0xff]  }
 0x524   : > { %2874 = vmatprep.subr.bf16.mxu1 %v9034_v51  ;;  %10980 = vst [vmem:[#allocation93_spill] sm:$0xff] %v9051_v47  ;;  %v7530_v51 = vld [vmem:[%s10981_s5 + $0x78] sm:$0xff]  }
 0x527   : > { %2875 = vmatpush2.bf16.msra.mxu1 %v9039_v31  ;;  %v1959_v31 = vpop.f32.mrf.mxu1 }
 0x528   : > { %2876 = vmatprep.subr.bf16.mxu1 %v9046_v44 }
 0x529   : > { %v1961_v42 = vpop.f32.mrf.mxu1 }
 0x52b   : > { %2877 = vmatpush2.bf16.msra.mxu1 %v9051_v47  ;;  %v1963_v48 = vpop.f32.mrf.mxu1 }
 0x52c   : > { %7174 = vmatprep.subr.bf16.mxu1 %v7530_v51 }
 0x52d   : > { %v1965_v27 = vpop.f32.mrf.mxu1 }
 0x58e   : > { %v2010_v35 = vpop.f32.mrf.mxu1  ;;  %v2230_v56 = vpop.f32.mrf.mxu0 }
 0x58f   : > { %v2011_v22 = vadd.f32 %v2010_v35, %v1959_v31 }
 0x590   : > { %v2012_v28 = vpop.f32.mrf.mxu1  ;;  %v2232_v49 = vpop.f32.mrf.mxu0 }
 0x591   : > { %v2013_v51 = vadd.f32 %v2012_v28, %v1961_v42 }
 0x592   : > { %v2014_v26 = vpop.f32.mrf.mxu1  ;;  %v2234_v39 = vpop.f32.mrf.mxu0 }
 0x593   : > { %v2015_v46 = vadd.f32 %v2014_v26, %v1963_v48 }
 0x594   : > { %v2016_v44 = vpop.f32.mrf.mxu1  ;;  %v9060_v52 = vpop.f32.mrf.mxu0 }
 0x595   : > { %v2017_v29 = vadd.f32 %v2016_v44, %v1965_v27 }
 0x596   : > { %v2064_v47 = vpop.f32.mrf.mxu1 }
 0x597   : > { %v2073_v24 = vadd.f32 %v2064_v47, %v2011_v22  ;;  %v2342_v22 = vpop.f32.mrf.mxu0 }
 0x598   : > { %v2066_v37 = vpop.f32.mrf.mxu1 }
 0x599   : > { %v2074_v25 = vadd.f32 %v2066_v37, %v2013_v51  ;;  %v7533_v51 = vld [vmem:[%s10981_s5 + $0x30] sm:$0xff]  }
 0x59a   : > { %v2068_v33 = vpop.f32.mrf.mxu1 }
 0x59b   : > { %v2075_v45 = vadd.f32 %v2068_v33, %v2015_v46 }
 0x59c   : > { %v2070_v43 = vpop.f32.mrf.mxu1 }
 0x59d   : > { %v2076_v41 = vadd.f32 %v2070_v43, %v2017_v29  ;;  %v2409_v58 = vpack.c.bf16 %v2075_v45, %v2073_v24 }
 0x59e   : > { %v2176_v40 = vpop.f32.mrf.mxu1 }
 0x59f   : > { %v2410_v23 = vpack.c.bf16 %v2076_v41, %v2074_v25  ;;  %v2177_v61 = vadd.f32 %v2176_v40, %v2125_v50  ;;  %v2344_v41 = vpop.f32.mrf.mxu0  ;;  %v7532_v50 = vld [vmem:[%s10981_s5 + $0x70] sm:$0xff]  }
 0x5a0   : > { %v2178_v54 = vpop.f32.mrf.mxu1 }
 0x5a1   : > { %v9062_v38 = vadd.f32 %v2230_v56, %v2177_v61  ;;  %v2179_v26 = vadd.f32 %v2178_v54, %v2127_v53  ;;  %2636 = vmatprep.mubr.bf16.mxu0 %v2410_v23  ;;  %v2346_v61 = vpop.f32.mrf.mxu0  ;;  %v7531_v56 = vld [vmem:[%s10981_s5 + $0x38] sm:$0xff]  }
 0x5a2   : > { %v2180_v42 = vpop.f32.mrf.mxu1  ;;  %2637 = vmatmul.mubr.bf16.vlgmr.msra.gmra.mxu0 %v2409_v58 }
 0x5a3   : > { %v9064_v27 = vadd.f32 %v2232_v49, %v2179_v26  ;;  %v2181_v46 = vadd.f32 %v2180_v42, %v2129_v1  ;;  %2986 = vmatprep.mubr.bf16.mxu0 %v10916_v2  ;;  %v2348_v23 = vpop.f32.mrf.mxu0  ;;  %v7534_v26 = vld [vmem:[%s10981_s5 + $0x68] sm:$0xff]  }
 0x5a4   : > { %v9067_v43 = vpop.f32.mrf.mxu1  ;;  %v7535_v42 = vld [vmem:[%s10981_s5 + $0x28] sm:$0xff]  }
 0x5a5   : > { %v9069_v25 = vadd.f32 %v2234_v39, %v2181_v46  ;;  %v7536_v46 = vld [vmem:[%s10981_s5 + $0x60] sm:$0xff]  }
 0x5a6   : > { %v2291_v24 = vpop.f32.mrf.mxu1 }
 0x5a7   : > { %v2343_v29 = vadd.f32 %v2342_v22, %v2291_v24  ;;  %v7537_v22 = vld [vmem:[%s10981_s5 + $0x20] sm:$0xff]   ;;  %v7538_v24 = vld [vmem:[%s10981_s5 + $0x58] sm:$0xff]  }
 0x5a8   : > { %v2293_v40 = vpop.f32.mrf.mxu1 }
 0x5a9   : > { %v2345_v48 = vadd.f32 %v2344_v41, %v2293_v40  ;;  %v7539_v40 = vld [vmem:[%s10981_s5 + $0x18] sm:$0xff]   ;;  %v7540_v41 = vld [vmem:[%s10981_s5 + $0x50] sm:$0xff]  }
 0x5aa   : > { %v2295_v45 = vpop.f32.mrf.mxu1 }
 0x5ab   : > { %v2347_v58 = vadd.f32 %v2346_v61, %v2295_v45  ;;  %v7541_v45 = vld [vmem:[%s10981_s5 + $0x10] sm:$0xff]   ;;  %v7542_v61 = vld [vmem:[%s10981_s5 + $0x48] sm:$0xff]  }
 0x5ac   : > { %v2297_v44 = vpop.f32.mrf.mxu1 }
 0x5ad   : > { %v2349_v1 = vadd.f32 %v2348_v23, %v2297_v44  ;;  %v7543_v44 = vld [vmem:[%s10981_s5 + $0x8] sm:$0xff]   ;;  %v7545_v23 = vld [vmem:[%s10981_s5] sm:$0xff]  }
 0x5ae   : > { %v2396_v54 = vpop.f32.mrf.mxu1 }
 0x5af   : > { %v2405_v39 = vadd.f32 %v2396_v54, %v2343_v29  ;;  %v7544_v54 = vld [vmem:[%s10981_s5 + $0x40] sm:$0xff]  }
 0x5b0   : > { %v2398_v47 = vpop.f32.mrf.mxu1 }
 0x5b1   : > { %v2406_v35 = vadd.f32 %v2398_v47, %v2345_v48 }
 0x5b2   : > { %v2400_v49 = vpop.f32.mrf.mxu1 }
 0x5b3   : > { %v2407_v31 = vadd.f32 %v2400_v49, %v2347_v58 }
 0x5b4   : > { %v2402_v33 = vpop.f32.mrf.mxu1 }
 0x5b5   : > { %v2408_v37 = vadd.f32 %v2402_v33, %v2349_v1  ;;  %v2651_v28 = vpack.c.bf16 %v2407_v31, %v2405_v39  ;;  %v7547_v39 = vld [vmem:[%s10703_s18 + $0x18] sm:$0xff]  }
 0x5b7   : > { %v2652_v53 = vpack.c.bf16 %v2408_v37, %v2406_v35  ;;  %v7546_v35 = vld [vmem:[%s10703_s18 + $0x10] sm:$0xff]   ;;  %v10988_v37 = vmov 0.0  }
 0x5b9   : > { %2878 = vmatprep.mubr.bf16.mxu1 %v2652_v53 }
 0x5ba   : > { %2879 = vmatmul.mubr.bf16.vlgmr.msra.gmra.mxu1 %v2651_v28 }
 0x5bb   : > { %7175 = vmatpush3.bf16.msra.mxu1 %v7531_v56  ;;  %3175 = vmatprep.mubr.bf16.mxu1 %v8173_v11 }
 0x5bc   : > { %7176 = vmatprep.subr.bf16.mxu1 %v7532_v50 }
 0x5bf   : > { %7177 = vmatpush3.bf16.msra.mxu1 %v7533_v51 }
 0x5c0   : > { %7178 = vmatprep.subr.bf16.mxu1 %v7534_v26 }
 0x5c3   : > { %7179 = vmatpush3.bf16.msra.mxu1 %v7535_v42 }
 0x5c4   : > { %7180 = vmatprep.subr.bf16.mxu1 %v7536_v46 }
 0x5c7   : > { %7181 = vmatpush3.bf16.msra.mxu1 %v7537_v22 }
 0x5c8   : > { %7182 = vmatprep.subr.bf16.mxu1 %v7538_v24 }
 0x5cb   : > { %7183 = vmatpush3.bf16.msra.mxu1 %v7539_v40 }
 0x5cc   : > { %7184 = vmatprep.subr.bf16.mxu1 %v7540_v41 }
 0x5cf   : > { %7185 = vmatpush3.bf16.msra.mxu1 %v7541_v45 }
 0x5d0   : > { %7186 = vmatprep.subr.bf16.mxu1 %v7542_v61 }
 0x5d3   : > { %7187 = vmatpush3.bf16.msra.mxu1 %v7543_v44 }
 0x5d4   : > { %7188 = vmatprep.subr.bf16.mxu1 %v7544_v54 }
 0x5d7   : > { %7189 = vmatpush3.bf16.msra.mxu1 %v7545_v23 }
 0x5d8   : > { %3426 = vmatprep.subr.bf16.mxu1 %v8293_v9  ;;  %v10983_v9 = vld [vmem:[#allocation23_spill] sm:$0xff] }
 0x5da   : > { %3176 = vmatmul.mubr.bf16.vlgmr.msra.gmra.mxu1 %v8212_v21 }
 0x5db   : > { %3427 = vmatpush1.bf16.msra.mxu1 %v8384_v55  ;;  %v10984_v55 = vld [vmem:[#allocation25_spill] sm:$0xff] }
 0x5dc   : > { %3428 = vmatprep.subr.bf16.mxu1 %v8389_v57  ;;  %v10985_v57 = vld [vmem:[#allocation27_spill] sm:$0xff] }
 0x5df   : > { %3429 = vmatpush1.bf16.msra.mxu1 %v8395_v59  ;;  %v10986_v59 = vld [vmem:[#allocation29_spill] sm:$0xff] }
 0x5e0   : > { %3430 = vmatprep.subr.bf16.mxu1 %v8401_v60 }
 0x5e3   : > { %3431 = vmatpush1.bf16.msra.mxu1 %v8407_v63 }
 0x5e4   : > { %3432 = vmatprep.subr.bf16.mxu1 %v8413_v0 }
 0x5e7   : > { %3433 = vmatpush1.bf16.msra.mxu1 %v8419_v4  ;;  %v10987_v4 = vld [vmem:[#allocation94_spill] sm:$0xff] }
 0x5e8   : > { %3434 = vmatprep.subr.bf16.mxu1 %v8425_v5  ;;  %v2183_v5 = vadd.f32 %v9067_v43, %v10987_v4  ;;  %v10991_v4 = vld [vmem:[#allocation10_spill] sm:$0xff] }
 0x5eb   : > { %3435 = vmatpush1.bf16.msra.mxu1 %v8431_v6 }
 0x5ec   : > { %3436 = vmatprep.subr.bf16.mxu1 %v8437_v7 }
 0x5ef   : > { %3437 = vmatpush1.bf16.msra.mxu1 %v8443_v8  ;;  %v2904_v8 = vpop.permute.xlu1 %2903 }
 0x5f0   : > { %3438 = vmatprep.subr.bf16.mxu1 %v8449_v10  ;;  %v2899_v10 = vpop.permute.xlu0 %2898 }
 0x5f3   : > { %3439 = vmatpush1.bf16.msra.mxu1 %v8455_v12 }
 0x5f4   : > { %3440 = vmatprep.subr.bf16.mxu1 %v8461_v13 }
 0x5f7   : > { %3441 = vmatpush1.bf16.msra.mxu1 %v8467_v14 }
 0x5f8   : > { %3442 = vmatprep.subr.bf16.mxu1 %v8473_v62 }
 0x5fb   : > { %3443 = vmatpush2.bf16.msra.mxu1 %v8479_v3  ;;  %v2242_v3 = vadd.f32 %v9060_v52, %v2183_v5 }
 0x5fc   : > { %3444 = vmatprep.subr.bf16.mxu1 %v8485_v15 }
 0x5ff   : > { %3445 = vmatpush2.bf16.msra.mxu1 %v8491_v16 }
 0x600   : > { %3446 = vmatprep.subr.bf16.mxu1 %v8497_v17 }
 0x603   : > { %3447 = vmatpush2.bf16.msra.mxu1 %v8503_v18 }
 0x604   : > { %3448 = vmatprep.subr.bf16.mxu1 %v8509_v19 }
 0x607   : > { %3449 = vmatpush2.bf16.msra.mxu1 %v8515_v20 }
 0x608   : > { %3450 = vmatprep.subr.bf16.mxu1 %v8527_v30 }
 0x60b   : > { %3451 = vmatpush2.bf16.msra.mxu1 %v8537_v32 }
 0x60c   : > { %3452 = vmatprep.subr.bf16.mxu1 %v8551_v34 }
 0x60f   : > { %3453 = vmatpush2.bf16.msra.mxu1 %v8561_v36 }
 0x610   : > { %3454 = vmatprep.subr.bf16.mxu1 %v10983_v9  ;;  %v7548_v9 = vld [vmem:[%s10697_s12 + $0x10] sm:$0xff]  }
 0x613   : > { %3455 = vmatpush2.bf16.msra.mxu1 %v10984_v55  ;;  %v7549_v55 = vld [vmem:[%s10989_s30 + $0x10] ss:$8 sps:$4 sm:$0xff]  }
 0x614   : > { %3456 = vmatprep.subr.bf16.mxu1 %v10985_v57  ;;  %v7551_v57 = vld [vmem:[%s10989_s30 + $0x14] ss:$8 sps:$4 sm:$0xff]  }
 0x617   : > { %3457 = vmatpush2.bf16.msra.mxu1 %v10986_v59  ;;  %v7554_v59 = vld [vmem:[%s10989_s30 + $0x4] ss:$8 sps:$4 sm:$0xff]  }
 0x662   : > { %v2638_v60 = vpop.f32.mrf.mxu0 }
 0x663   : > { %v2647_v6 = vadd.f32 %v2638_v60, %v9062_v38  ;;  %v2921_v38 = vpop.permute.xlu1 %2920  ;;  %v7552_v60 = vld [vmem:[%s10989_s30] ss:$8 sps:$4 sm:$0xff]  }
 0x664   : > { %v2640_v63 = vpop.f32.mrf.mxu0 }
 0x665   : > { %v2648_v12 = vadd.f32 %v2640_v63, %v9064_v27  ;;  %v2916_v27 = vpop.permute.xlu0 %2915  ;;  %v9200_v63 = vld [vmem:[%s10694_s9 + $0x74] ss:$8 sps:$4 sm:$0xff]  }
 0x666   : > { %v2642_v0 = vpop.f32.mrf.mxu0 }
 0x667   : > { %v2649_v15 = vadd.f32 %v2642_v0, %v9069_v25  ;;  %v3195_v51 = vpop.permute.xlu1 %3194  ;;  %v10990_v0 = vld [vmem:[#allocation2_spill] sm:$0xff] }
 0x668   : > { %v2644_v13 = vpop.f32.mrf.mxu0  ;;  %v987_v5 = vadd.f32 %v10991_v4, %v10990_v0  ;;  %v9342_v0 = vld [vmem:[%s10694_s9 + $0xe0] ss:$8 sps:$4 sm:$0xff]   ;;  %v9348_v4 = vld [vmem:[%s10694_s9 + $0xd4] ss:$8 sps:$4 sm:$0xff]  }
 0x669   : > { %v2650_v18 = vadd.f32 %v2644_v13, %v2242_v3  ;;  %v3190_v56 = vpop.permute.xlu0 %3189  ;;  %v10995_v3 = vld [vmem:[#allocation12_spill] sm:$0xff] }
 0x66b   : > { %v3210_v45 = vpop.permute.xlu1 %3209 }
 0x66d   : > { %v3205_v24 = vpop.permute.xlu0 %3204 }
 0x67a   : > { %v2880_v7 = vpop.f32.mrf.mxu1 }
 0x67b   : > { %v9154_v14 = vadd.f32 %v2880_v7, %v2647_v6  ;;  %v10992_v7 = vld [vmem:[#allocation3_spill] sm:$0xff] }
 0x67c   : > { %v2882_v62 = vpop.f32.mrf.mxu1 }
 0x67d   : > { %v9158_v16 = vadd.f32 %v2882_v62, %v2648_v12  ;;  %v2906_v30 = vmul.f32 %v2899_v10, %v9154_v14  ;;  %v10994_v62 = vld [vmem:[#allocation4_spill] sm:$0xff] }
 0x67e   : > { %v2884_v17 = vpop.f32.mrf.mxu1 }
 0x67f   : > { %v2907_v19 = vmul.f32 %v2899_v10, %v9158_v16  ;;  %v9161_v20 = vadd.f32 %v2884_v17, %v2649_v15  ;;  %v2923_v47 = vadd.f32 %v2916_v27, %v2906_v30  ;;  %v991_v15 = vadd.f32 %v10995_v3, %v10994_v62  ;;  %v11006_v62 = vld [vmem:[#allocation21_spill] sm:$0xff]  ;;  %v11007_v3 = vld [vmem:[#allocation22_spill] sm:$0xff] }
 0x680   : > { %v2886_v32 = vpop.f32.mrf.mxu1 }
 0x681   : > { %v2908_v34 = vmul.f32 %v2904_v8, %v9161_v20  ;;  %v9165_v36 = vadd.f32 %v2886_v32, %v2650_v18  ;;  %v2924_v52 = vadd.f32 %v2916_v27, %v2907_v19  ;;  %v2927_v29 = vmax.f32 %v2923_v47, 0.0  ;;  %v10997_v32 = vld [vmem:[#allocation6_spill] sm:$0xff] }
 0x683   : > { %v2925_v43 = vadd.f32 %v2921_v38, %v2908_v34  ;;  %v2909_v25 = vmul.f32 %v2904_v8, %v9165_v36  ;;  %v2928_v48 = vmax.f32 %v2924_v52, 0.0  ;;  %v10993_v8 = vld [vmem:[#allocation11_spill] sm:$0xff]  ;;  %v10998_v34 = vld [vmem:[#allocation14_spill] sm:$0xff] }
 0x684   : > { %v989_v10 = vadd.f32 %v10993_v8, %v10992_v7  ;;  %v10999_v52 = vld [vmem:[#allocation7_spill] sm:$0xff]  ;;  %v11003_v8 = vld [vmem:[#allocation18_spill] sm:$0xff] }
 0x685   : > { %v2926_v58 = vadd.f32 %v2921_v38, %v2909_v25  ;;  %v2929_v49 = vmax.f32 %v2925_v43, 0.0  ;;  %v997_v38 = vadd.f32 %v10998_v34, %v10997_v32  ;;  %v11000_v43 = vld [vmem:[#allocation15_spill] sm:$0xff]  ;;  %v11010_v32 = vld [vmem:[#allocation28_spill] sm:$0xff] }
 0x686   : > { %v999_v25 = vadd.f32 %v11000_v43, %v10999_v52  ;;  %v9366_v7 = vld [vmem:[%s10694_s9 + $0xc0] ss:$8 sps:$4 sm:$0xff]  }
 0x687   : > { %v2930_v1 = vmax.f32 %v2926_v58, 0.0  ;;  %v2936_v33 = vpack.c.bf16 %v2929_v49, %v2927_v29  ;;  %v11001_v49 = vld [vmem:[#allocation8_spill] sm:$0xff] }
 0x689   : > { %v2937_v31 = vpack.c.bf16 %v2930_v1, %v2928_v48  ;;  %v11002_v48 = vld [vmem:[#allocation16_spill] sm:$0xff] }
 0x68a   : > { %v1001_v1 = vadd.f32 %v11002_v48, %v11001_v49 }
 0x68b   : > { %2968 = vmatprep.subr.bf16.mxu0 %v2937_v31 }
 0x68c   : > { %2969 = vmatpush1.bf16.msra.mxu0 %v2936_v33 }
 0x68d   : > { %7252 = vmatprep.subr.bf16.mxu0 %v10988_v37 }
 0x68f   : > { %6903 = vmatmul.mubr.msk.bf16.vlgmr.msra.gmra.mxu0 %vm778_vm0, %v7546_v35 }
 0x690   : > { %2996 = vmatprep.mubr.bf16.mxu0 %v10916_v2 }
 0x697   : > { %6904 = vmatmul.mubr.msk.bf16.gmra.mxu0 %vm778_vm0, %v7547_v39 }
 0x698   : > { %7254 = vmatprep.mubr.msk.bf16.mxu0 %vm7788_vm1, %v10988_v37 }
 0x69a   : > { %v7190_v53 = vpop.f32.mrf.mxu1 }
 0x69c   : > { %v7191_v28 = vpop.f32.mrf.mxu1 }
 0x69d   : > { %v7192_v50 = vadd.f32 %v7191_v28, %v7190_v53 }
 0x69e   : > { %v7193_v26 = vpop.f32.mrf.mxu1 }
 0x69f   : > { %v3197_v42 = vmul.f32 %v7192_v50, %v3190_v56 }
 0x6a0   : > { %v7194_v46 = vpop.f32.mrf.mxu1 }
 0x6a1   : > { %v7195_v22 = vadd.f32 %v7194_v46, %v7193_v26  ;;  %v3212_v40 = vadd.f32 %v3205_v24, %v3197_v42  ;;  %v9240_v26 = vld [vmem:[%s10694_s9 + $0x64] ss:$8 sps:$4 sm:$0xff]   ;;  %v9246_v42 = vld [vmem:[%s10694_s9 + $0x60] ss:$8 sps:$4 sm:$0xff]   ;;  %v9252_v46 = vld [vmem:[%s10694_s9 + $0x54] ss:$8 sps:$4 sm:$0xff]  }
 0x6a2   : > { %v9264_v24 = vld [vmem:[%s10694_s9 + $0x44] ss:$8 sps:$4 sm:$0xff]  }
 0x6a3   : > { %v3198_v41 = vmul.f32 %v7195_v22, %v3195_v51  ;;  %v3214_v44 = vmax.f32 %v3212_v40, 0.0  ;;  %v9234_v51 = vld [vmem:[%s10694_s9 + $0x70] ss:$8 sps:$4 sm:$0xff]   ;;  %v9270_v40 = vld [vmem:[%s10694_s9 + $0x40] ss:$8 sps:$4 sm:$0xff]  }
 0x6a4   : > { %v9258_v22 = vld [vmem:[%s10694_s9 + $0x50] ss:$8 sps:$4 sm:$0xff]  }
 0x6a5   : > { %v3213_v61 = vadd.f32 %v3210_v45, %v3198_v41  ;;  %v9276_v41 = vld [vmem:[%s10694_s9 + $0x34] ss:$8 sps:$4 sm:$0xff]   ;;  %v9282_v45 = vld [vmem:[%s10694_s9 + $0x30] ss:$8 sps:$4 sm:$0xff]  }
 0x6a7   : > { %v3215_v54 = vmax.f32 %v3213_v61, 0.0  ;;  %v9288_v61 = vld [vmem:[%s10694_s9 + $0x24] ss:$8 sps:$4 sm:$0xff]  }
 0x6a9   : > { %v3219_v23 = vpack.c.bf16 %v3215_v54, %v3214_v44  ;;  %v9294_v44 = vld [vmem:[%s10694_s9 + $0x20] ss:$8 sps:$4 sm:$0xff]   ;;  %v9300_v54 = vld [vmem:[%s10694_s9 + $0x14] ss:$8 sps:$4 sm:$0xff]  }
 0x6ab   : > { %7253 = vmatpush3.bf16.msra.mxu0 %v3219_v23  ;;  %v9306_v23 = vld [vmem:[%s10694_s9 + $0x10] ss:$8 sps:$4 sm:$0xff]  }
 0x6ac   : > { %3310 = vmatprep.subr.bf16.mxu0 %v7551_v57  ;;  %v9324_v57 = vld [vmem:[%s10694_s9 + $0xf4] ss:$8 sps:$4 sm:$0xff]  }
 0x6ae   : > { %7255 = vmatmul.mubr.msk.bf16.vlgmr.msra.gmra.mxu0 %vm778_vm0, %v7548_v9  ;;  %v9312_v9 = vld [vmem:[%s10694_s9 + $0x4] ss:$8 sps:$4 sm:$0xff]  }
 0x6af   : > { %3330 = vmatprep.mubr.bf16.mxu0 %v10916_v2  ;;  %3311 = vmatpush1.bf16.msra.mxu0 %v7549_v55  ;;  %v9318_v55 = vld [vmem:[%s10694_s9] ss:$8 sps:$4 sm:$0xff]  }
 0x6b0   : > { %3312 = vmatprep.subr.bf16.mxu0 %v7554_v59  ;;  %v9330_v59 = vld [vmem:[%s10694_s9 + $0xf0] ss:$8 sps:$4 sm:$0xff]  }
 0x6b3   : > { %3313 = vmatpush1.bf16.msra.mxu0 %v7552_v60  ;;  %v9336_v60 = vld [vmem:[%s10694_s9 + $0xe4] ss:$8 sps:$4 sm:$0xff]  }
 0x6b4   : > { %3381 = vmatprep.subr.bf16.mxu0 %v9200_v63 }
 0x74f   : > { %v2988_v6 = vpop.f32.mrf.mxu0 }
 0x750   : > { %v9207_v12 = vadd.f32 %v2988_v6, %v987_v5  ;;  %v9354_v5 = vld [vmem:[%s10694_s9 + $0xd0] ss:$8 sps:$4 sm:$0xff]   ;;  %v9360_v6 = vld [vmem:[%s10694_s9 + $0xc4] ss:$8 sps:$4 sm:$0xff]  }
 0x751   : > { %v2990_v13 = vpop.f32.mrf.mxu0 }
 0x752   : > { %v9211_v17 = vadd.f32 %v2990_v13, %v989_v10  ;;  %v11004_v10 = vld [vmem:[#allocation19_spill] sm:$0xff]  ;;  %v11005_v13 = vld [vmem:[#allocation20_spill] sm:$0xff] }
 0x753   : > { %v2992_v18 = vpop.f32.mrf.mxu0 }
 0x754   : > { %v9213_v19 = vadd.f32 %v2992_v18, %v991_v15  ;;  %v11008_v15 = vld [vmem:[#allocation24_spill] sm:$0xff]  ;;  %v11009_v18 = vld [vmem:[#allocation26_spill] sm:$0xff] }
 0x755   : > { %v9215_v30 = vpop.f32.mrf.mxu0 }
 0x756   : > { %10996 = vst [vmem:[#allocation23_spill] sm:$0xff] %v9215_v30 }
 0x757   : > { %v2998_v27 = vpop.f32.mrf.mxu0 }
 0x758   : > { %v9221_v47 = vadd.f32 %v2998_v27, %v997_v38  ;;  %v3352_v38 = vpop.permute.xlu1 %3351  ;;  %v3347_v27 = vpop.permute.xlu0 %3346 }
 0x759   : > { %v3000_v58 = vpop.f32.mrf.mxu0 }
 0x75a   : > { %v9225_v29 = vadd.f32 %v3000_v58, %v999_v25 }
 0x75b   : > { %v3002_v31 = vpop.f32.mrf.mxu0 }
 0x75c   : > { %v9227_v33 = vadd.f32 %v3002_v31, %v1001_v1 }
 0x75d   : > { %v9229_v35 = vpop.f32.mrf.mxu0 }
 0x76e   : > { %v3262_v39 = vpop.f32.mrf.mxu0 }
 0x770   : > { %v7256_v53 = vpop.f32.mrf.mxu0 }
 0x772   : > { %v3265_v56 = vpop.f32.mrf.mxu0 }
 0x773   : > { %v3269_v28 = vpack.c.bf16 %v3265_v56, %v3262_v39  ;;  %v3369_v56 = vpop.permute.xlu1 %3368 }
 0x774   : > { %v7257_v50 = vpop.f32.mrf.mxu0 }
 0x775   : > { %6933 = vmatmul.mubr.msk.bf16.vlgmr.msra.gmra.mxu0 %vm3294_vm2, %v3269_v28  ;;  %v3364_v28 = vpop.permute.xlu0 %3363 }
 0x776   : > { %3382 = vmatpush1.bf16.msra.mxu0 %v9234_v51 }
 0x777   : > { %3383 = vmatprep.subr.bf16.mxu0 %v9240_v26 }
 0x77a   : > { %3384 = vmatpush1.bf16.msra.mxu0 %v9246_v42 }
 0x77b   : > { %3385 = vmatprep.subr.bf16.mxu0 %v9252_v46 }
 0x77e   : > { %3386 = vmatpush1.bf16.msra.mxu0 %v9258_v22 }
 0x77f   : > { %3387 = vmatprep.subr.bf16.mxu0 %v9264_v24 }
 0x782   : > { %3388 = vmatpush1.bf16.msra.mxu0 %v9270_v40 }
 0x783   : > { %3389 = vmatprep.subr.bf16.mxu0 %v9276_v41 }
 0x786   : > { %3390 = vmatpush1.bf16.msra.mxu0 %v9282_v45 }
 0x787   : > { %3391 = vmatprep.subr.bf16.mxu0 %v9288_v61 }
 0x78a   : > { %3392 = vmatpush1.bf16.msra.mxu0 %v9294_v44 }
 0x78b   : > { %3393 = vmatprep.subr.bf16.mxu0 %v9300_v54 }
 0x78e   : > { %3394 = vmatpush1.bf16.msra.mxu0 %v9306_v23 }
 0x78f   : > { %3395 = vmatprep.subr.bf16.mxu0 %v9312_v9 }
 0x792   : > { %3396 = vmatpush1.bf16.msra.mxu0 %v9318_v55 }
 0x793   : > { %3397 = vmatprep.subr.bf16.mxu0 %v9324_v57 }
 0x796   : > { %3398 = vmatpush2.bf16.msra.mxu0 %v9330_v59 }
 0x797   : > { %3399 = vmatprep.subr.bf16.mxu0 %v9336_v60 }
 0x79a   : > { %3400 = vmatpush2.bf16.msra.mxu0 %v9342_v0 }
 0x79b   : > { %3401 = vmatprep.subr.bf16.mxu0 %v9348_v4 }
 0x79e   : > { %3402 = vmatpush2.bf16.msra.mxu0 %v9354_v5 }
 0x79f   : > { %3403 = vmatprep.subr.bf16.mxu0 %v9360_v6 }
 0x7a2   : > { %3404 = vmatpush2.bf16.msra.mxu0 %v9366_v7 }
 0x7a3   : > { %3405 = vmatprep.subr.bf16.mxu0 %v11003_v8 }
 0x7a6   : > { %3406 = vmatpush2.bf16.msra.mxu0 %v11004_v10 }
 0x7a7   : > { %3407 = vmatprep.subr.bf16.mxu0 %v11005_v13 }
 0x7aa   : > { %3408 = vmatpush2.bf16.msra.mxu0 %v11006_v62 }
 0x7ab   : > { %3409 = vmatprep.subr.bf16.mxu0 %v11007_v3 }
 0x7ae   : > { %3410 = vmatpush2.bf16.msra.mxu0 %v11008_v15 }
 0x7af   : > { %3411 = vmatprep.subr.bf16.mxu0 %v11009_v18 }
 0x7b2   : > { %3412 = vmatpush2.bf16.msra.mxu0 %v11010_v32 }
 0x835   : > { %v3332_v34 = vpop.f32.mrf.mxu0 }
 0x836   : > { %v3333_v52 = vadd.f32 %v3332_v34, %v9154_v14 }
 0x837   : > { %v3334_v43 = vpop.f32.mrf.mxu0 }
 0x838   : > { %v3335_v25 = vadd.f32 %v3334_v43, %v9158_v16  ;;  %v3354_v1 = vmul.f32 %v3347_v27, %v3333_v52 }
 0x839   : > { %v3336_v58 = vpop.f32.mrf.mxu0 }
 0x83a   : > { %v3355_v49 = vmul.f32 %v3347_v27, %v3335_v25  ;;  %v3337_v48 = vadd.f32 %v3336_v58, %v9161_v20  ;;  %v3371_v13 = vadd.f32 %v3364_v28, %v3354_v1  ;;  %v7555_v20 = vld [vmem:[%s10700_s15 + $0x50] sm:$0xff]  }
 0x83b   : > { %v3338_v31 = vpop.f32.mrf.mxu0 }
 0x83c   : > { %v3356_v39 = vmul.f32 %v3352_v38, %v3337_v48  ;;  %v3339_v53 = vadd.f32 %v3338_v31, %v9165_v36  ;;  %v3372_v50 = vadd.f32 %v3364_v28, %v3355_v49  ;;  %v3375_v16 = vmax.f32 %v3371_v13, 0.0  ;;  %v7559_v28 = vld [vmem:[%s10700_s15 + $0x60] sm:$0xff]   ;;  %v7562_v13 = vld [vmem:[%s10700_s15 + $0x78] sm:$0xff]  }
 0x83e   : > { %v3373_v8 = vadd.f32 %v3369_v56, %v3356_v39  ;;  %v3357_v10 = vmul.f32 %v3352_v38, %v3339_v53  ;;  %v3376_v3 = vmax.f32 %v3372_v50, 0.0  ;;  %v7556_v39 = vld [vmem:[%s10700_s15 + $0x48] sm:$0xff]   ;;  %v7557_v53 = vld [vmem:[%s10700_s15 + $0x58] sm:$0xff]   ;;  %v7560_v50 = vld [vmem:[%s10700_s15 + $0x70] sm:$0xff]  }
 0x840   : > { %v3374_v62 = vadd.f32 %v3369_v56, %v3357_v10  ;;  %v3377_v14 = vmax.f32 %v3373_v8, 0.0  ;;  %v7558_v56 = vld [vmem:[%s10700_s15 + $0x68] sm:$0xff]   ;;  %v7561_v8 = vld [vmem:[%s10700_s15 + $0x80] sm:$0xff]  }
 0x841   : > { %v11011_v10 = vld [vmem:[#allocation30_spill] sm:$0xff] }
 0x842   : > { %v3378_v15 = vmax.f32 %v3374_v62, 0.0  ;;  %v3379_v32 = vpack.c.bf16 %v3377_v14, %v3375_v16  ;;  %v11012_v62 = vld [vmem:[#allocation40_spill] sm:$0xff]  ;;  %v7563_v14 = vld [vmem:[%s10700_s15 + $0x88] sm:$0xff]  }
 0x843   : > { %v11015_v16 = vld [vmem:[#allocation44_spill] sm:$0xff] }
 0x844   : > { %v3380_v18 = vpack.c.bf16 %v3378_v15, %v3376_v3  ;;  %v11013_v3 = vld [vmem:[#allocation31_spill] sm:$0xff]  ;;  %v11014_v15 = vld [vmem:[#allocation32_spill] sm:$0xff] }
 0x846   : > { %3413 = vmatprep.mubr.bf16.mxu0 %v3380_v18  ;;  %3458 = vmatprep.mubr.bf16.mxu1 %v3380_v18 }
 0x847   : > { %3499 = vmatprep.subr.bf16.mxu0 %v3380_v18  ;;  %3414 = vmatmul.mubr.bf16.vlgmr.msra.gmra.mxu0 %v3379_v32 }
 0x848   : > { %3459 = vmatmul.mubr.bf16.vlgmr.msra.gmra.mxu1 %v3379_v32  ;;  %3500 = vmatpush1.bf16.msra.mxu0 %v3379_v32 }
 0x849   : > { %3517 = vmatprep.mubr.bf16.mxu0 %v10916_v2  ;;  %3568 = vmatprep.mubr.bf16.mxu1 %v10916_v2 }
 0x84f   : > { %6943 = vmatmul.mubr.msk.bf16.vlgmr.msra.gmra.mxu0 %vm778_vm0, %v7555_v20  ;;  %v11018_v20 = vld [vmem:[#allocation34_spill] sm:$0xff] }
 0x850   : > { %3622 = vmatprep.mubr.bf16.mxu0 %v10916_v2 }
 0x907   : > { %v3415_v36 = vpop.f32.mrf.mxu0 }
 0x908   : > { %v3460_v34 = vpop.f32.mrf.mxu1 }
 0x909   : > { %v3417_v38 = vpop.f32.mrf.mxu0 }
 0x90a   : > { %v3462_v27 = vpop.f32.mrf.mxu1 }
 0x90b   : > { %v3419_v52 = vpop.f32.mrf.mxu0 }
 0x90c   : > { %v3464_v43 = vpop.f32.mrf.mxu1  ;;  %v3424_v48 = vpack.c.bf16 %v3419_v52, %v3415_v36  ;;  %v11019_v36 = vld [vmem:[#allocation48_spill] sm:$0xff] }
 0x90d   : > { %v3421_v25 = vpop.f32.mrf.mxu0  ;;  %v3469_v31 = vpack.c.bf16 %v3464_v43, %v3460_v34  ;;  %v11020_v34 = vld [vmem:[#allocation50_spill] sm:$0xff]  ;;  %v11023_v52 = vld [vmem:[#allocation52_spill] sm:$0xff] }
 0x90e   : > { %v3425_v58 = vpack.c.bf16 %v3421_v25, %v3417_v38  ;;  %v3466_v49 = vpop.f32.mrf.mxu1  ;;  %v11021_v38 = vld [vmem:[#allocation35_spill] sm:$0xff]  ;;  %v11024_v43 = vld [vmem:[#allocation54_spill] sm:$0xff]  ;;  %v11025_v25 = vld [vmem:[#allocation37_spill] sm:$0xff] }
 0x90f   : > { %v3470_v1 = vpack.c.bf16 %v3466_v49, %v3462_v27  ;;  %v11022_v27 = vld [vmem:[#allocation36_spill] sm:$0xff] }
 0x910   : > { %3550 = vmatprep.subr.bf16.mxu1 %v3425_v58  ;;  %v11027_v49 = vld [vmem:[#allocation56_spill] sm:$0xff] }
 0x911   : > { %3604 = vmatprep.subr.bf16.mxu0 %v3470_v1  ;;  %3551 = vmatpush1.bf16.msra.mxu1 %v3424_v48 }
 0x912   : > { %3605 = vmatpush1.bf16.msra.mxu0 %v3469_v31  ;;  %3665 = vmatprep.subr.bf16.mxu1 %v3380_v18 }
 0x913   : > { %3716 = vmatprep.subr.bf16.mxu0 %v3425_v58 }
 0x914   : > { %6945 = vmatmul.mubr.msk.bf16.vlgmr.msra.gmra.mxu1 %vm778_vm0, %v7556_v39  ;;  %v11031_v39 = vld [vmem:[#allocation60_spill] sm:$0xff] }
 0x915   : > { %6949 = vmatmul.mubr.msk.bf16.vlgmr.msra.gmra.mxu0 %vm778_vm0, %v7557_v53  ;;  %3666 = vmatpush1.bf16.msra.mxu1 %v3379_v32  ;;  %v11032_v53 = vld [vmem:[#allocation62_spill] sm:$0xff] }
 0x916   : > { %3717 = vmatpush1.bf16.msra.mxu0 %v3424_v48  ;;  %3770 = vmatprep.subr.bf16.mxu1 %v3470_v1 }
 0x917   : > { %3831 = vmatprep.subr.bf16.mxu0 %v3380_v18  ;;  %3683 = vmatprep.mubr.bf16.mxu1 %v10916_v2  ;;  %v11016_v18 = vld [vmem:[#allocation46_spill] sm:$0xff] }
 0x918   : > { %3734 = vmatprep.mubr.bf16.mxu0 %v10916_v2 }
 0x91c   : > { %6955 = vmatmul.mubr.msk.bf16.vlgmr.msra.gmra.mxu1 %vm778_vm0, %v7558_v56  ;;  %v11033_v56 = vld [vmem:[#allocation42_spill] sm:$0xff] }
 0x91d   : > { %6957 = vmatmul.mubr.msk.bf16.vlgmr.msra.gmra.mxu0 %vm778_vm0, %v7559_v28  ;;  %3771 = vmatpush1.bf16.msra.mxu1 %v3469_v31  ;;  %v11034_v28 = vld [vmem:[#allocation43_spill] sm:$0xff] }
 0x91e   : > { %3832 = vmatpush1.bf16.msra.mxu0 %v3379_v32  ;;  %3882 = vmatprep.subr.bf16.mxu1 %v3425_v58  ;;  %v11017_v32 = vld [vmem:[#allocation33_spill] sm:$0xff]  ;;  %v11026_v58 = vld [vmem:[#allocation38_spill] sm:$0xff] }
 0x91f   : > { %3936 = vmatprep.subr.bf16.mxu0 %v3470_v1  ;;  %3788 = vmatprep.mubr.bf16.mxu1 %v10916_v2  ;;  %v11029_v1 = vld [vmem:[#allocation39_spill] sm:$0xff] }
 0x920   : > { %3849 = vmatprep.mubr.bf16.mxu0 %v10916_v2 }
 0x924   : > { %6961 = vmatmul.mubr.msk.bf16.vlgmr.msra.gmra.mxu1 %vm778_vm0, %v7560_v50  ;;  %v11035_v50 = vld [vmem:[#allocation64_spill] sm:$0xff] }
 0x925   : > { %6967 = vmatmul.mubr.msk.bf16.vlgmr.msra.gmra.mxu0 %vm778_vm0, %v7561_v8  ;;  %3883 = vmatpush1.bf16.msra.mxu1 %v3424_v48  ;;  %v11028_v48 = vld [vmem:[#allocation58_spill] sm:$0xff] }
 0x926   : > { %3937 = vmatpush1.bf16.msra.mxu0 %v3469_v31  ;;  %3900 = vmatprep.mubr.bf16.mxu1 %v10916_v2  ;;  %v11030_v31 = vld [vmem:[#allocation41_spill] sm:$0xff]  ;;  %v11036_v8 = vld [vmem:[#allocation66_spill] sm:$0xff] }
 0x927   : > { %3954 = vmatprep.mubr.bf16.mxu0 %v10916_v2  ;;  %3971 = vmatprep.subr.bf16.mxu1 %v11011_v10  ;;  %v11037_v10 = vld [vmem:[#allocation45_spill] sm:$0xff] }
 0x928   : > { %4020 = vmatprep.subr.bf16.mxu0 %v11012_v62  ;;  %v11039_v62 = vld [vmem:[#allocation68_spill] sm:$0xff] }
 0x92c   : > { %6969 = vmatmul.mubr.msk.bf16.vlgmr.msra.gmra.mxu1 %vm778_vm0, %v7562_v13  ;;  %v11038_v13 = vld [vmem:[#allocation47_spill] sm:$0xff] }
 0x92d   : > { %6973 = vmatmul.mubr.msk.bf16.vlgmr.msra.gmra.mxu0 %vm778_vm0, %v7563_v14  ;;  %3972 = vmatpush1.bf16.msra.mxu1 %v11013_v3  ;;  %v11040_v14 = vld [vmem:[#allocation70_spill] sm:$0xff]  ;;  %v11041_v3 = vld [vmem:[#allocation49_spill] sm:$0xff] }
 0x92e   : > { %3973 = vmatprep.subr.bf16.mxu1 %v11014_v15  ;;  %4021 = vmatpush1.bf16.msra.mxu0 %v11015_v16  ;;  %v11042_v15 = vld [vmem:[#allocation51_spill] sm:$0xff]  ;;  %v11043_v16 = vld [vmem:[#allocation72_spill] sm:$0xff] }
 0x92f   : > { %4022 = vmatprep.subr.bf16.mxu0 %v11016_v18  ;;  %v11044_v18 = vld [vmem:[#allocation74_spill] sm:$0xff] }
 0x931   : > { %3974 = vmatpush1.bf16.msra.mxu1 %v11017_v32  ;;  %v11045_v32 = vld [vmem:[#allocation53_spill] sm:$0xff] }
 0x932   : > { %3975 = vmatprep.subr.bf16.mxu1 %v11018_v20  ;;  %4023 = vmatpush1.bf16.msra.mxu0 %v11019_v36  ;;  %v11046_v20 = vld [vmem:[#allocation55_spill] sm:$0xff]  ;;  %v11047_v36 = vld [vmem:[#allocation76_spill] sm:$0xff] }
 0x933   : > { %4024 = vmatprep.subr.bf16.mxu0 %v11020_v34  ;;  %v11048_v34 = vld [vmem:[#allocation78_spill] sm:$0xff] }
 0x935   : > { %3976 = vmatpush1.bf16.msra.mxu1 %v11021_v38  ;;  %v11049_v38 = vld [vmem:[#allocation57_spill] sm:$0xff] }
 0x936   : > { %3977 = vmatprep.subr.bf16.mxu1 %v11022_v27  ;;  %4025 = vmatpush1.bf16.msra.mxu0 %v11023_v52  ;;  %v11050_v27 = vld [vmem:[#allocation59_spill] sm:$0xff]  ;;  %v11051_v52 = vld [vmem:[#allocation80_spill] sm:$0xff] }
 0x937   : > { %4026 = vmatprep.subr.bf16.mxu0 %v11024_v43  ;;  %v11052_v43 = vld [vmem:[#allocation82_spill] sm:$0xff] }
 0x939   : > { %3978 = vmatpush1.bf16.msra.mxu1 %v11025_v25  ;;  %v11053_v25 = vld [vmem:[#allocation61_spill] sm:$0xff] }
 0x93a   : > { %3979 = vmatprep.subr.bf16.mxu1 %v11026_v58  ;;  %4027 = vmatpush1.bf16.msra.mxu0 %v11027_v49  ;;  %v11054_v58 = vld [vmem:[#allocation63_spill] sm:$0xff] }
 0x93b   : > { %4028 = vmatprep.subr.bf16.mxu0 %v11028_v48  ;;  %v11055_v49 = vld [vmem:[#allocation83_spill] sm:$0xff]  ;;  %v11056_v48 = vld [vmem:[#allocation84_spill] sm:$0xff] }
 0x93d   : > { %3980 = vmatpush1.bf16.msra.mxu1 %v11029_v1  ;;  %v11057_v1 = vld [vmem:[#allocation65_spill] sm:$0xff] }
 0x93e   : > { %3981 = vmatprep.subr.bf16.mxu1 %v11030_v31  ;;  %4029 = vmatpush1.bf16.msra.mxu0 %v11031_v39  ;;  %v11058_v31 = vld [vmem:[#allocation67_spill] sm:$0xff]  ;;  %v11059_v39 = vld [vmem:[#allocation85_spill] sm:$0xff] }
 0x93f   : > { %4030 = vmatprep.subr.bf16.mxu0 %v11032_v53  ;;  %v11060_v53 = vld [vmem:[#allocation86_spill] sm:$0xff] }
 0x941   : > { %3982 = vmatpush1.bf16.msra.mxu1 %v11033_v56  ;;  %v11061_v56 = vld [vmem:[#allocation69_spill] sm:$0xff] }
 0x942   : > { %3983 = vmatprep.subr.bf16.mxu1 %v11034_v28  ;;  %4031 = vmatpush1.bf16.msra.mxu0 %v11035_v50  ;;  %v11062_v28 = vld [vmem:[#allocation71_spill] sm:$0xff] }
 0x943   : > { %4032 = vmatprep.subr.bf16.mxu0 %v11036_v8  ;;  %v11063_v50 = vld [vmem:[#allocation87_spill] sm:$0xff]  ;;  %v11064_v8 = vld [vmem:[#allocation88_spill] sm:$0xff] }
 0x945   : > { %3984 = vmatpush1.bf16.msra.mxu1 %v11037_v10  ;;  %v11065_v10 = vld [vmem:[#allocation73_spill] sm:$0xff] }
 0x946   : > { %3985 = vmatprep.subr.bf16.mxu1 %v11038_v13  ;;  %4033 = vmatpush1.bf16.msra.mxu0 %v11039_v62  ;;  %v11066_v13 = vld [vmem:[#allocation75_spill] sm:$0xff]  ;;  %v11067_v62 = vld [vmem:[#allocation89_spill] sm:$0xff] }
 0x947   : > { %4034 = vmatprep.subr.bf16.mxu0 %v11040_v14  ;;  %v11068_v14 = vld [vmem:[#allocation90_spill] sm:$0xff] }
 0x949   : > { %3986 = vmatpush1.bf16.msra.mxu1 %v11041_v3  ;;  %v11069_v3 = vld [vmem:[#allocation77_spill] sm:$0xff] }
 0x94a   : > { %3987 = vmatprep.subr.bf16.mxu1 %v11042_v15  ;;  %4035 = vmatpush1.bf16.msra.mxu0 %v11043_v16  ;;  %v11070_v15 = vld [vmem:[#allocation79_spill] sm:$0xff] }
 0x94b   : > { %4036 = vmatprep.subr.bf16.mxu0 %v11044_v18  ;;  %v11071_v16 = vld [vmem:[#allocation91_spill] sm:$0xff]  ;;  %v11072_v18 = vld [vmem:[#allocation92_spill] sm:$0xff] }
 0x94d   : > { %3988 = vmatpush2.bf16.msra.mxu1 %v11045_v32  ;;  %v11073_v32 = vld [vmem:[#allocation81_spill] sm:$0xff] }
 0x94e   : > { %3989 = vmatprep.subr.bf16.mxu1 %v11046_v20  ;;  %4037 = vmatpush2.bf16.msra.mxu0 %v11047_v36  ;;  %v11074_v20 = vld [vmem:[#allocation93_spill] sm:$0xff] }
 0x94f   : > { %4038 = vmatprep.subr.bf16.mxu0 %v11048_v34  ;;  %v7564_v36 = vld [vmem:[%s11075_s23 + $0x78] sm:$0xff]   ;;  %v3519_v34 = vpop.f32.mrf.mxu0 }
 0x951   : > { %3990 = vmatpush2.bf16.msra.mxu1 %v11049_v38  ;;  %v3521_v38 = vpop.f32.mrf.mxu0 }
 0x952   : > { %3991 = vmatprep.subr.bf16.mxu1 %v11050_v27  ;;  %4039 = vmatpush2.bf16.msra.mxu0 %v11051_v52 }
 0x953   : > { %4040 = vmatprep.subr.bf16.mxu0 %v11052_v43  ;;  %v3523_v27 = vpop.f32.mrf.mxu0 }
 0x955   : > { %3992 = vmatpush2.bf16.msra.mxu1 %v11053_v25  ;;  %v3525_v52 = vpop.f32.mrf.mxu0 }
 0x956   : > { %3993 = vmatprep.subr.bf16.mxu1 %v11054_v58  ;;  %4041 = vmatpush2.bf16.msra.mxu0 %v11055_v49 }
 0x957   : > { %4042 = vmatprep.subr.bf16.mxu0 %v11056_v48 }
 0x959   : > { %3994 = vmatpush2.bf16.msra.mxu1 %v11057_v1 }
 0x95a   : > { %3995 = vmatprep.subr.bf16.mxu1 %v11058_v31  ;;  %4043 = vmatpush2.bf16.msra.mxu0 %v11059_v39 }
 0x95b   : > { %4044 = vmatprep.subr.bf16.mxu0 %v11060_v53 }
 0x95d   : > { %3996 = vmatpush2.bf16.msra.mxu1 %v11061_v56 }
 0x95e   : > { %3997 = vmatprep.subr.bf16.mxu1 %v11062_v28  ;;  %4045 = vmatpush2.bf16.msra.mxu0 %v11063_v50 }
 0x95f   : > { %4046 = vmatprep.subr.bf16.mxu0 %v11064_v8 }
 0x961   : > { %3998 = vmatpush2.bf16.msra.mxu1 %v11065_v10 }
 0x962   : > { %3999 = vmatprep.subr.bf16.mxu1 %v11066_v13  ;;  %4047 = vmatpush2.bf16.msra.mxu0 %v11067_v62 }
 0x963   : > { %4048 = vmatprep.subr.bf16.mxu0 %v11068_v14 }
 0x965   : > { %4000 = vmatpush2.bf16.msra.mxu1 %v11069_v3 }
 0x966   : > { %4001 = vmatprep.subr.bf16.mxu1 %v11070_v15  ;;  %4049 = vmatpush2.bf16.msra.mxu0 %v11071_v16 }
 0x967   : > { %4050 = vmatprep.subr.bf16.mxu0 %v11072_v18 }
 0x969   : > { %4002 = vmatpush2.bf16.msra.mxu1 %v11073_v32 }
 0x96a   : > { %4051 = vmatpush2.bf16.msra.mxu0 %v11074_v20 }
 0x96b   : > { %7198 = vmatprep.subr.bf16.mxu0 %v7564_v36 }
 0x9d4   : > { %v3570_v43 = vpop.f32.mrf.mxu1 }
 0x9d5   : > { %v3624_v25 = vpop.f32.mrf.mxu0  ;;  %v3571_v53 = vadd.f32 %v3570_v43, %v3519_v34 }
 0x9d6   : > { %v3572_v58 = vpop.f32.mrf.mxu1 }
 0x9d7   : > { %v3626_v49 = vpop.f32.mrf.mxu0  ;;  %v3573_v1 = vadd.f32 %v3572_v58, %v3521_v38  ;;  %v3633_v3 = vadd.f32 %v3624_v25, %v3571_v53 }
 0x9d8   : > { %v3574_v48 = vpop.f32.mrf.mxu1 }
 0x9d9   : > { %v3575_v31 = vadd.f32 %v3574_v48, %v3523_v27  ;;  %v3628_v39 = vpop.f32.mrf.mxu0  ;;  %v3634_v13 = vadd.f32 %v3626_v49, %v3573_v1 }
 0x9da   : > { %v3576_v56 = vpop.f32.mrf.mxu1 }
 0x9db   : > { %v3577_v28 = vadd.f32 %v3576_v56, %v3525_v52  ;;  %v3630_v50 = vpop.f32.mrf.mxu0  ;;  %v3635_v8 = vadd.f32 %v3628_v39, %v3575_v31 }
 0x9dc   : > { %v3685_v10 = vpop.f32.mrf.mxu1 }
 0x9dd   : > { %v3636_v62 = vadd.f32 %v3630_v50, %v3577_v28  ;;  %v3736_v14 = vpop.f32.mrf.mxu0  ;;  %v3969_v20 = vpack.c.bf16 %v3635_v8, %v3633_v3 }
 0x9de   : > { %v3737_v15 = vadd.f32 %v3736_v14, %v3685_v10  ;;  %v3687_v16 = vpop.f32.mrf.mxu1 }
 0x9df   : > { %v3970_v18 = vpack.c.bf16 %v3636_v62, %v3634_v13  ;;  %v3738_v32 = vpop.f32.mrf.mxu0 }
 0x9e0   : > { %v3739_v36 = vadd.f32 %v3738_v32, %v3687_v16  ;;  %v3689_v30 = vpop.f32.mrf.mxu1 }
 0x9e1   : > { %v3740_v38 = vpop.f32.mrf.mxu0  ;;  %4003 = vmatprep.mubr.bf16.mxu1 %v3970_v18 }
 0x9e2   : > { %v3741_v27 = vadd.f32 %v3740_v38, %v3689_v30  ;;  %v3691_v34 = vpop.f32.mrf.mxu1  ;;  %4004 = vmatmul.mubr.bf16.vlgmr.msra.gmra.mxu1 %v3969_v20 }
 0x9e3   : > { %v3742_v52 = vpop.f32.mrf.mxu0  ;;  %4160 = vmatprep.mubr.bf16.mxu1 %v10916_v2 }
 0x9e4   : > { %v3743_v43 = vadd.f32 %v3742_v52, %v3691_v34  ;;  %v3790_v58 = vpop.f32.mrf.mxu1 }
 0x9e5   : > { %v9494_v49 = vadd.f32 %v3790_v58, %v3737_v15  ;;  %v3851_v25 = vpop.f32.mrf.mxu0 }
 0x9e6   : > { %v3792_v48 = vpop.f32.mrf.mxu1 }
 0x9e7   : > { %v9496_v1 = vadd.f32 %v3792_v48, %v3739_v36  ;;  %v3853_v31 = vpop.f32.mrf.mxu0 }
 0x9e8   : > { %v3794_v39 = vpop.f32.mrf.mxu1 }
 0x9e9   : > { %v9498_v53 = vadd.f32 %v3794_v39, %v3741_v27  ;;  %v3855_v56 = vpop.f32.mrf.mxu0  ;;  %v7568_v39 = vld [vmem:[%s11075_s23 + $0x68] sm:$0xff]  }
 0x9ea   : > { %v3796_v28 = vpop.f32.mrf.mxu1 }
 0x9eb   : > { %v9500_v30 = vadd.f32 %v3796_v28, %v3743_v43  ;;  %v3857_v50 = vpop.f32.mrf.mxu0  ;;  %v7565_v43 = vld [vmem:[%s11075_s23 + $0x38] sm:$0xff]   ;;  %v7570_v28 = vld [vmem:[%s11075_s23 + $0x60] sm:$0xff]  }
 0x9ec   : > { %v3902_v8 = vpop.f32.mrf.mxu1 }
 0x9ed   : > { %v3956_v10 = vpop.f32.mrf.mxu0  ;;  %v3903_v18 = vadd.f32 %v3902_v8, %v3851_v25  ;;  %v7567_v25 = vld [vmem:[%s11075_s23 + $0x30] sm:$0xff]   ;;  %v7572_v8 = vld [vmem:[%s11075_s23 + $0x58] sm:$0xff]  }
 0x9ee   : > { %v3904_v13 = vpop.f32.mrf.mxu1 }
 0x9ef   : > { %v3958_v62 = vpop.f32.mrf.mxu0  ;;  %v3905_v3 = vadd.f32 %v3904_v13, %v3853_v31  ;;  %v3965_v52 = vadd.f32 %v3956_v10, %v3903_v18  ;;  %v7566_v31 = vld [vmem:[%s11075_s23 + $0x70] sm:$0xff]   ;;  %v7573_v10 = vld [vmem:[%s11075_s23 + $0x18] sm:$0xff]  }
 0x9f0   : > { %v3906_v14 = vpop.f32.mrf.mxu1  ;;  %v7574_v13 = vld [vmem:[%s11075_s23 + $0x50] sm:$0xff]  }
 0x9f1   : > { %v3907_v15 = vadd.f32 %v3906_v14, %v3855_v56  ;;  %v3960_v16 = vpop.f32.mrf.mxu0  ;;  %v3966_v27 = vadd.f32 %v3958_v62, %v3905_v3  ;;  %v7569_v56 = vld [vmem:[%s11075_s23 + $0x28] sm:$0xff]   ;;  %v7575_v62 = vld [vmem:[%s11075_s23 + $0x10] sm:$0xff]  }
 0x9f2   : > { %v3908_v32 = vpop.f32.mrf.mxu1  ;;  %v7576_v14 = vld [vmem:[%s11075_s23 + $0x48] sm:$0xff]   ;;  %v9551_v18 = vld [vmem:[%s10694_s9 + $0x174] ss:$8 sps:$4 sm:$0xff]  }
 0x9f3   : > { %v3909_v20 = vadd.f32 %v3908_v32, %v3857_v50  ;;  %v3967_v36 = vadd.f32 %v3960_v16, %v3907_v15  ;;  %v3962_v38 = vpop.f32.mrf.mxu0  ;;  %v7571_v50 = vld [vmem:[%s11075_s23 + $0x20] sm:$0xff]   ;;  %v7577_v3 = vld [vmem:[%s11075_s23 + $0x8] sm:$0xff]   ;;  %v9558_v32 = vld [vmem:[%s10694_s9 + $0x170] ss:$8 sps:$4 sm:$0xff]  }
 0x9f4   : > { %v7578_v15 = vld [vmem:[%s11075_s23 + $0x40] sm:$0xff]  }
 0x9f5   : > { %v3968_v34 = vadd.f32 %v3962_v38, %v3909_v20  ;;  %v4018_v48 = vpack.c.bf16 %v3967_v36, %v3965_v52  ;;  %v7579_v16 = vld [vmem:[%s11075_s23] sm:$0xff]   ;;  %v9576_v38 = vld [vmem:[%s10694_s9 + $0x154] ss:$8 sps:$4 sm:$0xff]  }
 0x9f6   : > { %v9564_v20 = vld [vmem:[%s10694_s9 + $0x164] ss:$8 sps:$4 sm:$0xff]   ;;  %v9570_v36 = vld [vmem:[%s10694_s9 + $0x160] ss:$8 sps:$4 sm:$0xff]  }
 0x9f7   : > { %v4019_v58 = vpack.c.bf16 %v3968_v34, %v3966_v27  ;;  %v9582_v27 = vld [vmem:[%s10694_s9 + $0x150] ss:$8 sps:$4 sm:$0xff]   ;;  %v9588_v34 = vld [vmem:[%s10694_s9 + $0x144] ss:$8 sps:$4 sm:$0xff]   ;;  %v9594_v52 = vld [vmem:[%s10694_s9 + $0x140] ss:$8 sps:$4 sm:$0xff]  }
 0x9f8   : > { %11076 = vst [vmem:[#allocation25_spill] sm:$0xff] %v9582_v27  ;;  %11077 = vst [vmem:[#allocation27_spill] sm:$0xff] %v9588_v34 }
 0x9f9   : > { %4052 = vmatprep.mubr.bf16.mxu0 %v4019_v58  ;;  %11078 = vst [vmem:[#allocation29_spill] sm:$0xff] %v9594_v52  ;;  %v9600_v58 = vld [vmem:[%s10694_s9 + $0x134] ss:$8 sps:$4 sm:$0xff]  }
 0x9fa   : > { %4053 = vmatmul.mubr.bf16.vlgmr.msra.gmra.mxu0 %v4018_v48  ;;  %11079 = vst [vmem:[#allocation94_spill] sm:$0xff] %v9600_v58  ;;  %v9612_v48 = vld [vmem:[%s10694_s9 + $0x124] ss:$8 sps:$4 sm:$0xff]  }
 0x9fb   : > { %7199 = vmatpush3.bf16.msra.mxu0 %v7565_v43  ;;  %4349 = vmatprep.mubr.bf16.mxu0 %v8173_v11  ;;  %v9606_v43 = vld [vmem:[%s10694_s9 + $0x130] ss:$8 sps:$4 sm:$0xff]   ;;  %11081 = vst [vmem:[#allocation10_spill] sm:$0xff] %v9612_v48 }
 0x9fc   : > { %7200 = vmatprep.subr.bf16.mxu0 %v7566_v31  ;;  %11080 = vst [vmem:[#allocation2_spill] sm:$0xff] %v9606_v43  ;;  %v9618_v31 = vld [vmem:[%s10694_s9 + $0x120] ss:$8 sps:$4 sm:$0xff]  }
 0x9fd   : > { %11082 = vst [vmem:[#allocation3_spill] sm:$0xff] %v9618_v31 }
 0x9ff   : > { %7201 = vmatpush3.bf16.msra.mxu0 %v7567_v25  ;;  %v9624_v25 = vld [vmem:[%s10694_s9 + $0x114] ss:$8 sps:$4 sm:$0xff]  }
 0xa00   : > { %7202 = vmatprep.subr.bf16.mxu0 %v7568_v39  ;;  %11083 = vst [vmem:[#allocation11_spill] sm:$0xff] %v9624_v25  ;;  %v9630_v39 = vld [vmem:[%s10694_s9 + $0x110] ss:$8 sps:$4 sm:$0xff]  }
 0xa01   : > { %11084 = vst [vmem:[#allocation4_spill] sm:$0xff] %v9630_v39 }
 0xa03   : > { %7203 = vmatpush3.bf16.msra.mxu0 %v7569_v56  ;;  %v9636_v56 = vld [vmem:[%s10694_s9 + $0x104] ss:$8 sps:$4 sm:$0xff]  }
 0xa04   : > { %7204 = vmatprep.subr.bf16.mxu0 %v7570_v28  ;;  %11085 = vst [vmem:[#allocation12_spill] sm:$0xff] %v9636_v56  ;;  %v9642_v28 = vld [vmem:[%s10694_s9 + $0x100] ss:$8 sps:$4 sm:$0xff]  }
 0xa05   : > { %11086 = vst [vmem:[#allocation6_spill] sm:$0xff] %v9642_v28 }
 0xa07   : > { %7205 = vmatpush3.bf16.msra.mxu0 %v7571_v50  ;;  %v9648_v50 = vld [vmem:[%s10694_s9 + $0x1f4] ss:$8 sps:$4 sm:$0xff]  }
 0xa08   : > { %7206 = vmatprep.subr.bf16.mxu0 %v7572_v8  ;;  %11087 = vst [vmem:[#allocation14_spill] sm:$0xff] %v9648_v50  ;;  %v9654_v8 = vld [vmem:[%s10694_s9 + $0x1f0] ss:$8 sps:$4 sm:$0xff]  }
 0xa09   : > { %11088 = vst [vmem:[#allocation7_spill] sm:$0xff] %v9654_v8 }
 0xa0b   : > { %7207 = vmatpush3.bf16.msra.mxu0 %v7573_v10  ;;  %v9660_v10 = vld [vmem:[%s10694_s9 + $0x1e4] ss:$8 sps:$4 sm:$0xff]  }
 0xa0c   : > { %7208 = vmatprep.subr.bf16.mxu0 %v7574_v13  ;;  %11089 = vst [vmem:[#allocation15_spill] sm:$0xff] %v9660_v10  ;;  %v9666_v13 = vld [vmem:[%s10694_s9 + $0x1e0] ss:$8 sps:$4 sm:$0xff]  }
 0xa0d   : > { %11090 = vst [vmem:[#allocation8_spill] sm:$0xff] %v9666_v13 }
 0xa0f   : > { %7209 = vmatpush3.bf16.msra.mxu0 %v7575_v62  ;;  %v9672_v62 = vld [vmem:[%s10694_s9 + $0x1d4] ss:$8 sps:$4 sm:$0xff]  }
 0xa10   : > { %7210 = vmatprep.subr.bf16.mxu0 %v7576_v14  ;;  %11091 = vst [vmem:[#allocation16_spill] sm:$0xff] %v9672_v62  ;;  %v9678_v14 = vld [vmem:[%s10694_s9 + $0x1d0] ss:$8 sps:$4 sm:$0xff]  }
 0xa11   : > { %11092 = vst [vmem:[#allocation18_spill] sm:$0xff] %v9678_v14 }
 0xa13   : > { %7211 = vmatpush3.bf16.msra.mxu0 %v7577_v3  ;;  %v9684_v3 = vld [vmem:[%s10694_s9 + $0x1c4] ss:$8 sps:$4 sm:$0xff]  }
 0xa14   : > { %7212 = vmatprep.subr.bf16.mxu0 %v7578_v15  ;;  %11093 = vst [vmem:[#allocation19_spill] sm:$0xff] %v9684_v3  ;;  %v9690_v15 = vld [vmem:[%s10694_s9 + $0x1c0] ss:$8 sps:$4 sm:$0xff]  }
 0xa15   : > { %11094 = vst [vmem:[#allocation20_spill] sm:$0xff] %v9690_v15 }
 0xa17   : > { %7213 = vmatpush3.bf16.msra.mxu0 %v7579_v16  ;;  %v9696_v16 = vld [vmem:[%s10694_s9 + $0x1b4] ss:$8 sps:$4 sm:$0xff]  }
 0xa18   : > { %4589 = vmatprep.subr.bf16.mxu0 %v9551_v18  ;;  %11095 = vst [vmem:[#allocation21_spill] sm:$0xff] %v9696_v16 }
 0xa1a   : > { %4350 = vmatmul.mubr.bf16.vlgmr.msra.gmra.mxu0 %v8212_v21 }
 0xa1b   : > { %4590 = vmatpush1.bf16.msra.mxu0 %v9558_v32 }
 0xa1c   : > { %4591 = vmatprep.subr.bf16.mxu0 %v9564_v20 }
 0xa1f   : > { %4592 = vmatpush1.bf16.msra.mxu0 %v9570_v36 }
 0xa20   : > { %4593 = vmatprep.subr.bf16.mxu0 %v9576_v38 }
 0xa23   : > { %4594 = vmatpush1.bf16.msra.mxu0 %v9582_v27 }
 0xa24   : > { %4595 = vmatprep.subr.bf16.mxu0 %v9588_v34 }
 0xa27   : > { %4596 = vmatpush1.bf16.msra.mxu0 %v9594_v52 }
 0xa28   : > { %4597 = vmatprep.subr.bf16.mxu0 %v9600_v58 }
 0xa2b   : > { %4598 = vmatpush1.bf16.msra.mxu0 %v9606_v43 }
 0xa2c   : > { %4599 = vmatprep.subr.bf16.mxu0 %v9612_v48 }
 0xa2f   : > { %4600 = vmatpush1.bf16.msra.mxu0 %v9618_v31 }
 0xa30   : > { %4601 = vmatprep.subr.bf16.mxu0 %v9624_v25 }
 0xa33   : > { %4602 = vmatpush1.bf16.msra.mxu0 %v9630_v39 }
 0xa34   : > { %4603 = vmatprep.subr.bf16.mxu0 %v9636_v56 }
 0xa37   : > { %4604 = vmatpush1.bf16.msra.mxu0 %v9642_v28 }
 0xa38   : > { %4605 = vmatprep.subr.bf16.mxu0 %v9648_v50  ;;  %v4073_v50 = vpop.permute.xlu0 %4072 }
 0xa3b   : > { %4606 = vmatpush2.bf16.msra.mxu0 %v9654_v8  ;;  %v4078_v8 = vpop.permute.xlu1 %4077 }
 0xa3c   : > { %4607 = vmatprep.subr.bf16.mxu0 %v9660_v10 }
 0xa3f   : > { %4608 = vmatpush2.bf16.msra.mxu0 %v9666_v13 }
 0xa40   : > { %4609 = vmatprep.subr.bf16.mxu0 %v9672_v62 }
 0xa43   : > { %4610 = vmatpush2.bf16.msra.mxu0 %v9678_v14  ;;  %v9702_v14 = vld [vmem:[%s10694_s9 + $0x1b0] ss:$8 sps:$4 sm:$0xff]  }
 0xa44   : > { %4611 = vmatprep.subr.bf16.mxu0 %v9684_v3  ;;  %11096 = vst [vmem:[#allocation22_spill] sm:$0xff] %v9702_v14  ;;  %v9708_v3 = vld [vmem:[%s10694_s9 + $0x1a4] ss:$8 sps:$4 sm:$0xff]  }
 0xa45   : > { %11097 = vst [vmem:[#allocation24_spill] sm:$0xff] %v9708_v3 }
 0xa47   : > { %4612 = vmatpush2.bf16.msra.mxu0 %v9690_v15  ;;  %v9714_v15 = vld [vmem:[%s10694_s9 + $0x1a0] ss:$8 sps:$4 sm:$0xff]  }
 0xa48   : > { %4613 = vmatprep.subr.bf16.mxu0 %v9696_v16  ;;  %11098 = vst [vmem:[#allocation26_spill] sm:$0xff] %v9714_v15  ;;  %v9720_v16 = vld [vmem:[%s10694_s9 + $0x194] ss:$8 sps:$4 sm:$0xff]  }
 0xa49   : > { %11099 = vst [vmem:[#allocation28_spill] sm:$0xff] %v9720_v16 }
 0xa4b   : > { %4614 = vmatpush2.bf16.msra.mxu0 %v9702_v14  ;;  %v9726_v14 = vld [vmem:[%s10694_s9 + $0x190] ss:$8 sps:$4 sm:$0xff]  }
 0xa4c   : > { %4615 = vmatprep.subr.bf16.mxu0 %v9708_v3  ;;  %11100 = vst [vmem:[#allocation30_spill] sm:$0xff] %v9726_v14  ;;  %v9732_v3 = vld [vmem:[%s10694_s9 + $0x184] ss:$8 sps:$4 sm:$0xff]  }
 0xa4d   : > { %11101 = vst [vmem:[#allocation40_spill] sm:$0xff] %v9732_v3 }
 0xa4f   : > { %4616 = vmatpush2.bf16.msra.mxu0 %v9714_v15  ;;  %v9738_v15 = vld [vmem:[%s10694_s9 + $0x180] ss:$8 sps:$4 sm:$0xff]  }
 0xa50   : > { %4617 = vmatprep.subr.bf16.mxu0 %v9720_v16  ;;  %11102 = vst [vmem:[#allocation31_spill] sm:$0xff] %v9738_v15 }
 0xa53   : > { %4618 = vmatpush2.bf16.msra.mxu0 %v9726_v14 }
 0xa54   : > { %4619 = vmatprep.subr.bf16.mxu0 %v9732_v3 }
 0xa57   : > { %4620 = vmatpush2.bf16.msra.mxu0 %v9738_v15 }
 0xaa2   : > { %v4005_v16 = vpop.f32.mrf.mxu1 }
 0xaa3   : > { %v4014_v10 = vadd.f32 %v4005_v16, %v9494_v49 }
 0xaa4   : > { %v4007_v62 = vpop.f32.mrf.mxu1 }
 0xaa5   : > { %v4015_v28 = vadd.f32 %v4007_v62, %v9496_v1 }
 0xaa6   : > { %v4009_v13 = vpop.f32.mrf.mxu1 }
 0xaa7   : > { %v4016_v25 = vadd.f32 %v4009_v13, %v9498_v53 }
 0xaa8   : > { %v4011_v56 = vpop.f32.mrf.mxu1 }
 0xaa9   : > { %v4017_v15 = vadd.f32 %v4011_v56, %v9500_v30 }
 0xaba   : > { %v4054_v14 = vpop.f32.mrf.mxu0 }
 0xabb   : > { %v9743_v39 = vadd.f32 %v4054_v14, %v4014_v10  ;;  %v4095_v10 = vpop.permute.xlu1 %4094  ;;  %v4090_v14 = vpop.permute.xlu0 %4089 }
 0xabc   : > { %v4056_v3 = vpop.f32.mrf.mxu0 }
 0xabd   : > { %v9746_v31 = vadd.f32 %v4056_v3, %v4015_v28  ;;  %v4080_v49 = vmul.f32 %v4073_v50, %v9743_v39 }
 0xabe   : > { %v4058_v48 = vpop.f32.mrf.mxu0 }
 0xabf   : > { %v4081_v43 = vmul.f32 %v4073_v50, %v9746_v31  ;;  %v9750_v58 = vadd.f32 %v4058_v48, %v4016_v25  ;;  %v4097_v13 = vadd.f32 %v4090_v14, %v4080_v49  ;;  %v7580_v50 = vld [vmem:[%s10703_s18 + $0x20] sm:$0xff]  }
 0xac0   : > { %v4060_v16 = vpop.f32.mrf.mxu0 }
 0xac1   : > { %v4082_v1 = vmul.f32 %v4078_v8, %v9750_v58  ;;  %v9754_v62 = vadd.f32 %v4060_v16, %v4017_v15  ;;  %v4098_v52 = vadd.f32 %v4090_v14, %v4081_v43  ;;  %v4101_v48 = vmax.f32 %v4097_v13, 0.0  ;;  %v4364_v43 = vpop.permute.xlu0 %4363 }
 0xac3   : > { %v4099_v53 = vadd.f32 %v4095_v10, %v4082_v1  ;;  %v4083_v28 = vmul.f32 %v4078_v8, %v9754_v62  ;;  %v4102_v56 = vmax.f32 %v4098_v52, 0.0  ;;  %v7581_v52 = vld [vmem:[%s10703_s18 + $0x28] sm:$0xff]  }
 0xac5   : > { %v4100_v3 = vadd.f32 %v4095_v10, %v4083_v28  ;;  %v4103_v30 = vmax.f32 %v4099_v53, 0.0  ;;  %v4379_v14 = vpop.permute.xlu0 %4378 }
 0xac7   : > { %v4104_v34 = vmax.f32 %v4100_v3, 0.0  ;;  %v4110_v27 = vpack.c.bf16 %v4103_v30, %v4101_v48 }
 0xac9   : > { %v4111_v25 = vpack.c.bf16 %v4104_v34, %v4102_v56 }
 0xacb   : > { %4142 = vmatprep.subr.bf16.mxu1 %v4111_v25  ;;  %v7582_v25 = vld [vmem:[%s10697_s12 + $0x18] sm:$0xff]  }
 0xacc   : > { %4143 = vmatpush1.bf16.msra.mxu1 %v4110_v27  ;;  %v4369_v27 = vpop.permute.xlu1 %4368 }
 0xacd   : > { %7258 = vmatprep.subr.bf16.mxu1 %v10988_v37 }
 0xacf   : > { %6984 = vmatmul.mubr.msk.bf16.vlgmr.msra.gmra.mxu1 %vm778_vm0, %v7580_v50  ;;  %v4444_v50 = vld [vmem:[%s10692_s7] sm:$0xff] }
 0xad0   : > { %4170 = vmatprep.mubr.bf16.mxu1 %v10916_v2  ;;  %v4384_v13 = vpop.permute.xlu1 %4383 }
 0xad7   : > { %6985 = vmatmul.mubr.msk.bf16.gmra.mxu1 %vm778_vm0, %v7581_v52  ;;  %v7011_v52 = vcombine.high %v4444_v50, %v4444_v50 }
 0xad8   : > { %7260 = vmatprep.mubr.msk.bf16.mxu1 %vm7788_vm1, %v10988_v37 }
 0xada   : > { %v7214_v34 = vpop.f32.mrf.mxu0 }
 0xadc   : > { %v7215_v8 = vpop.f32.mrf.mxu0 }
 0xadd   : > { %v7216_v15 = vadd.f32 %v7215_v8, %v7214_v34  ;;  %v7010_v34 = vcombine.low %v4444_v50, %v4444_v50 }
 0xade   : > { %v7217_v49 = vpop.f32.mrf.mxu0 }
 0xadf   : > { %v4371_v16 = vmul.f32 %v7216_v15, %v4364_v43  ;;  %v4456_v43 = vsel %vm4454_vm3, %v7010_v34, 0 }
 0xae0   : > { %v7218_v1 = vpop.f32.mrf.mxu0 }
 0xae1   : > { %v7219_v10 = vadd.f32 %v7218_v1, %v7217_v49  ;;  %v4386_v53 = vadd.f32 %v4379_v14, %v4371_v16 }
 0xae3   : > { %v4372_v28 = vmul.f32 %v7219_v10, %v4369_v27  ;;  %v4388_v30 = vmax.f32 %v4386_v53, 0.0 }
 0xae5   : > { %v4387_v3 = vadd.f32 %v4384_v13, %v4372_v28  ;;  %v11104_v13 = vld [vmem:[#allocation17_spill] sm:$0xff] }
 0xae7   : > { %v4389_v56 = vmax.f32 %v4387_v3, 0.0 }
 0xae9   : > { %v4393_v48 = vpack.c.bf16 %v4389_v56, %v4388_v30 }
 0xaeb   : > { %7259 = vmatpush3.bf16.msra.mxu1 %v4393_v48 }
 0xaec   : > { %7012 = vmatprep.subr.msk.bf16.mxu1 %vm4454_vm3, %v7011_v52 }
 0xaee   : > { %7261 = vmatmul.mubr.msk.bf16.vlgmr.msra.gmra.mxu1 %vm778_vm0, %v7582_v25 }
 0xaef   : > { %4493 = vmatprep.mubr.bf16.mxu1 %v10916_v2  ;;  %4476 = vmatpush1.bf16.msra.mxu1 %v4456_v43 }
 0xaf0   : > { %4544 = vmatprep.subr.bf16.mxu1 %v9200_v63  ;;  %v11103_v63 = vld [vmem:[#allocation9_spill] sm:$0xff] }
 0xaf1   : > { %v1003_v3 = vadd.f32 %v11104_v13, %v11103_v63 }
 0xb8f   : > { %v4162_v8 = vpop.f32.mrf.mxu1 }
 0xb90   : > { %v9781_v15 = vadd.f32 %v4162_v8, %v9207_v12 }
 0xb91   : > { %v4164_v27 = vpop.f32.mrf.mxu1 }
 0xb92   : > { %v9784_v49 = vadd.f32 %v4164_v27, %v9211_v17  ;;  %v3014_v17 = vadd.f32 %v9229_v35, %v1003_v3  ;;  %v9844_v35 = vld [vmem:[%s10694_s9 + $0xa4] ss:$8 sps:$4 sm:$0xff]  }
 0xb93   : > { %v4166_v16 = vpop.f32.mrf.mxu1 }
 0xb94   : > { %v9787_v1 = vadd.f32 %v4166_v16, %v9213_v19 }
 0xb95   : > { %v9789_v10 = vpop.f32.mrf.mxu1 }
 0xb97   : > { %v4172_v14 = vpop.f32.mrf.mxu1 }
 0xb98   : > { %v9792_v53 = vadd.f32 %v4172_v14, %v9221_v47 }
 0xb99   : > { %v4174_v28 = vpop.f32.mrf.mxu1 }
 0xb9a   : > { %v9797_v12 = vadd.f32 %v4174_v28, %v9225_v29  ;;  %v9832_v29 = vld [vmem:[%s10694_s9 + $0xb4] ss:$8 sps:$4 sm:$0xff]  }
 0xb9b   : > { %v4176_v30 = vpop.f32.mrf.mxu1 }
 0xb9c   : > { %v9801_v56 = vadd.f32 %v4176_v30, %v9227_v33  ;;  %v9838_v33 = vld [vmem:[%s10694_s9 + $0xb0] ss:$8 sps:$4 sm:$0xff]  }
 0xb9d   : > { %v4178_v19 = vpop.f32.mrf.mxu1 }
 0xb9e   : > { %v9803_v48 = vadd.f32 %v4178_v19, %v3014_v17 }
 0xbae   : > { %v4436_v25 = vpop.f32.mrf.mxu1 }
 0xbb0   : > { %v7262_v50 = vpop.f32.mrf.mxu1 }
 0xbb2   : > { %v4439_v47 = vpop.f32.mrf.mxu1 }
 0xbb3   : > { %v4443_v52 = vpack.c.bf16 %v4439_v47, %v4436_v25 }
 0xbb4   : > { %v7263_v34 = vpop.f32.mrf.mxu1 }
 0xbb5   : > { %7013 = vmatmul.mubr.msk.bf16.vlgmr.msra.gmra.mxu1 %vm4450_vm4, %v4443_v52 }
 0xbb6   : > { %4545 = vmatpush1.bf16.msra.mxu1 %v9234_v51  ;;  %v9850_v51 = vld [vmem:[%s10694_s9 + $0xa0] ss:$8 sps:$4 sm:$0xff]  }
 0xbb7   : > { %4546 = vmatprep.subr.bf16.mxu1 %v9240_v26  ;;  %v9856_v26 = vld [vmem:[%s10694_s9 + $0x94] ss:$8 sps:$4 sm:$0xff]  }
 0xbba   : > { %4547 = vmatpush1.bf16.msra.mxu1 %v9246_v42  ;;  %v9862_v42 = vld [vmem:[%s10694_s9 + $0x90] ss:$8 sps:$4 sm:$0xff]  }
 0xbbb   : > { %4548 = vmatprep.subr.bf16.mxu1 %v9252_v46  ;;  %v9868_v46 = vld [vmem:[%s10694_s9 + $0x84] ss:$8 sps:$4 sm:$0xff]  }
 0xbbe   : > { %4549 = vmatpush1.bf16.msra.mxu1 %v9258_v22  ;;  %v9874_v22 = vld [vmem:[%s10694_s9 + $0x80] ss:$8 sps:$4 sm:$0xff]  }
 0xbbf   : > { %4550 = vmatprep.subr.bf16.mxu1 %v9264_v24 }
 0xbc2   : > { %4551 = vmatpush1.bf16.msra.mxu1 %v9270_v40  ;;  %v4515_v40 = vpop.permute.xlu1 %4514 }
 0xbc3   : > { %4552 = vmatprep.subr.bf16.mxu1 %v9276_v41  ;;  %v4510_v41 = vpop.permute.xlu0 %4509 }
 0xbc6   : > { %4553 = vmatpush1.bf16.msra.mxu1 %v9282_v45 }
 0xbc7   : > { %4554 = vmatprep.subr.bf16.mxu1 %v9288_v61 }
 0xbca   : > { %4555 = vmatpush1.bf16.msra.mxu1 %v9294_v44 }
 0xbcb   : > { %4556 = vmatprep.subr.bf16.mxu1 %v9300_v54 }
 0xbce   : > { %4557 = vmatpush1.bf16.msra.mxu1 %v9306_v23 }
 0xbcf   : > { %4558 = vmatprep.subr.bf16.mxu1 %v9312_v9 }
 0xbd2   : > { %4559 = vmatpush1.bf16.msra.mxu1 %v9318_v55 }
 0xbd3   : > { %4560 = vmatprep.subr.bf16.mxu1 %v9324_v57 }
 0xbd6   : > { %4561 = vmatpush2.bf16.msra.mxu1 %v9330_v59 }
 0xbd7   : > { %4562 = vmatprep.subr.bf16.mxu1 %v9336_v60 }
 0xbda   : > { %4563 = vmatpush2.bf16.msra.mxu1 %v9342_v0  ;;  %v4532_v0 = vpop.permute.xlu1 %4531 }
 0xbdb   : > { %4564 = vmatprep.subr.bf16.mxu1 %v9348_v4  ;;  %v4527_v4 = vpop.permute.xlu0 %4526 }
 0xbde   : > { %4565 = vmatpush2.bf16.msra.mxu1 %v9354_v5 }
 0xbdf   : > { %4566 = vmatprep.subr.bf16.mxu1 %v9360_v6 }
 0xbe2   : > { %4567 = vmatpush2.bf16.msra.mxu1 %v9366_v7 }
 0xbe3   : > { %4568 = vmatprep.subr.bf16.mxu1 %v9832_v29 }
 0xbe6   : > { %4569 = vmatpush2.bf16.msra.mxu1 %v9838_v33 }
 0xbe7   : > { %4570 = vmatprep.subr.bf16.mxu1 %v9844_v35 }
 0xbea   : > { %4571 = vmatpush2.bf16.msra.mxu1 %v9850_v51 }
 0xbeb   : > { %4572 = vmatprep.subr.bf16.mxu1 %v9856_v26 }
 0xbee   : > { %4573 = vmatpush2.bf16.msra.mxu1 %v9862_v42 }
 0xbef   : > { %4574 = vmatprep.subr.bf16.mxu1 %v9868_v46 }
 0xbf2   : > { %4575 = vmatpush2.bf16.msra.mxu1 %v9874_v22 }
 0xc75   : > { %v4495_v24 = vpop.f32.mrf.mxu1 }
 0xc76   : > { %v4496_v45 = vadd.f32 %v4495_v24, %v9743_v39  ;;  %v7586_v24 = vld [vmem:[%s10700_s15 + $0x90] sm:$0xff]  }
 0xc77   : > { %v4497_v61 = vpop.f32.mrf.mxu1 }
 0xc78   : > { %v4498_v44 = vadd.f32 %v4497_v61, %v9746_v31  ;;  %v4517_v55 = vmul.f32 %v4510_v41, %v4496_v45  ;;  %v7589_v45 = vld [vmem:[%s10700_s15 + $0xa8] sm:$0xff]   ;;  %v7590_v61 = vld [vmem:[%s10700_s15 + $0xb8] sm:$0xff]  }
 0xc79   : > { %v4499_v54 = vpop.f32.mrf.mxu1 }
 0xc7a   : > { %v4518_v23 = vmul.f32 %v4510_v41, %v4498_v44  ;;  %v4500_v9 = vadd.f32 %v4499_v54, %v9750_v58  ;;  %v4534_v43 = vadd.f32 %v4527_v4, %v4517_v55  ;;  %v7585_v58 = vld [vmem:[%s10700_s15 + $0x98] sm:$0xff]   ;;  %v7588_v41 = vld [vmem:[%s10700_s15 + $0xb0] sm:$0xff]   ;;  %v7591_v44 = vld [vmem:[%s10700_s15 + $0xc8] sm:$0xff]  }
 0xc7b   : > { %v4501_v57 = vpop.f32.mrf.mxu1  ;;  %v9921_v54 = vld [vmem:[%s10694_s9 + $0x274] ss:$8 sps:$4 sm:$0xff]  }
 0xc7c   : > { %v4519_v59 = vmul.f32 %v4515_v40, %v4500_v9  ;;  %v4502_v60 = vadd.f32 %v4501_v57, %v9754_v62  ;;  %v4535_v5 = vadd.f32 %v4527_v4, %v4518_v23  ;;  %v4538_v31 = vmax.f32 %v4534_v43, 0.0  ;;  %v7592_v23 = vld [vmem:[%s10700_s15 + $0xc0] sm:$0xff]   ;;  %v9930_v9 = vld [vmem:[%s10694_s9 + $0x374] ss:$8 sps:$4 sm:$0xff]   ;;  %v9941_v57 = vld [vmem:[%s10694_s9 + $0x270] ss:$8 sps:$4 sm:$0xff]  }
 0xc7d   : > { %v7593_v55 = vld [vmem:[%s10700_s15 + $0xd0] sm:$0xff]   ;;  %v9965_v4 = vld [vmem:[%s10694_s9 + $0x260] ss:$8 sps:$4 sm:$0xff]  }
 0xc7e   : > { %v4536_v6 = vadd.f32 %v4532_v0, %v4519_v59  ;;  %v4520_v7 = vmul.f32 %v4515_v40, %v4502_v60  ;;  %v4539_v27 = vmax.f32 %v4535_v5, 0.0  ;;  %v7587_v40 = vld [vmem:[%s10700_s15 + $0xa0] sm:$0xff]   ;;  %v9953_v60 = vld [vmem:[%s10694_s9 + $0x370] ss:$8 sps:$4 sm:$0xff]   ;;  %v9971_v5 = vld [vmem:[%s10694_s9 + $0x254] ss:$8 sps:$4 sm:$0xff]  }
 0xc7f   : > { %v9947_v59 = vld [vmem:[%s10694_s9 + $0x264] ss:$8 sps:$4 sm:$0xff]   ;;  %v9989_v43 = vld [vmem:[%s10694_s9 + $0x250] ss:$8 sps:$4 sm:$0xff]  }
 0xc80   : > { %v4537_v8 = vadd.f32 %v4532_v0, %v4520_v7  ;;  %v4540_v39 = vmax.f32 %v4536_v6, 0.0  ;;  %v9959_v0 = vld [vmem:[%s10694_s9 + $0x364] ss:$8 sps:$4 sm:$0xff]   ;;  %v9977_v6 = vld [vmem:[%s10694_s9 + $0x360] ss:$8 sps:$4 sm:$0xff]   ;;  %11105 = vst [vmem:[#allocation32_spill] sm:$0xff] %v9989_v43 }
 0xc81   : > { %v9983_v7 = vld [vmem:[%s10694_s9 + $0x354] ss:$8 sps:$4 sm:$0xff]  }
 0xc82   : > { %v4541_v16 = vmax.f32 %v4537_v8, 0.0  ;;  %v4542_v28 = vpack.c.bf16 %v4540_v39, %v4538_v31  ;;  %v9995_v8 = vld [vmem:[%s10694_s9 + $0x244] ss:$8 sps:$4 sm:$0xff]   ;;  %v10001_v39 = vld [vmem:[%s10694_s9 + $0x350] ss:$8 sps:$4 sm:$0xff]  }
 0xc83   : > { %11106 = vst [vmem:[#allocation44_spill] sm:$0xff] %v9995_v8  ;;  %11107 = vst [vmem:[#allocation46_spill] sm:$0xff] %v10001_v39  ;;  %v10019_v31 = vld [vmem:[%s10694_s9 + $0x234] ss:$8 sps:$4 sm:$0xff]  }
 0xc84   : > { %v4543_v14 = vpack.c.bf16 %v4541_v16, %v4539_v27  ;;  %v10007_v27 = vld [vmem:[%s10694_s9 + $0x344] ss:$8 sps:$4 sm:$0xff]   ;;  %v10013_v16 = vld [vmem:[%s10694_s9 + $0x240] ss:$8 sps:$4 sm:$0xff]   ;;  %11110 = vst [vmem:[#allocation48_spill] sm:$0xff] %v10019_v31 }
 0xc85   : > { %11108 = vst [vmem:[#allocation33_spill] sm:$0xff] %v10007_v27  ;;  %11109 = vst [vmem:[#allocation34_spill] sm:$0xff] %v10013_v16 }
 0xc86   : > { %4576 = vmatprep.mubr.bf16.mxu1 %v4543_v14  ;;  %4621 = vmatprep.mubr.bf16.mxu0 %v4543_v14 }
 0xc87   : > { %4662 = vmatprep.subr.bf16.mxu1 %v4543_v14  ;;  %4577 = vmatmul.mubr.bf16.vlgmr.msra.gmra.mxu1 %v4542_v28 }
 0xc88   : > { %4622 = vmatmul.mubr.bf16.vlgmr.msra.gmra.mxu0 %v4542_v28  ;;  %4663 = vmatpush1.bf16.msra.mxu1 %v4542_v28 }
 0xc89   : > { %4680 = vmatprep.mubr.bf16.mxu1 %v10916_v2  ;;  %4731 = vmatprep.mubr.bf16.mxu0 %v10916_v2 }
 0xc8f   : > { %7023 = vmatmul.mubr.msk.bf16.vlgmr.msra.gmra.mxu1 %vm778_vm0, %v7585_v58  ;;  %v10037_v58 = vld [vmem:[%s10694_s9 + $0x230] ss:$8 sps:$4 sm:$0xff]  }
 0xc90   : > { %4785 = vmatprep.mubr.bf16.mxu1 %v10916_v2  ;;  %11113 = vst [vmem:[#allocation36_spill] sm:$0xff] %v10037_v58 }
 0xd47   : > { %v4578_v62 = vpop.f32.mrf.mxu1 }
 0xd48   : > { %v4623_v63 = vpop.f32.mrf.mxu0 }
 0xd49   : > { %v4580_v13 = vpop.f32.mrf.mxu1 }
 0xd4a   : > { %v4625_v3 = vpop.f32.mrf.mxu0 }
 0xd4b   : > { %v4582_v30 = vpop.f32.mrf.mxu1 }
 0xd4c   : > { %v4627_v17 = vpop.f32.mrf.mxu0  ;;  %v4587_v47 = vpack.c.bf16 %v4582_v30, %v4578_v62  ;;  %v10043_v62 = vld [vmem:[%s10694_s9 + $0x224] ss:$8 sps:$4 sm:$0xff]   ;;  %v10067_v30 = vld [vmem:[%s10694_s9 + $0x214] ss:$8 sps:$4 sm:$0xff]  }
 0xd4d   : > { %v4584_v19 = vpop.f32.mrf.mxu1  ;;  %v4632_v34 = vpack.c.bf16 %v4627_v17, %v4623_v63  ;;  %11114 = vst [vmem:[#allocation52_spill] sm:$0xff] %v10043_v62  ;;  %v10049_v63 = vld [vmem:[%s10694_s9 + $0x330] ss:$8 sps:$4 sm:$0xff]   ;;  %11118 = vst [vmem:[#allocation56_spill] sm:$0xff] %v10067_v30  ;;  %v10073_v17 = vld [vmem:[%s10694_s9 + $0x320] ss:$8 sps:$4 sm:$0xff]  }
 0xd4e   : > { %v4588_v25 = vpack.c.bf16 %v4584_v19, %v4580_v13  ;;  %v4629_v50 = vpop.f32.mrf.mxu0  ;;  %11115 = vst [vmem:[#allocation54_spill] sm:$0xff] %v10049_v63  ;;  %v10055_v13 = vld [vmem:[%s10694_s9 + $0x324] ss:$8 sps:$4 sm:$0xff]   ;;  %11119 = vst [vmem:[#allocation58_spill] sm:$0xff] %v10073_v17  ;;  %v10079_v19 = vld [vmem:[%s10694_s9 + $0x314] ss:$8 sps:$4 sm:$0xff]  }
 0xd4f   : > { %v4633_v52 = vpack.c.bf16 %v4629_v50, %v4625_v3  ;;  %11116 = vst [vmem:[#allocation37_spill] sm:$0xff] %v10055_v13  ;;  %v10061_v3 = vld [vmem:[%s10694_s9 + $0x220] ss:$8 sps:$4 sm:$0xff]   ;;  %11120 = vst [vmem:[#allocation39_spill] sm:$0xff] %v10079_v19  ;;  %v10091_v50 = vld [vmem:[%s10694_s9 + $0x204] ss:$8 sps:$4 sm:$0xff]  }
 0xd50   : > { %4713 = vmatprep.subr.bf16.mxu0 %v4588_v25  ;;  %11117 = vst [vmem:[#allocation38_spill] sm:$0xff] %v10061_v3  ;;  %11122 = vst [vmem:[#allocation60_spill] sm:$0xff] %v10091_v50 }
 0xd51   : > { %4767 = vmatprep.subr.bf16.mxu1 %v4633_v52  ;;  %4714 = vmatpush1.bf16.msra.mxu0 %v4587_v47 }
 0xd52   : > { %4768 = vmatpush1.bf16.msra.mxu1 %v4632_v34  ;;  %4828 = vmatprep.subr.bf16.mxu0 %v4543_v14 }
 0xd53   : > { %4879 = vmatprep.subr.bf16.mxu1 %v4588_v25 }
 0xd54   : > { %7025 = vmatmul.mubr.msk.bf16.vlgmr.msra.gmra.mxu0 %vm778_vm0, %v7586_v24  ;;  %v10115_v24 = vld [vmem:[%s10694_s9 + $0x2f4] ss:$8 sps:$4 sm:$0xff]  }
 0xd55   : > { %7029 = vmatmul.mubr.msk.bf16.vlgmr.msra.gmra.mxu1 %vm778_vm0, %v7587_v40  ;;  %4829 = vmatpush1.bf16.msra.mxu0 %v4542_v28  ;;  %11126 = vst [vmem:[#allocation64_spill] sm:$0xff] %v10115_v24  ;;  %v10121_v40 = vld [vmem:[%s10694_s9 + $0x300] ss:$8 sps:$4 sm:$0xff]  }
 0xd56   : > { %4880 = vmatpush1.bf16.msra.mxu1 %v4587_v47  ;;  %4933 = vmatprep.subr.bf16.mxu0 %v4633_v52  ;;  %11127 = vst [vmem:[#allocation66_spill] sm:$0xff] %v10121_v40 }
 0xd57   : > { %4994 = vmatprep.subr.bf16.mxu1 %v4543_v14  ;;  %4846 = vmatprep.mubr.bf16.mxu0 %v10916_v2  ;;  %v10025_v14 = vld [vmem:[%s10694_s9 + $0x340] ss:$8 sps:$4 sm:$0xff]  }
 0xd58   : > { %4897 = vmatprep.mubr.bf16.mxu1 %v10916_v2  ;;  %11111 = vst [vmem:[#allocation50_spill] sm:$0xff] %v10025_v14 }
 0xd5c   : > { %7035 = vmatmul.mubr.msk.bf16.vlgmr.msra.gmra.mxu0 %vm778_vm0, %v7588_v41  ;;  %v10127_v41 = vld [vmem:[%s10694_s9 + $0x3f4] ss:$8 sps:$4 sm:$0xff]  }
 0xd5d   : > { %7037 = vmatmul.mubr.msk.bf16.vlgmr.msra.gmra.mxu1 %vm778_vm0, %v7589_v45  ;;  %4934 = vmatpush1.bf16.msra.mxu0 %v4632_v34  ;;  %11128 = vst [vmem:[#allocation45_spill] sm:$0xff] %v10127_v41  ;;  %v10133_v45 = vld [vmem:[%s10694_s9 + $0x2f0] ss:$8 sps:$4 sm:$0xff]  }
 0xd5e   : > { %4995 = vmatpush1.bf16.msra.mxu1 %v4542_v28  ;;  %5045 = vmatprep.subr.bf16.mxu0 %v4588_v25  ;;  %v10031_v28 = vld [vmem:[%s10694_s9 + $0x334] ss:$8 sps:$4 sm:$0xff]   ;;  %v10085_v25 = vld [vmem:[%s10694_s9 + $0x210] ss:$8 sps:$4 sm:$0xff]   ;;  %11129 = vst [vmem:[#allocation47_spill] sm:$0xff] %v10133_v45 }
 0xd5f   : > { %5099 = vmatprep.subr.bf16.mxu1 %v4633_v52  ;;  %4951 = vmatprep.mubr.bf16.mxu0 %v10916_v2  ;;  %11112 = vst [vmem:[#allocation35_spill] sm:$0xff] %v10031_v28  ;;  %11121 = vst [vmem:[#allocation41_spill] sm:$0xff] %v10085_v25  ;;  %v10103_v52 = vld [vmem:[%s10694_s9 + $0x304] ss:$8 sps:$4 sm:$0xff]  }
 0xd60   : > { %5012 = vmatprep.mubr.bf16.mxu1 %v10916_v2  ;;  %11124 = vst [vmem:[#allocation42_spill] sm:$0xff] %v10103_v52 }
 0xd64   : > { %7041 = vmatmul.mubr.msk.bf16.vlgmr.msra.gmra.mxu0 %vm778_vm0, %v7590_v61  ;;  %v10139_v61 = vld [vmem:[%s10694_s9 + $0x2e4] ss:$8 sps:$4 sm:$0xff]  }
 0xd65   : > { %7047 = vmatmul.mubr.msk.bf16.vlgmr.msra.gmra.mxu1 %vm778_vm0, %v7591_v44  ;;  %5046 = vmatpush1.bf16.msra.mxu0 %v4587_v47  ;;  %v10097_v47 = vld [vmem:[%s10694_s9 + $0x310] ss:$8 sps:$4 sm:$0xff]   ;;  %11130 = vst [vmem:[#allocation68_spill] sm:$0xff] %v10139_v61 }
 0xd66   : > { %5100 = vmatpush1.bf16.msra.mxu1 %v4632_v34  ;;  %5063 = vmatprep.mubr.bf16.mxu0 %v10916_v2  ;;  %11123 = vst [vmem:[#allocation62_spill] sm:$0xff] %v10097_v47  ;;  %v10109_v34 = vld [vmem:[%s10694_s9 + $0x200] ss:$8 sps:$4 sm:$0xff]   ;;  %v10145_v44 = vld [vmem:[%s10694_s9 + $0x3f0] ss:$8 sps:$4 sm:$0xff]  }
 0xd67   : > { %5117 = vmatprep.mubr.bf16.mxu1 %v10916_v2  ;;  %5134 = vmatprep.subr.bf16.mxu0 %v9921_v54  ;;  %11125 = vst [vmem:[#allocation43_spill] sm:$0xff] %v10109_v34  ;;  %11131 = vst [vmem:[#allocation70_spill] sm:$0xff] %v10145_v44 }
 0xd68   : > { %5183 = vmatprep.subr.bf16.mxu1 %v9930_v9 }
 0xd6c   : > { %7049 = vmatmul.mubr.msk.bf16.vlgmr.msra.gmra.mxu0 %vm778_vm0, %v7592_v23  ;;  %v10151_v23 = vld [vmem:[%s10694_s9 + $0x3e4] ss:$8 sps:$4 sm:$0xff]  }
 0xd6d   : > { %7053 = vmatmul.mubr.msk.bf16.vlgmr.msra.gmra.mxu1 %vm778_vm0, %v7593_v55  ;;  %5135 = vmatpush1.bf16.msra.mxu0 %v9941_v57  ;;  %11132 = vst [vmem:[#allocation49_spill] sm:$0xff] %v10151_v23  ;;  %v10157_v55 = vld [vmem:[%s10694_s9 + $0x2e0] ss:$8 sps:$4 sm:$0xff]  }
 0xd6e   : > { %5136 = vmatprep.subr.bf16.mxu0 %v9947_v59  ;;  %5184 = vmatpush1.bf16.msra.mxu1 %v9953_v60  ;;  %11133 = vst [vmem:[#allocation51_spill] sm:$0xff] %v10157_v55 }
 0xd6f   : > { %5185 = vmatprep.subr.bf16.mxu1 %v9959_v0 }
 0xd71   : > { %5137 = vmatpush1.bf16.msra.mxu0 %v9965_v4 }
 0xd72   : > { %5138 = vmatprep.subr.bf16.mxu0 %v9971_v5  ;;  %5186 = vmatpush1.bf16.msra.mxu1 %v9977_v6 }
 0xd73   : > { %5187 = vmatprep.subr.bf16.mxu1 %v9983_v7 }
 0xd75   : > { %5139 = vmatpush1.bf16.msra.mxu0 %v9989_v43 }
 0xd76   : > { %5140 = vmatprep.subr.bf16.mxu0 %v9995_v8  ;;  %5188 = vmatpush1.bf16.msra.mxu1 %v10001_v39 }
 0xd77   : > { %5189 = vmatprep.subr.bf16.mxu1 %v10007_v27 }
 0xd79   : > { %5141 = vmatpush1.bf16.msra.mxu0 %v10013_v16 }
 0xd7a   : > { %5142 = vmatprep.subr.bf16.mxu0 %v10019_v31  ;;  %5190 = vmatpush1.bf16.msra.mxu1 %v10025_v14 }
 0xd7b   : > { %5191 = vmatprep.subr.bf16.mxu1 %v10031_v28 }
 0xd7d   : > { %5143 = vmatpush1.bf16.msra.mxu0 %v10037_v58 }
 0xd7e   : > { %5144 = vmatprep.subr.bf16.mxu0 %v10043_v62  ;;  %5192 = vmatpush1.bf16.msra.mxu1 %v10049_v63 }
 0xd7f   : > { %5193 = vmatprep.subr.bf16.mxu1 %v10055_v13 }
 0xd81   : > { %5145 = vmatpush1.bf16.msra.mxu0 %v10061_v3 }
 0xd82   : > { %5146 = vmatprep.subr.bf16.mxu0 %v10067_v30  ;;  %5194 = vmatpush1.bf16.msra.mxu1 %v10073_v17 }
 0xd83   : > { %5195 = vmatprep.subr.bf16.mxu1 %v10079_v19 }
 0xd85   : > { %5147 = vmatpush1.bf16.msra.mxu0 %v10085_v25 }
 0xd86   : > { %5148 = vmatprep.subr.bf16.mxu0 %v10091_v50  ;;  %5196 = vmatpush1.bf16.msra.mxu1 %v10097_v47 }
 0xd87   : > { %5197 = vmatprep.subr.bf16.mxu1 %v10103_v52 }
 0xd89   : > { %5149 = vmatpush1.bf16.msra.mxu0 %v10109_v34 }
 0xd8a   : > { %5150 = vmatprep.subr.bf16.mxu0 %v10115_v24  ;;  %5198 = vmatpush1.bf16.msra.mxu1 %v10121_v40 }
 0xd8b   : > { %5199 = vmatprep.subr.bf16.mxu1 %v10127_v41 }
 0xd8d   : > { %5151 = vmatpush2.bf16.msra.mxu0 %v10133_v45 }
 0xd8e   : > { %5152 = vmatprep.subr.bf16.mxu0 %v10139_v61  ;;  %5200 = vmatpush2.bf16.msra.mxu1 %v10145_v44  ;;  %v10163_v61 = vld [vmem:[%s10694_s9 + $0x2d4] ss:$8 sps:$4 sm:$0xff]   ;;  %v10169_v44 = vld [vmem:[%s10694_s9 + $0x3e0] ss:$8 sps:$4 sm:$0xff]  }
 0xd8f   : > { %5201 = vmatprep.subr.bf16.mxu1 %v10151_v23  ;;  %11134 = vst [vmem:[#allocation72_spill] sm:$0xff] %v10163_v61  ;;  %11135 = vst [vmem:[#allocation74_spill] sm:$0xff] %v10169_v44  ;;  %v10175_v23 = vld [vmem:[%s10694_s9 + $0x3d4] ss:$8 sps:$4 sm:$0xff]  }
 0xd90   : > { %11136 = vst [vmem:[#allocation53_spill] sm:$0xff] %v10175_v23 }
 0xd91   : > { %5153 = vmatpush2.bf16.msra.mxu0 %v10157_v55  ;;  %v10181_v55 = vld [vmem:[%s10694_s9 + $0x2d0] ss:$8 sps:$4 sm:$0xff]  }
 0xd92   : > { %5154 = vmatprep.subr.bf16.mxu0 %v10163_v61  ;;  %5202 = vmatpush2.bf16.msra.mxu1 %v10169_v44  ;;  %11137 = vst [vmem:[#allocation55_spill] sm:$0xff] %v10181_v55  ;;  %v10187_v61 = vld [vmem:[%s10694_s9 + $0x2c4] ss:$8 sps:$4 sm:$0xff]   ;;  %v10193_v44 = vld [vmem:[%s10694_s9 + $0x3d0] ss:$8 sps:$4 sm:$0xff]  }
 0xd93   : > { %5203 = vmatprep.subr.bf16.mxu1 %v10175_v23  ;;  %11138 = vst [vmem:[#allocation76_spill] sm:$0xff] %v10187_v61  ;;  %11139 = vst [vmem:[#allocation78_spill] sm:$0xff] %v10193_v44  ;;  %v10199_v23 = vld [vmem:[%s10694_s9 + $0x3c4] ss:$8 sps:$4 sm:$0xff]  }
 0xd94   : > { %11140 = vst [vmem:[#allocation57_spill] sm:$0xff] %v10199_v23 }
 0xd95   : > { %5155 = vmatpush2.bf16.msra.mxu0 %v10181_v55  ;;  %v10205_v55 = vld [vmem:[%s10694_s9 + $0x2c0] ss:$8 sps:$4 sm:$0xff]  }
 0xd96   : > { %5156 = vmatprep.subr.bf16.mxu0 %v10187_v61  ;;  %5204 = vmatpush2.bf16.msra.mxu1 %v10193_v44  ;;  %11141 = vst [vmem:[#allocation59_spill] sm:$0xff] %v10205_v55  ;;  %v10211_v61 = vld [vmem:[%s10694_s9 + $0x2b4] ss:$8 sps:$4 sm:$0xff]   ;;  %v10217_v44 = vld [vmem:[%s10694_s9 + $0x3c0] ss:$8 sps:$4 sm:$0xff]  }
 0xd97   : > { %5205 = vmatprep.subr.bf16.mxu1 %v10199_v23  ;;  %11142 = vst [vmem:[#allocation80_spill] sm:$0xff] %v10211_v61  ;;  %11143 = vst [vmem:[#allocation82_spill] sm:$0xff] %v10217_v44  ;;  %v10223_v23 = vld [vmem:[%s10694_s9 + $0x3b4] ss:$8 sps:$4 sm:$0xff]  }
 0xd98   : > { %11144 = vst [vmem:[#allocation61_spill] sm:$0xff] %v10223_v23 }
 0xd99   : > { %5157 = vmatpush2.bf16.msra.mxu0 %v10205_v55  ;;  %v10229_v55 = vld [vmem:[%s10694_s9 + $0x2b0] ss:$8 sps:$4 sm:$0xff]  }
 0xd9a   : > { %5158 = vmatprep.subr.bf16.mxu0 %v10211_v61  ;;  %5206 = vmatpush2.bf16.msra.mxu1 %v10217_v44  ;;  %11145 = vst [vmem:[#allocation63_spill] sm:$0xff] %v10229_v55  ;;  %v10235_v61 = vld [vmem:[%s10694_s9 + $0x2a4] ss:$8 sps:$4 sm:$0xff]   ;;  %v10241_v44 = vld [vmem:[%s10694_s9 + $0x3b0] ss:$8 sps:$4 sm:$0xff]  }
 0xd9b   : > { %5207 = vmatprep.subr.bf16.mxu1 %v10223_v23  ;;  %11146 = vst [vmem:[#allocation83_spill] sm:$0xff] %v10235_v61  ;;  %11147 = vst [vmem:[#allocation84_spill] sm:$0xff] %v10241_v44  ;;  %v10247_v23 = vld [vmem:[%s10694_s9 + $0x3a4] ss:$8 sps:$4 sm:$0xff]  }
 0xd9c   : > { %11148 = vst [vmem:[#allocation65_spill] sm:$0xff] %v10247_v23 }
 0xd9d   : > { %5159 = vmatpush2.bf16.msra.mxu0 %v10229_v55  ;;  %v10253_v55 = vld [vmem:[%s10694_s9 + $0x2a0] ss:$8 sps:$4 sm:$0xff]  }
 0xd9e   : > { %5160 = vmatprep.subr.bf16.mxu0 %v10235_v61  ;;  %5208 = vmatpush2.bf16.msra.mxu1 %v10241_v44  ;;  %11149 = vst [vmem:[#allocation67_spill] sm:$0xff] %v10253_v55  ;;  %v10259_v61 = vld [vmem:[%s10694_s9 + $0x294] ss:$8 sps:$4 sm:$0xff]   ;;  %v10265_v44 = vld [vmem:[%s10694_s9 + $0x3a0] ss:$8 sps:$4 sm:$0xff]  }
 0xd9f   : > { %5209 = vmatprep.subr.bf16.mxu1 %v10247_v23  ;;  %11150 = vst [vmem:[#allocation85_spill] sm:$0xff] %v10259_v61  ;;  %11151 = vst [vmem:[#allocation86_spill] sm:$0xff] %v10265_v44  ;;  %v10271_v23 = vld [vmem:[%s10694_s9 + $0x394] ss:$8 sps:$4 sm:$0xff]  }
 0xda0   : > { %11152 = vst [vmem:[#allocation69_spill] sm:$0xff] %v10271_v23 }
 0xda1   : > { %5161 = vmatpush2.bf16.msra.mxu0 %v10253_v55  ;;  %v10277_v55 = vld [vmem:[%s10694_s9 + $0x290] ss:$8 sps:$4 sm:$0xff]  }
 0xda2   : > { %5162 = vmatprep.subr.bf16.mxu0 %v10259_v61  ;;  %5210 = vmatpush2.bf16.msra.mxu1 %v10265_v44  ;;  %11153 = vst [vmem:[#allocation71_spill] sm:$0xff] %v10277_v55  ;;  %v10283_v61 = vld [vmem:[%s10694_s9 + $0x284] ss:$8 sps:$4 sm:$0xff]   ;;  %v10289_v44 = vld [vmem:[%s10694_s9 + $0x390] ss:$8 sps:$4 sm:$0xff]  }
 0xda3   : > { %5211 = vmatprep.subr.bf16.mxu1 %v10271_v23  ;;  %11154 = vst [vmem:[#allocation87_spill] sm:$0xff] %v10283_v61  ;;  %11155 = vst [vmem:[#allocation88_spill] sm:$0xff] %v10289_v44  ;;  %v10295_v23 = vld [vmem:[%s10694_s9 + $0x384] ss:$8 sps:$4 sm:$0xff]  }
 0xda4   : > { %11156 = vst [vmem:[#allocation73_spill] sm:$0xff] %v10295_v23 }
 0xda5   : > { %5163 = vmatpush2.bf16.msra.mxu0 %v10277_v55  ;;  %v10301_v55 = vld [vmem:[%s10694_s9 + $0x280] ss:$8 sps:$4 sm:$0xff]  }
 0xda6   : > { %5164 = vmatprep.subr.bf16.mxu0 %v10283_v61  ;;  %5212 = vmatpush2.bf16.msra.mxu1 %v10289_v44  ;;  %11157 = vst [vmem:[#allocation75_spill] sm:$0xff] %v10301_v55  ;;  %v10307_v61 = vld [vmem:[%s10694_s9 + $0x380] ss:$8 sps:$4 sm:$0xff]   ;;  %v7594_v44 = vld [vmem:[%s11159_s4 + $0x78] sm:$0xff]  }
 0xda7   : > { %5213 = vmatprep.subr.bf16.mxu1 %v10295_v23  ;;  %11158 = vst [vmem:[#allocation89_spill] sm:$0xff] %v10307_v61  ;;  %v4682_v23 = vpop.f32.mrf.mxu1 }
 0xda9   : > { %5165 = vmatpush2.bf16.msra.mxu0 %v10301_v55  ;;  %v4684_v45 = vpop.f32.mrf.mxu1 }
 0xdaa   : > { %5214 = vmatpush2.bf16.msra.mxu1 %v10307_v61 }
 0xdab   : > { %7222 = vmatprep.subr.bf16.mxu1 %v7594_v44  ;;  %v4686_v41 = vpop.f32.mrf.mxu1 }
 0xdad   : > { %v4688_v40 = vpop.f32.mrf.mxu1 }
 0xe14   : > { %v4733_v24 = vpop.f32.mrf.mxu0 }
 0xe15   : > { %v4787_v34 = vpop.f32.mrf.mxu1  ;;  %v4734_v17 = vadd.f32 %v4733_v24, %v4682_v23 }
 0xe16   : > { %v4735_v52 = vpop.f32.mrf.mxu0 }
 0xe17   : > { %v4789_v55 = vpop.f32.mrf.mxu1  ;;  %v4736_v50 = vadd.f32 %v4735_v52, %v4684_v45  ;;  %v4796_v28 = vadd.f32 %v4787_v34, %v4734_v17 }
 0xe18   : > { %v4737_v47 = vpop.f32.mrf.mxu0 }
 0xe19   : > { %v4738_v25 = vadd.f32 %v4737_v47, %v4686_v41  ;;  %v4791_v19 = vpop.f32.mrf.mxu1  ;;  %v4797_v62 = vadd.f32 %v4789_v55, %v4736_v50 }
 0xe1a   : > { %v4739_v30 = vpop.f32.mrf.mxu0 }
 0xe1b   : > { %v4740_v61 = vadd.f32 %v4739_v30, %v4688_v40  ;;  %v4793_v3 = vpop.f32.mrf.mxu1  ;;  %v4798_v13 = vadd.f32 %v4791_v19, %v4738_v25 }
 0xe1c   : > { %v4848_v63 = vpop.f32.mrf.mxu0 }
 0xe1d   : > { %v4799_v44 = vadd.f32 %v4793_v3, %v4740_v61  ;;  %v4899_v58 = vpop.f32.mrf.mxu1  ;;  %v5132_v39 = vpack.c.bf16 %v4798_v13, %v4796_v28 }
 0xe1e   : > { %v4900_v14 = vadd.f32 %v4899_v58, %v4848_v63  ;;  %v4850_v31 = vpop.f32.mrf.mxu0 }
 0xe1f   : > { %v5133_v16 = vpack.c.bf16 %v4799_v44, %v4797_v62  ;;  %v4901_v27 = vpop.f32.mrf.mxu1 }
 0xe20   : > { %v4902_v8 = vadd.f32 %v4901_v27, %v4850_v31  ;;  %v4852_v43 = vpop.f32.mrf.mxu0 }
 0xe21   : > { %v4903_v52 = vpop.f32.mrf.mxu1  ;;  %5166 = vmatprep.mubr.bf16.mxu0 %v5133_v16 }
 0xe22   : > { %v4904_v47 = vadd.f32 %v4903_v52, %v4852_v43  ;;  %v4854_v24 = vpop.f32.mrf.mxu0  ;;  %5167 = vmatmul.mubr.bf16.vlgmr.msra.gmra.mxu0 %v5132_v39 }
 0xe23   : > { %v4905_v30 = vpop.f32.mrf.mxu1  ;;  %5323 = vmatprep.mubr.bf16.mxu0 %v10916_v2 }
 0xe24   : > { %v4906_v19 = vadd.f32 %v4905_v30, %v4854_v24  ;;  %v4953_v25 = vpop.f32.mrf.mxu0 }
 0xe25   : > { %v10314_v3 = vadd.f32 %v4953_v25, %v4900_v14  ;;  %v5014_v17 = vpop.f32.mrf.mxu1 }
 0xe26   : > { %v4955_v58 = vpop.f32.mrf.mxu0 }
 0xe27   : > { %v10316_v63 = vadd.f32 %v4955_v58, %v4902_v8  ;;  %v5016_v62 = vpop.f32.mrf.mxu1 }
 0xe28   : > { %v4957_v28 = vpop.f32.mrf.mxu0 }
 0xe29   : > { %v10318_v27 = vadd.f32 %v4957_v28, %v4904_v47  ;;  %v5018_v31 = vpop.f32.mrf.mxu1  ;;  %v7598_v28 = vld [vmem:[%s11159_s4 + $0x68] sm:$0xff]  }
 0xe2a   : > { %v4959_v16 = vpop.f32.mrf.mxu0 }
 0xe2b   : > { %v10320_v43 = vadd.f32 %v4959_v16, %v4906_v19  ;;  %v5020_v39 = vpop.f32.mrf.mxu1  ;;  %v7595_v19 = vld [vmem:[%s11159_s4 + $0x38] sm:$0xff]   ;;  %v7600_v16 = vld [vmem:[%s11159_s4 + $0x60] sm:$0xff]  }
 0xe2c   : > { %v5065_v13 = vpop.f32.mrf.mxu0 }
 0xe2d   : > { %v5119_v50 = vpop.f32.mrf.mxu1  ;;  %v5066_v23 = vadd.f32 %v5065_v13, %v5014_v17  ;;  %v7597_v17 = vld [vmem:[%s11159_s4 + $0x30] sm:$0xff]   ;;  %v7603_v13 = vld [vmem:[%s11159_s4 + $0x18] sm:$0xff]  }
 0xe2e   : > { %v5067_v34 = vpop.f32.mrf.mxu0 }
 0xe2f   : > { %v5121_v40 = vpop.f32.mrf.mxu1  ;;  %v5068_v14 = vadd.f32 %v5067_v34, %v5016_v62  ;;  %v5128_v30 = vadd.f32 %v5119_v50, %v5066_v23  ;;  %v7596_v62 = vld [vmem:[%s11159_s4 + $0x70] sm:$0xff]   ;;  %v11161_v23 = vld [vmem:[#allocation27_spill] sm:$0xff] }
 0xe30   : > { %v5069_v41 = vpop.f32.mrf.mxu0  ;;  %v7604_v50 = vld [vmem:[%s11159_s4 + $0x50] sm:$0xff]  }
 0xe31   : > { %v5070_v45 = vadd.f32 %v5069_v41, %v5018_v31  ;;  %v5123_v61 = vpop.f32.mrf.mxu1  ;;  %v5129_v47 = vadd.f32 %v5121_v40, %v5068_v14  ;;  %v7599_v31 = vld [vmem:[%s11159_s4 + $0x28] sm:$0xff]   ;;  %v7605_v34 = vld [vmem:[%s11159_s4 + $0x10] sm:$0xff]   ;;  %v7608_v14 = vld [vmem:[%s11159_s4 + $0x40] sm:$0xff]  }
 0xe32   : > { %v5071_v8 = vpop.f32.mrf.mxu0  ;;  %v7606_v40 = vld [vmem:[%s11159_s4 + $0x48] sm:$0xff]  }
 0xe33   : > { %v5072_v55 = vadd.f32 %v5071_v8, %v5020_v39  ;;  %v5130_v44 = vadd.f32 %v5123_v61, %v5070_v45  ;;  %v5125_v52 = vpop.f32.mrf.mxu1  ;;  %v7602_v39 = vld [vmem:[%s11159_s4 + $0x58] sm:$0xff]   ;;  %v7607_v41 = vld [vmem:[%s11159_s4 + $0x8] sm:$0xff]   ;;  %v7609_v45 = vld [vmem:[%s11159_s4] sm:$0xff]  }
 0xe34   : > { %v11160_v61 = vld [vmem:[#allocation25_spill] sm:$0xff] }
 0xe35   : > { %v5131_v24 = vadd.f32 %v5125_v52, %v5072_v55  ;;  %v5181_v58 = vpack.c.bf16 %v5130_v44, %v5128_v30  ;;  %v11162_v8 = vld [vmem:[#allocation29_spill] sm:$0xff]  ;;  %v11163_v55 = vld [vmem:[#allocation94_spill] sm:$0xff]  ;;  %v11174_v30 = vld [vmem:[#allocation8_spill] sm:$0xff] }
 0xe36   : > { %v11164_v44 = vld [vmem:[#allocation2_spill] sm:$0xff] }
 0xe37   : > { %v5182_v25 = vpack.c.bf16 %v5131_v24, %v5129_v47  ;;  %v11171_v52 = vld [vmem:[#allocation14_spill] sm:$0xff]  ;;  %v11172_v47 = vld [vmem:[#allocation7_spill] sm:$0xff] }
 0xe38   : > { %v11173_v24 = vld [vmem:[#allocation15_spill] sm:$0xff] }
 0xe39   : > { %5215 = vmatprep.mubr.bf16.mxu1 %v5182_v25  ;;  %v11175_v25 = vld [vmem:[#allocation16_spill] sm:$0xff] }
 0xe3a   : > { %5216 = vmatmul.mubr.bf16.vlgmr.msra.gmra.mxu1 %v5181_v58  ;;  %v11177_v58 = vld [vmem:[#allocation19_spill] sm:$0xff] }
 0xe3b   : > { %7223 = vmatpush3.bf16.msra.mxu1 %v7595_v19  ;;  %5512 = vmatprep.mubr.bf16.mxu1 %v8173_v11  ;;  %v7601_v11 = vld [vmem:[%s11159_s4 + $0x20] sm:$0xff]  }
 0xe3c   : > { %7224 = vmatprep.subr.bf16.mxu1 %v7596_v62  ;;  %v11176_v19 = vld [vmem:[#allocation18_spill] sm:$0xff]  ;;  %v11178_v62 = vld [vmem:[#allocation20_spill] sm:$0xff] }
 0xe3f   : > { %7225 = vmatpush3.bf16.msra.mxu1 %v7597_v17  ;;  %v11179_v17 = vld [vmem:[#allocation21_spill] sm:$0xff] }
 0xe40   : > { %7226 = vmatprep.subr.bf16.mxu1 %v7598_v28  ;;  %v11180_v28 = vld [vmem:[#allocation22_spill] sm:$0xff] }
 0xe43   : > { %7227 = vmatpush3.bf16.msra.mxu1 %v7599_v31  ;;  %v11181_v31 = vld [vmem:[#allocation24_spill] sm:$0xff] }
 0xe44   : > { %7228 = vmatprep.subr.bf16.mxu1 %v7600_v16  ;;  %v11182_v16 = vld [vmem:[#allocation26_spill] sm:$0xff] }
 0xe47   : > { %7229 = vmatpush3.bf16.msra.mxu1 %v7601_v11  ;;  %v11183_v11 = vld [vmem:[#allocation28_spill] sm:$0xff] }
 0xe48   : > { %7230 = vmatprep.subr.bf16.mxu1 %v7602_v39  ;;  %v11184_v39 = vld [vmem:[#allocation30_spill] sm:$0xff] }
 0xe4b   : > { %7231 = vmatpush3.bf16.msra.mxu1 %v7603_v13  ;;  %v11185_v13 = vld [vmem:[#allocation40_spill] sm:$0xff] }
 0xe4c   : > { %7232 = vmatprep.subr.bf16.mxu1 %v7604_v50  ;;  %v11186_v50 = vld [vmem:[#allocation31_spill] sm:$0xff] }
 0xe4f   : > { %7233 = vmatpush3.bf16.msra.mxu1 %v7605_v34 }
 0xe50   : > { %7234 = vmatprep.subr.bf16.mxu1 %v7606_v40 }
 0xe53   : > { %7235 = vmatpush3.bf16.msra.mxu1 %v7607_v41 }
 0xe54   : > { %7236 = vmatprep.subr.bf16.mxu1 %v7608_v14 }
 0xe57   : > { %7237 = vmatpush3.bf16.msra.mxu1 %v7609_v45 }
 0xe58   : > { %5750 = vmatprep.subr.bf16.mxu1 %v9551_v18  ;;  %v11165_v18 = vld [vmem:[#allocation10_spill] sm:$0xff] }
 0xe5a   : > { %5513 = vmatmul.mubr.bf16.vlgmr.msra.gmra.mxu1 %v8212_v21  ;;  %v11166_v21 = vld [vmem:[#allocation3_spill] sm:$0xff] }
 0xe5b   : > { %5751 = vmatpush1.bf16.msra.mxu1 %v9558_v32  ;;  %v11167_v32 = vld [vmem:[#allocation11_spill] sm:$0xff] }
 0xe5c   : > { %5752 = vmatprep.subr.bf16.mxu1 %v9564_v20  ;;  %v11168_v20 = vld [vmem:[#allocation4_spill] sm:$0xff] }
 0xe5f   : > { %5753 = vmatpush1.bf16.msra.mxu1 %v9570_v36  ;;  %v11169_v36 = vld [vmem:[#allocation12_spill] sm:$0xff] }
 0xe60   : > { %5754 = vmatprep.subr.bf16.mxu1 %v9576_v38  ;;  %v11170_v38 = vld [vmem:[#allocation6_spill] sm:$0xff] }
 0xe63   : > { %5755 = vmatpush1.bf16.msra.mxu1 %v11160_v61  ;;  %v5241_v61 = vpop.permute.xlu1 %5240 }
 0xe64   : > { %5756 = vmatprep.subr.bf16.mxu1 %v11161_v23  ;;  %v5236_v23 = vpop.permute.xlu0 %5235 }
 0xe67   : > { %5757 = vmatpush1.bf16.msra.mxu1 %v11162_v8 }
 0xe68   : > { %5758 = vmatprep.subr.bf16.mxu1 %v11163_v55 }
 0xe6b   : > { %5759 = vmatpush1.bf16.msra.mxu1 %v11164_v44 }
 0xe6c   : > { %5760 = vmatprep.subr.bf16.mxu1 %v11165_v18 }
 0xe6f   : > { %5761 = vmatpush1.bf16.msra.mxu1 %v11166_v21 }
 0xe70   : > { %5762 = vmatprep.subr.bf16.mxu1 %v11167_v32 }
 0xe73   : > { %5763 = vmatpush1.bf16.msra.mxu1 %v11168_v20 }
 0xe74   : > { %5764 = vmatprep.subr.bf16.mxu1 %v11169_v36 }
 0xe77   : > { %5765 = vmatpush1.bf16.msra.mxu1 %v11170_v38 }
 0xe78   : > { %5766 = vmatprep.subr.bf16.mxu1 %v11171_v52 }
 0xe7b   : > { %5767 = vmatpush2.bf16.msra.mxu1 %v11172_v47 }
 0xe7c   : > { %5768 = vmatprep.subr.bf16.mxu1 %v11173_v24 }
 0xe7f   : > { %5769 = vmatpush2.bf16.msra.mxu1 %v11174_v30  ;;  %v5258_v30 = vpop.permute.xlu1 %5257 }
 0xe80   : > { %5770 = vmatprep.subr.bf16.mxu1 %v11175_v25  ;;  %v5253_v25 = vpop.permute.xlu0 %5252 }
 0xe83   : > { %5771 = vmatpush2.bf16.msra.mxu1 %v11176_v19 }
 0xe84   : > { %5772 = vmatprep.subr.bf16.mxu1 %v11177_v58 }
 0xe87   : > { %5773 = vmatpush2.bf16.msra.mxu1 %v11178_v62 }
 0xe88   : > { %5774 = vmatprep.subr.bf16.mxu1 %v11179_v17 }
 0xe8b   : > { %5775 = vmatpush2.bf16.msra.mxu1 %v11180_v28 }
 0xe8c   : > { %5776 = vmatprep.subr.bf16.mxu1 %v11181_v31 }
 0xe8f   : > { %5777 = vmatpush2.bf16.msra.mxu1 %v11182_v16 }
 0xe90   : > { %5778 = vmatprep.subr.bf16.mxu1 %v11183_v11 }
 0xe93   : > { %5779 = vmatpush2.bf16.msra.mxu1 %v11184_v39 }
 0xe94   : > { %5780 = vmatprep.subr.bf16.mxu1 %v11185_v13  ;;  %v7610_v13 = vld [vmem:[%s10703_s18 + $0x30] sm:$0xff]  }
 0xe97   : > { %5781 = vmatpush2.bf16.msra.mxu1 %v11186_v50  ;;  %v7611_v50 = vld [vmem:[%s10703_s18 + $0x38] sm:$0xff]  }
 0xee2   : > { %v5168_v34 = vpop.f32.mrf.mxu0 }
 0xee3   : > { %v5177_v14 = vadd.f32 %v5168_v34, %v10314_v3 }
 0xee4   : > { %v5170_v40 = vpop.f32.mrf.mxu0 }
 0xee5   : > { %v5178_v8 = vadd.f32 %v5170_v40, %v10316_v63  ;;  %v5527_v40 = vpop.permute.xlu0 %5526 }
 0xee6   : > { %v5172_v41 = vpop.f32.mrf.mxu0 }
 0xee7   : > { %v5179_v21 = vadd.f32 %v5172_v41, %v10318_v27 }
 0xee8   : > { %v5174_v55 = vpop.f32.mrf.mxu0 }
 0xee9   : > { %v5180_v36 = vadd.f32 %v5174_v55, %v10320_v43 }
 0xefa   : > { %v5217_v45 = vpop.f32.mrf.mxu1 }
 0xefb   : > { %v10403_v44 = vadd.f32 %v5217_v45, %v5177_v14  ;;  %v5532_v45 = vpop.permute.xlu1 %5531 }
 0xefc   : > { %v5219_v18 = vpop.f32.mrf.mxu1 }
 0xefd   : > { %v10406_v32 = vadd.f32 %v5219_v18, %v5178_v8  ;;  %v5243_v3 = vmul.f32 %v5236_v23, %v10403_v44  ;;  %v5542_v18 = vpop.permute.xlu0 %5541 }
 0xefe   : > { %v5221_v20 = vpop.f32.mrf.mxu1 }
 0xeff   : > { %v5244_v38 = vmul.f32 %v5236_v23, %v10406_v32  ;;  %v10410_v52 = vadd.f32 %v5221_v20, %v5179_v21  ;;  %v5260_v62 = vadd.f32 %v5253_v25, %v5243_v3 }
 0xf00   : > { %v5223_v47 = vpop.f32.mrf.mxu1 }
 0xf01   : > { %v5245_v63 = vmul.f32 %v5241_v61, %v10410_v52  ;;  %v10414_v24 = vadd.f32 %v5223_v47, %v5180_v36  ;;  %v5261_v19 = vadd.f32 %v5253_v25, %v5244_v38  ;;  %v5264_v16 = vmax.f32 %v5260_v62, 0.0  ;;  %v5547_v36 = vpop.permute.xlu1 %5546 }
 0xf03   : > { %v5262_v27 = vadd.f32 %v5258_v30, %v5245_v63  ;;  %v5246_v58 = vmul.f32 %v5241_v61, %v10414_v24  ;;  %v5265_v28 = vmax.f32 %v5261_v19, 0.0 }
 0xf05   : > { %v5263_v17 = vadd.f32 %v5258_v30, %v5246_v58  ;;  %v5266_v43 = vmax.f32 %v5262_v27, 0.0  ;;  %v5607_v30 = vld [vmem:[%s10693_s8] sm:$0xff]  ;;  %v7754_v58 = vld [vmem:[%s10694_s9 + $0x74] ss:$8 sps:$4 sm:$0xff]  }
 0xf06   : > { %v7091_v25 = vcombine.high %v5607_v30, %v5607_v30  ;;  %v7090_v19 = vcombine.low %v5607_v30, %v5607_v30  ;;  %v7764_v30 = vld [vmem:[%s10694_s9 + $0x24] ss:$8 sps:$4 sm:$0xff]  }
 0xf07   : > { %v5267_v31 = vmax.f32 %v5263_v17, 0.0  ;;  %v5273_v39 = vpack.c.bf16 %v5266_v43, %v5264_v16  ;;  %v11187_v17 = vld [vmem:[#allocation5_spill] sm:$0xff] }
 0xf08   : > { %v5617_v27 = vsel %vm4454_vm3, %v7090_v19, 0  ;;  %v11188_v43 = vld [vmem:[#allocation13_spill] sm:$0xff] }
 0xf09   : > { %v5274_v11 = vpack.c.bf16 %v5267_v31, %v5265_v28  ;;  %v993_v28 = vadd.f32 %v11188_v43, %v11187_v17  ;;  %v7766_v19 = vld [vmem:[%s10694_s9 + $0x14] ss:$8 sps:$4 sm:$0xff]   ;;  %v7771_v43 = vld [vmem:[%s10694_s9 + $0xf0] ss:$8 sps:$4 sm:$0xff]  }
 0xf0a   : > { %v7770_v17 = vld [vmem:[%s10694_s9 + $0xf4] ss:$8 sps:$4 sm:$0xff]  }
 0xf0b   : > { %5305 = vmatprep.subr.bf16.mxu0 %v5274_v11  ;;  %v11189_v11 = vld [vmem:[#allocation23_spill] sm:$0xff] }
 0xf0c   : > { %5306 = vmatpush1.bf16.msra.mxu0 %v5273_v39  ;;  %v3010_v39 = vadd.f32 %v11189_v11, %v993_v28  ;;  %v7772_v28 = vld [vmem:[%s10694_s9 + $0xe4] ss:$8 sps:$4 sm:$0xff]   ;;  %v7774_v11 = vld [vmem:[%s10694_s9 + $0xd4] ss:$8 sps:$4 sm:$0xff]  }
 0xf0d   : > { %7264 = vmatprep.subr.bf16.mxu0 %v10988_v37 }
 0xf0f   : > { %7064 = vmatmul.mubr.msk.bf16.vlgmr.msra.gmra.mxu0 %vm778_vm0, %v7610_v13 }
 0xf10   : > { %5333 = vmatprep.mubr.bf16.mxu0 %v10916_v2 }
 0xf17   : > { %7065 = vmatmul.mubr.msk.bf16.gmra.mxu0 %vm778_vm0, %v7611_v50 }
 0xf18   : > { %7266 = vmatprep.mubr.msk.bf16.mxu0 %vm7788_vm1, %v10988_v37  ;;  %v7612_v37 = vld [vmem:[%s10697_s12 + $0x20] sm:$0xff]  }
 0xf1a   : > { %v7238_v34 = vpop.f32.mrf.mxu1 }
 0xf1c   : > { %v7239_v41 = vpop.f32.mrf.mxu1 }
 0xf1d   : > { %v7240_v14 = vadd.f32 %v7239_v41, %v7238_v34  ;;  %v4184_v34 = vadd.f32 %v9789_v10, %v3010_v39  ;;  %v7775_v39 = vld [vmem:[%s10694_s9 + $0xd0] ss:$8 sps:$4 sm:$0xff]  }
 0xf1e   : > { %v7241_v61 = vpop.f32.mrf.mxu1 }
 0xf1f   : > { %v5534_v23 = vmul.f32 %v7240_v14, %v5527_v40 }
 0xf20   : > { %v7242_v8 = vpop.f32.mrf.mxu1 }
 0xf21   : > { %v7243_v55 = vadd.f32 %v7242_v8, %v7241_v61  ;;  %v5549_v21 = vadd.f32 %v5542_v18, %v5534_v23 }
 0xf23   : > { %v5535_v20 = vmul.f32 %v7243_v55, %v5532_v45  ;;  %v5551_v3 = vmax.f32 %v5549_v21, 0.0 }
 0xf25   : > { %v5550_v38 = vadd.f32 %v5547_v36, %v5535_v20 }
 0xf27   : > { %v5552_v47 = vmax.f32 %v5550_v38, 0.0  ;;  %v7759_v38 = vld [vmem:[%s10694_s9 + $0x50] ss:$8 sps:$4 sm:$0xff]  }
 0xf29   : > { %v5556_v63 = vpack.c.bf16 %v5552_v47, %v5551_v3  ;;  %v7760_v3 = vld [vmem:[%s10694_s9 + $0x44] ss:$8 sps:$4 sm:$0xff]   ;;  %v7761_v47 = vld [vmem:[%s10694_s9 + $0x40] ss:$8 sps:$4 sm:$0xff]  }
 0xf2b   : > { %7265 = vmatpush3.bf16.msra.mxu0 %v5556_v63  ;;  %v7762_v63 = vld [vmem:[%s10694_s9 + $0x34] ss:$8 sps:$4 sm:$0xff]  }
 0xf2c   : > { %7092 = vmatprep.subr.msk.bf16.mxu0 %vm4454_vm3, %v7091_v25  ;;  %v7765_v25 = vld [vmem:[%s10694_s9 + $0x20] ss:$8 sps:$4 sm:$0xff]  }
 0xf2e   : > { %7267 = vmatmul.mubr.msk.bf16.vlgmr.msra.gmra.mxu0 %vm778_vm0, %v7612_v37  ;;  %v7763_v37 = vld [vmem:[%s10694_s9 + $0x30] ss:$8 sps:$4 sm:$0xff]  }
 0xf2f   : > { %5654 = vmatprep.mubr.bf16.mxu0 %v10916_v2  ;;  %5637 = vmatpush1.bf16.msra.mxu0 %v5617_v27  ;;  %v7767_v27 = vld [vmem:[%s10694_s9 + $0x10] ss:$8 sps:$4 sm:$0xff]  }
 0xf30   : > { %5705 = vmatprep.subr.bf16.mxu0 %v7754_v58  ;;  %v7768_v58 = vld [vmem:[%s10694_s9 + $0x4] ss:$8 sps:$4 sm:$0xff]  }
 0xfcf   : > { %v5325_v62 = vpop.f32.mrf.mxu0 }
 0xfd0   : > { %v10445_v31 = vadd.f32 %v5325_v62, %v9781_v15  ;;  %v7769_v62 = vld [vmem:[%s10694_s9] ss:$8 sps:$4 sm:$0xff]  }
 0xfd1   : > { %v5327_v16 = vpop.f32.mrf.mxu0 }
 0xfd2   : > { %v10449_v13 = vadd.f32 %v5327_v16, %v9784_v49  ;;  %v7773_v16 = vld [vmem:[%s10694_s9 + $0xe0] ss:$8 sps:$4 sm:$0xff]  }
 0xfd3   : > { %v5329_v50 = vpop.f32.mrf.mxu0 }
 0xfd4   : > { %v10453_v40 = vadd.f32 %v5329_v50, %v9787_v1  ;;  %v7776_v50 = vld [vmem:[%s10694_s9 + $0xc4] ss:$8 sps:$4 sm:$0xff]  }
 0xfd5   : > { %v5331_v41 = vpop.f32.mrf.mxu0 }
 0xfd6   : > { %v10455_v14 = vadd.f32 %v5331_v41, %v4184_v34  ;;  %v7777_v34 = vld [vmem:[%s10694_s9 + $0xc0] ss:$8 sps:$4 sm:$0xff]  }
 0xfd7   : > { %v5335_v45 = vpop.f32.mrf.mxu0 }
 0xfd8   : > { %v10458_v61 = vadd.f32 %v5335_v45, %v9792_v53  ;;  %v7755_v53 = vld [vmem:[%s10694_s9 + $0x70] ss:$8 sps:$4 sm:$0xff]   ;;  %v5676_v45 = vpop.permute.xlu1 %5675 }
 0xfd9   : > { %v5337_v15 = vpop.f32.mrf.mxu0 }
 0xfda   : > { %v10461_v23 = vadd.f32 %v5337_v15, %v9797_v12  ;;  %v7756_v12 = vld [vmem:[%s10694_s9 + $0x64] ss:$8 sps:$4 sm:$0xff]   ;;  %v5671_v15 = vpop.permute.xlu0 %5670 }
 0xfdb   : > { %v5339_v8 = vpop.f32.mrf.mxu0 }
 0xfdc   : > { %v10464_v49 = vadd.f32 %v5339_v8, %v9801_v56  ;;  %v7757_v56 = vld [vmem:[%s10694_s9 + $0x60] ss:$8 sps:$4 sm:$0xff]  }
 0xfdd   : > { %v5341_v55 = vpop.f32.mrf.mxu0 }
 0xfde   : > { %v10467_v10 = vadd.f32 %v5341_v55, %v9803_v48  ;;  %v7758_v48 = vld [vmem:[%s10694_s9 + $0x54] ss:$8 sps:$4 sm:$0xff]  }
 0xfee   : > { %v5599_v1 = vpop.f32.mrf.mxu0 }
 0xff0   : > { %v7268_v18 = vpop.f32.mrf.mxu0 }
 0xff2   : > { %v5602_v21 = vpop.f32.mrf.mxu0 }
 0xff3   : > { %v5606_v20 = vpack.c.bf16 %v5602_v21, %v5599_v1  ;;  %v5688_v21 = vpop.permute.xlu0 %5687 }
 0xff4   : > { %v7269_v36 = vpop.f32.mrf.mxu0 }
 0xff5   : > { %7093 = vmatmul.mubr.msk.bf16.vlgmr.msra.gmra.mxu0 %vm4450_vm4, %v5606_v20 }
 0xff6   : > { %5706 = vmatpush1.bf16.msra.mxu0 %v7755_v53 }
 0xff7   : > { %5707 = vmatprep.subr.bf16.mxu0 %v7756_v12 }
 0xffa   : > { %5708 = vmatpush1.bf16.msra.mxu0 %v7757_v56 }
 0xffb   : > { %5709 = vmatprep.subr.bf16.mxu0 %v7758_v48 }
 0xffe   : > { %5710 = vmatpush1.bf16.msra.mxu0 %v7759_v38 }
 0xfff   : > { %5711 = vmatprep.subr.bf16.mxu0 %v7760_v3 }
0x1002   : > { %5712 = vmatpush1.bf16.msra.mxu0 %v7761_v47 }
0x1003   : > { %5713 = vmatprep.subr.bf16.mxu0 %v7762_v63 }
0x1006   : > { %5714 = vmatpush1.bf16.msra.mxu0 %v7763_v37 }
0x1007   : > { %5715 = vmatprep.subr.bf16.mxu0 %v7764_v30 }
0x100a   : > { %5716 = vmatpush1.bf16.msra.mxu0 %v7765_v25 }
0x100b   : > { %5717 = vmatprep.subr.bf16.mxu0 %v7766_v19 }
0x100e   : > { %5718 = vmatpush1.bf16.msra.mxu0 %v7767_v27 }
0x100f   : > { %5719 = vmatprep.subr.bf16.mxu0 %v7768_v58 }
0x1012   : > { %5720 = vmatpush1.bf16.msra.mxu0 %v7769_v62 }
0x1013   : > { %5721 = vmatprep.subr.bf16.mxu0 %v7770_v17 }
0x1016   : > { %5722 = vmatpush2.bf16.msra.mxu0 %v7771_v43 }
0x1017   : > { %5723 = vmatprep.subr.bf16.mxu0 %v7772_v28  ;;  %v7616_v28 = vld [vmem:[%s10700_s15 + $0xd8] sm:$0xff]  }
0x101a   : > { %5724 = vmatpush2.bf16.msra.mxu0 %v7773_v16  ;;  %v7617_v16 = vld [vmem:[%s10700_s15 + $0xe8] sm:$0xff]  }
0x101b   : > { %5725 = vmatprep.subr.bf16.mxu0 %v7774_v11  ;;  %v7618_v11 = vld [vmem:[%s10700_s15 + $0xf8] sm:$0xff]  }
0x101e   : > { %5726 = vmatpush2.bf16.msra.mxu0 %v7775_v39  ;;  %v7619_v39 = vld [vmem:[%s10700_s15 + $0xf0] sm:$0xff]  }
0x101f   : > { %5727 = vmatprep.subr.bf16.mxu0 %v7776_v50  ;;  %v7620_v50 = vld [vmem:[%s10700_s15 + $0x100] sm:$0xff]  }
0x1022   : > { %5728 = vmatpush2.bf16.msra.mxu0 %v7777_v34  ;;  %v7621_v34 = vld [vmem:[%s10700_s15 + $0x110] sm:$0xff]  }
0x1023   : > { %5729 = vmatprep.subr.bf16.mxu0 %v9832_v29 }
0x1026   : > { %5730 = vmatpush2.bf16.msra.mxu0 %v9838_v33 }
0x1027   : > { %5731 = vmatprep.subr.bf16.mxu0 %v9844_v35 }
0x102a   : > { %5732 = vmatpush2.bf16.msra.mxu0 %v9850_v51 }
0x102b   : > { %5733 = vmatprep.subr.bf16.mxu0 %v9856_v26 }
0x102e   : > { %5734 = vmatpush2.bf16.msra.mxu0 %v9862_v42 }
0x102f   : > { %5735 = vmatprep.subr.bf16.mxu0 %v9868_v46  ;;  %v5693_v46 = vpop.permute.xlu1 %5692 }
0x1032   : > { %5736 = vmatpush2.bf16.msra.mxu0 %v9874_v22 }
0x10b5   : > { %v5656_v41 = vpop.f32.mrf.mxu0 }
0x10b6   : > { %v5657_v8 = vadd.f32 %v5656_v41, %v10403_v44  ;;  %v7622_v41 = vld [vmem:[%s10700_s15 + $0x108] sm:$0xff]  }
0x10b7   : > { %v5658_v29 = vpop.f32.mrf.mxu0 }
0x10b8   : > { %v5659_v33 = vadd.f32 %v5658_v29, %v10406_v32  ;;  %v5678_v1 = vmul.f32 %v5671_v15, %v5657_v8  ;;  %v11201_v8 = vld [vmem:[#allocation37_spill] sm:$0xff]  ;;  %v11202_v29 = vld [vmem:[#allocation38_spill] sm:$0xff] }
0x10b9   : > { %v5660_v55 = vpop.f32.mrf.mxu0 }
0x10ba   : > { %v5679_v35 = vmul.f32 %v5671_v15, %v5659_v33  ;;  %v5661_v51 = vadd.f32 %v5660_v55, %v10410_v52  ;;  %v5695_v53 = vadd.f32 %v5688_v21, %v5678_v1  ;;  %v7615_v52 = vld [vmem:[%s10700_s15 + $0xe0] sm:$0xff]   ;;  %v11203_v33 = vld [vmem:[#allocation56_spill] sm:$0xff] }
0x10bb   : > { %v5662_v26 = vpop.f32.mrf.mxu0  ;;  %v11192_v15 = vld [vmem:[#allocation46_spill] sm:$0xff]  ;;  %v11207_v1 = vld [vmem:[#allocation60_spill] sm:$0xff] }
0x10bc   : > { %v5680_v18 = vmul.f32 %v5676_v45, %v5661_v51  ;;  %v5663_v42 = vadd.f32 %v5662_v26, %v10414_v24  ;;  %v5696_v22 = vadd.f32 %v5688_v21, %v5679_v35  ;;  %v5699_v32 = vmax.f32 %v5695_v53, 0.0  ;;  %v11204_v55 = vld [vmem:[#allocation58_spill] sm:$0xff]  ;;  %v11205_v35 = vld [vmem:[#allocation39_spill] sm:$0xff]  ;;  %v11206_v51 = vld [vmem:[#allocation41_spill] sm:$0xff] }
0x10bd   : > { %v11208_v26 = vld [vmem:[#allocation62_spill] sm:$0xff] }
0x10be   : > { %v5697_v20 = vadd.f32 %v5693_v46, %v5680_v18  ;;  %v5681_v36 = vmul.f32 %v5676_v45, %v5663_v42  ;;  %v5700_v56 = vmax.f32 %v5696_v22, 0.0  ;;  %v7623_v45 = vld [vmem:[%s10700_s15 + $0x118] sm:$0xff]   ;;  %v11209_v18 = vld [vmem:[#allocation42_spill] sm:$0xff]  ;;  %v11210_v42 = vld [vmem:[#allocation43_spill] sm:$0xff] }
0x10bf   : > { %v11212_v21 = vld [vmem:[#allocation66_spill] sm:$0xff]  ;;  %v11213_v22 = vld [vmem:[#allocation45_spill] sm:$0xff] }
0x10c0   : > { %v5698_v12 = vadd.f32 %v5693_v46, %v5681_v36  ;;  %v5701_v44 = vmax.f32 %v5697_v20, 0.0  ;;  %v11211_v46 = vld [vmem:[#allocation64_spill] sm:$0xff]  ;;  %v11214_v20 = vld [vmem:[#allocation47_spill] sm:$0xff]  ;;  %v11216_v53 = vld [vmem:[#allocation70_spill] sm:$0xff] }
0x10c1   : > { %v11215_v36 = vld [vmem:[#allocation68_spill] sm:$0xff] }
0x10c2   : > { %v5702_v48 = vmax.f32 %v5698_v12, 0.0  ;;  %v5703_v3 = vpack.c.bf16 %v5701_v44, %v5699_v32  ;;  %v11217_v12 = vld [vmem:[#allocation49_spill] sm:$0xff]  ;;  %v11218_v44 = vld [vmem:[#allocation51_spill] sm:$0xff] }
0x10c3   : > { %v11221_v32 = vld [vmem:[#allocation53_spill] sm:$0xff] }
0x10c4   : > { %v5704_v38 = vpack.c.bf16 %v5702_v48, %v5700_v56  ;;  %v11219_v56 = vld [vmem:[#allocation72_spill] sm:$0xff]  ;;  %v11220_v48 = vld [vmem:[#allocation74_spill] sm:$0xff] }
0x10c6   : > { %5737 = vmatprep.mubr.bf16.mxu0 %v5704_v38  ;;  %5782 = vmatprep.mubr.bf16.mxu1 %v5704_v38 }
0x10c7   : > { %5823 = vmatprep.subr.bf16.mxu0 %v5704_v38  ;;  %5738 = vmatmul.mubr.bf16.vlgmr.msra.gmra.mxu0 %v5703_v3 }
0x10c8   : > { %5783 = vmatmul.mubr.bf16.vlgmr.msra.gmra.mxu1 %v5703_v3  ;;  %5824 = vmatpush1.bf16.msra.mxu0 %v5703_v3 }
0x10c9   : > { %5841 = vmatprep.mubr.bf16.mxu0 %v10916_v2  ;;  %5892 = vmatprep.mubr.bf16.mxu1 %v10916_v2 }
0x10cf   : > { %7103 = vmatmul.mubr.msk.bf16.vlgmr.msra.gmra.mxu0 %vm778_vm0, %v7615_v52  ;;  %v11224_v52 = vld [vmem:[#allocation78_spill] sm:$0xff] }
0x10d0   : > { %5946 = vmatprep.mubr.bf16.mxu0 %v10916_v2 }
0x1187   : > { %v5739_v24 = vpop.f32.mrf.mxu0 }
0x1188   : > { %v5784_v47 = vpop.f32.mrf.mxu1 }
0x1189   : > { %v5741_v63 = vpop.f32.mrf.mxu0 }
0x118a   : > { %v5786_v37 = vpop.f32.mrf.mxu1 }
0x118b   : > { %v5743_v30 = vpop.f32.mrf.mxu0 }
0x118c   : > { %v5788_v25 = vpop.f32.mrf.mxu1  ;;  %v5748_v62 = vpack.c.bf16 %v5743_v30, %v5739_v24  ;;  %v11225_v24 = vld [vmem:[#allocation57_spill] sm:$0xff] }
0x118d   : > { %v5745_v19 = vpop.f32.mrf.mxu0  ;;  %v5793_v43 = vpack.c.bf16 %v5788_v25, %v5784_v47  ;;  %v11226_v47 = vld [vmem:[#allocation59_spill] sm:$0xff]  ;;  %v11229_v30 = vld [vmem:[#allocation61_spill] sm:$0xff] }
0x118e   : > { %v5749_v27 = vpack.c.bf16 %v5745_v19, %v5741_v63  ;;  %v5790_v58 = vpop.f32.mrf.mxu1  ;;  %v11227_v63 = vld [vmem:[#allocation80_spill] sm:$0xff]  ;;  %v11230_v25 = vld [vmem:[#allocation63_spill] sm:$0xff] }
0x118f   : > { %v5794_v17 = vpack.c.bf16 %v5790_v58, %v5786_v37  ;;  %v11228_v37 = vld [vmem:[#allocation82_spill] sm:$0xff]  ;;  %v11231_v19 = vld [vmem:[#allocation83_spill] sm:$0xff]  ;;  %v11233_v58 = vld [vmem:[#allocation65_spill] sm:$0xff] }
0x1190   : > { %5874 = vmatprep.subr.bf16.mxu1 %v5749_v27 }
0x1191   : > { %5928 = vmatprep.subr.bf16.mxu0 %v5794_v17  ;;  %5875 = vmatpush1.bf16.msra.mxu1 %v5748_v62 }
0x1192   : > { %5929 = vmatpush1.bf16.msra.mxu0 %v5793_v43  ;;  %5989 = vmatprep.subr.bf16.mxu1 %v5704_v38 }
0x1193   : > { %6040 = vmatprep.subr.bf16.mxu0 %v5749_v27 }
0x1194   : > { %7105 = vmatmul.mubr.msk.bf16.vlgmr.msra.gmra.mxu1 %vm778_vm0, %v7616_v28  ;;  %v11237_v28 = vld [vmem:[#allocation69_spill] sm:$0xff] }
0x1195   : > { %7109 = vmatmul.mubr.msk.bf16.vlgmr.msra.gmra.mxu0 %vm778_vm0, %v7617_v16  ;;  %5990 = vmatpush1.bf16.msra.mxu1 %v5703_v3  ;;  %v11238_v16 = vld [vmem:[#allocation71_spill] sm:$0xff] }
0x1196   : > { %6041 = vmatpush1.bf16.msra.mxu0 %v5748_v62  ;;  %6094 = vmatprep.subr.bf16.mxu1 %v5794_v17 }
0x1197   : > { %6155 = vmatprep.subr.bf16.mxu0 %v5704_v38  ;;  %6007 = vmatprep.mubr.bf16.mxu1 %v10916_v2  ;;  %v11222_v38 = vld [vmem:[#allocation55_spill] sm:$0xff] }
0x1198   : > { %6058 = vmatprep.mubr.bf16.mxu0 %v10916_v2 }
0x119c   : > { %7115 = vmatmul.mubr.msk.bf16.vlgmr.msra.gmra.mxu1 %vm778_vm0, %v7618_v11  ;;  %v11239_v11 = vld [vmem:[#allocation87_spill] sm:$0xff] }
0x119d   : > { %7117 = vmatmul.mubr.msk.bf16.vlgmr.msra.gmra.mxu0 %vm778_vm0, %v7619_v39  ;;  %6095 = vmatpush1.bf16.msra.mxu1 %v5793_v43  ;;  %v11240_v39 = vld [vmem:[#allocation88_spill] sm:$0xff] }
0x119e   : > { %6156 = vmatpush1.bf16.msra.mxu0 %v5703_v3  ;;  %6206 = vmatprep.subr.bf16.mxu1 %v5749_v27  ;;  %v11223_v3 = vld [vmem:[#allocation76_spill] sm:$0xff] }
0x119f   : > { %6260 = vmatprep.subr.bf16.mxu0 %v5794_v17  ;;  %6112 = vmatprep.mubr.bf16.mxu1 %v10916_v2  ;;  %v11232_v27 = vld [vmem:[#allocation84_spill] sm:$0xff]  ;;  %v11235_v17 = vld [vmem:[#allocation85_spill] sm:$0xff] }
0x11a0   : > { %6173 = vmatprep.mubr.bf16.mxu0 %v10916_v2 }
0x11a4   : > { %7121 = vmatmul.mubr.msk.bf16.vlgmr.msra.gmra.mxu1 %vm778_vm0, %v7620_v50  ;;  %v11241_v50 = vld [vmem:[#allocation73_spill] sm:$0xff] }
0x11a5   : > { %7127 = vmatmul.mubr.msk.bf16.vlgmr.msra.gmra.mxu0 %vm778_vm0, %v7621_v34  ;;  %6207 = vmatpush1.bf16.msra.mxu1 %v5748_v62  ;;  %v11234_v62 = vld [vmem:[#allocation67_spill] sm:$0xff] }
0x11a6   : > { %6261 = vmatpush1.bf16.msra.mxu0 %v5793_v43  ;;  %6224 = vmatprep.mubr.bf16.mxu1 %v10916_v2  ;;  %v11236_v43 = vld [vmem:[#allocation86_spill] sm:$0xff]  ;;  %v11242_v34 = vld [vmem:[#allocation75_spill] sm:$0xff] }
0x11a7   : > { %6278 = vmatprep.mubr.bf16.mxu0 %v10916_v2  ;;  %6295 = vmatprep.subr.bf16.mxu1 %v9921_v54  ;;  %v11190_v54 = vld [vmem:[#allocation32_spill] sm:$0xff] }
0x11a8   : > { %6344 = vmatprep.subr.bf16.mxu0 %v9930_v9  ;;  %v11191_v9 = vld [vmem:[#allocation44_spill] sm:$0xff] }
0x11ac   : > { %7129 = vmatmul.mubr.msk.bf16.vlgmr.msra.gmra.mxu1 %vm778_vm0, %v7622_v41  ;;  %v11243_v41 = vld [vmem:[#allocation89_spill] sm:$0xff] }
0x11ad   : > { %7133 = vmatmul.mubr.msk.bf16.vlgmr.msra.gmra.mxu0 %vm778_vm0, %v7623_v45  ;;  %6296 = vmatpush1.bf16.msra.mxu1 %v9941_v57  ;;  %v11193_v57 = vld [vmem:[#allocation33_spill] sm:$0xff]  ;;  %v5843_v45 = vpop.f32.mrf.mxu0 }
0x11ae   : > { %6297 = vmatprep.subr.bf16.mxu1 %v9947_v59  ;;  %6345 = vmatpush1.bf16.msra.mxu0 %v9953_v60  ;;  %v11194_v59 = vld [vmem:[#allocation34_spill] sm:$0xff]  ;;  %v11195_v60 = vld [vmem:[#allocation48_spill] sm:$0xff] }
0x11af   : > { %6346 = vmatprep.subr.bf16.mxu0 %v9959_v0  ;;  %v11196_v0 = vld [vmem:[#allocation50_spill] sm:$0xff] }
0x11b1   : > { %6298 = vmatpush1.bf16.msra.mxu1 %v9965_v4  ;;  %v11197_v4 = vld [vmem:[#allocation35_spill] sm:$0xff] }
0x11b2   : > { %6299 = vmatprep.subr.bf16.mxu1 %v9971_v5  ;;  %6347 = vmatpush1.bf16.msra.mxu0 %v9977_v6  ;;  %v11198_v5 = vld [vmem:[#allocation36_spill] sm:$0xff] }
0x11b3   : > { %6348 = vmatprep.subr.bf16.mxu0 %v9983_v7  ;;  %v11199_v6 = vld [vmem:[#allocation52_spill] sm:$0xff]  ;;  %v11200_v7 = vld [vmem:[#allocation54_spill] sm:$0xff] }
0x11b5   : > { %6300 = vmatpush1.bf16.msra.mxu1 %v11190_v54  ;;  %v5845_v54 = vpop.f32.mrf.mxu0 }
0x11b6   : > { %6301 = vmatprep.subr.bf16.mxu1 %v11191_v9  ;;  %6349 = vmatpush1.bf16.msra.mxu0 %v11192_v15 }
0x11b7   : > { %6350 = vmatprep.subr.bf16.mxu0 %v11193_v57  ;;  %v5847_v9 = vpop.f32.mrf.mxu0 }
0x11b9   : > { %6302 = vmatpush1.bf16.msra.mxu1 %v11194_v59  ;;  %v5849_v15 = vpop.f32.mrf.mxu0 }
0x11ba   : > { %6303 = vmatprep.subr.bf16.mxu1 %v11195_v60  ;;  %6351 = vmatpush1.bf16.msra.mxu0 %v11196_v0 }
0x11bb   : > { %6352 = vmatprep.subr.bf16.mxu0 %v11197_v4 }
0x11bd   : > { %6304 = vmatpush1.bf16.msra.mxu1 %v11198_v5 }
0x11be   : > { %6305 = vmatprep.subr.bf16.mxu1 %v11199_v6  ;;  %6353 = vmatpush1.bf16.msra.mxu0 %v11200_v7 }
0x11bf   : > { %6354 = vmatprep.subr.bf16.mxu0 %v11201_v8 }
0x11c1   : > { %6306 = vmatpush1.bf16.msra.mxu1 %v11202_v29 }
0x11c2   : > { %6307 = vmatprep.subr.bf16.mxu1 %v11203_v33  ;;  %6355 = vmatpush1.bf16.msra.mxu0 %v11204_v55 }
0x11c3   : > { %6356 = vmatprep.subr.bf16.mxu0 %v11205_v35 }
0x11c5   : > { %6308 = vmatpush1.bf16.msra.mxu1 %v11206_v51 }
0x11c6   : > { %6309 = vmatprep.subr.bf16.mxu1 %v11207_v1  ;;  %6357 = vmatpush1.bf16.msra.mxu0 %v11208_v26 }
0x11c7   : > { %6358 = vmatprep.subr.bf16.mxu0 %v11209_v18 }
0x11c9   : > { %6310 = vmatpush1.bf16.msra.mxu1 %v11210_v42 }
0x11ca   : > { %6311 = vmatprep.subr.bf16.mxu1 %v11211_v46  ;;  %6359 = vmatpush1.bf16.msra.mxu0 %v11212_v21 }
0x11cb   : > { %6360 = vmatprep.subr.bf16.mxu0 %v11213_v22 }
0x11cd   : > { %6312 = vmatpush2.bf16.msra.mxu1 %v11214_v20 }
0x11ce   : > { %6313 = vmatprep.subr.bf16.mxu1 %v11215_v36  ;;  %6361 = vmatpush2.bf16.msra.mxu0 %v11216_v53 }
0x11cf   : > { %6362 = vmatprep.subr.bf16.mxu0 %v11217_v12 }
0x11d1   : > { %6314 = vmatpush2.bf16.msra.mxu1 %v11218_v44 }
0x11d2   : > { %6315 = vmatprep.subr.bf16.mxu1 %v11219_v56  ;;  %6363 = vmatpush2.bf16.msra.mxu0 %v11220_v48 }
0x11d3   : > { %6364 = vmatprep.subr.bf16.mxu0 %v11221_v32 }
0x11d5   : > { %6316 = vmatpush2.bf16.msra.mxu1 %v11222_v38 }
0x11d6   : > { %6317 = vmatprep.subr.bf16.mxu1 %v11223_v3  ;;  %6365 = vmatpush2.bf16.msra.mxu0 %v11224_v52 }
0x11d7   : > { %6366 = vmatprep.subr.bf16.mxu0 %v11225_v24 }
0x11d9   : > { %6318 = vmatpush2.bf16.msra.mxu1 %v11226_v47 }
0x11da   : > { %6319 = vmatprep.subr.bf16.mxu1 %v11227_v63  ;;  %6367 = vmatpush2.bf16.msra.mxu0 %v11228_v37 }
0x11db   : > { %6368 = vmatprep.subr.bf16.mxu0 %v11229_v30 }
0x11dd   : > { %6320 = vmatpush2.bf16.msra.mxu1 %v11230_v25 }
0x11de   : > { %6321 = vmatprep.subr.bf16.mxu1 %v11231_v19  ;;  %6369 = vmatpush2.bf16.msra.mxu0 %v11232_v27 }
0x11df   : > { %6370 = vmatprep.subr.bf16.mxu0 %v11233_v58 }
0x11e1   : > { %6322 = vmatpush2.bf16.msra.mxu1 %v11234_v62 }
0x11e2   : > { %6323 = vmatprep.subr.bf16.mxu1 %v11235_v17  ;;  %6371 = vmatpush2.bf16.msra.mxu0 %v11236_v43 }
0x11e3   : > { %6372 = vmatprep.subr.bf16.mxu0 %v11237_v28 }
0x11e5   : > { %6324 = vmatpush2.bf16.msra.mxu1 %v11238_v16 }
0x11e6   : > { %6325 = vmatprep.subr.bf16.mxu1 %v11239_v11  ;;  %6373 = vmatpush2.bf16.msra.mxu0 %v11240_v39 }
0x11e7   : > { %6374 = vmatprep.subr.bf16.mxu0 %v11241_v50 }
0x11e9   : > { %6326 = vmatpush2.bf16.msra.mxu1 %v11242_v34 }
0x11ea   : > { %6375 = vmatpush2.bf16.msra.mxu0 %v11243_v41 }
0x1254   : > { %v5894_v57 = vpop.f32.mrf.mxu1 }
0x1255   : > { %v5948_v59 = vpop.f32.mrf.mxu0  ;;  %v5895_v8 = vadd.f32 %v5894_v57, %v5843_v45 }
0x1256   : > { %v5896_v60 = vpop.f32.mrf.mxu1 }
0x1257   : > { %v5950_v0 = vpop.f32.mrf.mxu0  ;;  %v5897_v5 = vadd.f32 %v5896_v60, %v5845_v54  ;;  %v5957_v42 = vadd.f32 %v5948_v59, %v5895_v8 }
0x1258   : > { %v5898_v4 = vpop.f32.mrf.mxu1 }
0x1259   : > { %v5899_v6 = vadd.f32 %v5898_v4, %v5847_v9  ;;  %v5952_v7 = vpop.f32.mrf.mxu0  ;;  %v5958_v1 = vadd.f32 %v5950_v0, %v5897_v5 }
0x125a   : > { %v5900_v29 = vpop.f32.mrf.mxu1 }
0x125b   : > { %v5901_v33 = vadd.f32 %v5900_v29, %v5849_v15  ;;  %v5954_v55 = vpop.f32.mrf.mxu0  ;;  %v5959_v35 = vadd.f32 %v5952_v7, %v5899_v6  ;;  %v6397_v29 = vpop.permute.xlu0 %6396 }
0x125c   : > { %v6009_v51 = vpop.f32.mrf.mxu1 }
0x125d   : > { %v5960_v26 = vadd.f32 %v5954_v55, %v5901_v33  ;;  %v6060_v18 = vpop.f32.mrf.mxu0  ;;  %v6293_v36 = vpack.c.bf16 %v5959_v35, %v5957_v42  ;;  %v6402_v55 = vpop.permute.xlu1 %6401 }
0x125e   : > { %v6011_v46 = vpop.f32.mrf.mxu1  ;;  %v6061_v21 = vadd.f32 %v6060_v18, %v6009_v51 }
0x125f   : > { %v6294_v22 = vpack.c.bf16 %v5960_v26, %v5958_v1  ;;  %v6062_v20 = vpop.f32.mrf.mxu0 }
0x1260   : > { %v6013_v53 = vpop.f32.mrf.mxu1  ;;  %v6063_v12 = vadd.f32 %v6062_v20, %v6011_v46 }
0x1261   : > { %6327 = vmatprep.mubr.bf16.mxu1 %v6294_v22  ;;  %v6064_v44 = vpop.f32.mrf.mxu0 }
0x1262   : > { %v6015_v56 = vpop.f32.mrf.mxu1  ;;  %v6065_v48 = vadd.f32 %v6064_v44, %v6013_v53  ;;  %6328 = vmatmul.mubr.bf16.vlgmr.msra.gmra.mxu1 %v6293_v36  ;;  %v6414_v53 = vpop.permute.xlu0 %6413 }
0x1263   : > { %v6066_v32 = vpop.f32.mrf.mxu0  ;;  %6484 = vmatprep.mubr.bf16.mxu1 %v10916_v2 }
0x1264   : > { %v6067_v38 = vadd.f32 %v6066_v32, %v6015_v56  ;;  %v6114_v3 = vpop.f32.mrf.mxu1  ;;  %v6419_v32 = vpop.permute.xlu1 %6418 }
0x1265   : > { %v6123_v52 = vadd.f32 %v6114_v3, %v6061_v21  ;;  %v6175_v24 = vpop.f32.mrf.mxu0 }
0x1266   : > { %v6116_v47 = vpop.f32.mrf.mxu1 }
0x1267   : > { %v6124_v63 = vadd.f32 %v6116_v47, %v6063_v12  ;;  %v6177_v37 = vpop.f32.mrf.mxu0 }
0x1268   : > { %v6118_v30 = vpop.f32.mrf.mxu1 }
0x1269   : > { %v6125_v25 = vadd.f32 %v6118_v30, %v6065_v48  ;;  %v6179_v19 = vpop.f32.mrf.mxu0 }
0x126a   : > { %v6120_v27 = vpop.f32.mrf.mxu1 }
0x126b   : > { %v6126_v58 = vadd.f32 %v6120_v27, %v6067_v38  ;;  %v6181_v62 = vpop.f32.mrf.mxu0  ;;  %v7624_v27 = vld [vmem:[%s10703_s18 + $0x40] sm:$0xff]  }
0x126c   : > { %v6226_v17 = vpop.f32.mrf.mxu1 }
0x126d   : > { %v6280_v43 = vpop.f32.mrf.mxu0  ;;  %v6227_v41 = vadd.f32 %v6226_v17, %v6175_v24 }
0x126e   : > { %v6228_v28 = vpop.f32.mrf.mxu1 }
0x126f   : > { %v6282_v16 = vpop.f32.mrf.mxu0  ;;  %v6229_v39 = vadd.f32 %v6228_v28, %v6177_v37  ;;  %v6289_v60 = vadd.f32 %v6280_v43, %v6227_v41 }
0x1270   : > { %v6230_v11 = vpop.f32.mrf.mxu1 }
0x1271   : > { %v6231_v50 = vadd.f32 %v6230_v11, %v6179_v19  ;;  %v6284_v34 = vpop.f32.mrf.mxu0  ;;  %v6290_v57 = vadd.f32 %v6282_v16, %v6229_v39 }
0x1272   : > { %v6232_v45 = vpop.f32.mrf.mxu1 }
0x1273   : > { %v6233_v54 = vadd.f32 %v6232_v45, %v6181_v62  ;;  %v6291_v9 = vadd.f32 %v6284_v34, %v6231_v50  ;;  %v6286_v15 = vpop.f32.mrf.mxu0 }
0x1275   : > { %v6292_v59 = vadd.f32 %v6286_v15, %v6233_v54  ;;  %v6342_v4 = vpack.c.bf16 %v6291_v9, %v6289_v60 }
0x1277   : > { %v6343_v0 = vpack.c.bf16 %v6292_v59, %v6290_v57 }
0x1279   : > { %6376 = vmatprep.mubr.bf16.mxu0 %v6343_v0 }
0x127a   : > { %6377 = vmatmul.mubr.bf16.vlgmr.msra.gmra.mxu0 %v6342_v4 }
0x1322   : > { %v6329_v5 = vpop.f32.mrf.mxu1 }
0x1323   : > { %v6338_v8 = vadd.f32 %v6329_v5, %v6123_v52 }
0x1324   : > { %v6331_v6 = vpop.f32.mrf.mxu1 }
0x1325   : > { %v6339_v35 = vadd.f32 %v6331_v6, %v6124_v63 }
0x1326   : > { %v6333_v7 = vpop.f32.mrf.mxu1 }
0x1327   : > { %v6340_v18 = vadd.f32 %v6333_v7, %v6125_v25 }
0x1328   : > { %v6335_v1 = vpop.f32.mrf.mxu1 }
0x1329   : > { %v6341_v22 = vadd.f32 %v6335_v1, %v6126_v58  ;;  %v7625_v58 = vld [vmem:[%s10703_s18 + $0x48] sm:$0xff]  }
0x133a   : > { %v6378_v33 = vpop.f32.mrf.mxu0 }
0x133b   : > { %v6387_v51 = vadd.f32 %v6378_v33, %v6338_v8 }
0x133c   : > { %v6380_v26 = vpop.f32.mrf.mxu0 }
0x133d   : > { %v6404_v42 = vmul.f32 %v6397_v29, %v6387_v51  ;;  %v6388_v46 = vadd.f32 %v6380_v26, %v6339_v35 }
0x133e   : > { %v6382_v21 = vpop.f32.mrf.mxu0 }
0x133f   : > { %v6405_v20 = vmul.f32 %v6397_v29, %v6388_v46  ;;  %v6389_v36 = vadd.f32 %v6382_v21, %v6340_v18  ;;  %v6421_v44 = vadd.f32 %v6414_v53, %v6404_v42 }
0x1340   : > { %v6384_v12 = vpop.f32.mrf.mxu0 }
0x1341   : > { %v6406_v56 = vmul.f32 %v6402_v55, %v6389_v36  ;;  %v6390_v48 = vadd.f32 %v6384_v12, %v6341_v22  ;;  %v6422_v38 = vadd.f32 %v6414_v53, %v6405_v20  ;;  %v6425_v24 = vmax.f32 %v6421_v44, 0.0 }
0x1343   : > { %v6423_v3 = vadd.f32 %v6419_v32, %v6406_v56  ;;  %v6407_v52 = vmul.f32 %v6402_v55, %v6390_v48  ;;  %v6426_v37 = vmax.f32 %v6422_v38, 0.0 }
0x1345   : > { %v6427_v47 = vmax.f32 %v6423_v3, 0.0  ;;  %v6424_v63 = vadd.f32 %v6419_v32, %v6407_v52 }
0x1347   : > { %v6434_v30 = vpack.c.bf16 %v6427_v47, %v6425_v24  ;;  %v6428_v25 = vmax.f32 %v6424_v63, 0.0 }
0x1349   : > { %v6435_v19 = vpack.c.bf16 %v6428_v25, %v6426_v37 }
0x134b   : > { %6466 = vmatprep.subr.bf16.mxu1 %v6435_v19 }
0x134c   : > { %6467 = vmatpush1.bf16.msra.mxu1 %v6434_v30 }
0x134f   : > { %7144 = vmatmul.mubr.msk.bf16.vlgmr.msra.gmra.mxu1 %vm778_vm0, %v7624_v27 }
0x1350   : > { %6494 = vmatprep.mubr.bf16.mxu1 %v10916_v2 }
0x1357   : > { %7145 = vmatmul.mubr.msk.bf16.gmra.mxu1 %vm778_vm0, %v7625_v58 }
0x140f   : > { %v6486_v62 = vpop.f32.mrf.mxu1 }
0x1410   : > { %v6505_v17 = vadd.f32 %v6486_v62, %v10445_v31 }
0x1411   : > { %v6488_v43 = vpop.f32.mrf.mxu1 }
0x1412   : > { %6513 = vst [vmem:[%s683_s25] sm:$0xff] %v6505_v17  ;;  %v6506_v28 = vadd.f32 %v6488_v43, %v10449_v13 }
0x1413   : > { %v6490_v16 = vpop.f32.mrf.mxu1 }
0x1414   : > { %6514 = vst [vmem:[%s683_s25 + $0x8] sm:$0xff] %v6506_v28  ;;  %v6507_v2 = vadd.f32 %v6490_v16, %v10453_v40 }
0x1415   : > { %v6492_v11 = vpop.f32.mrf.mxu1 }
0x1416   : > { %6515 = vst [vmem:[%s683_s25 + $0x10] sm:$0xff] %v6507_v2  ;;  %v6508_v39 = vadd.f32 %v6492_v11, %v10455_v14 }
0x1417   : > { %v6496_v50 = vpop.f32.mrf.mxu1 }
0x1418   : > { %6516 = vst [vmem:[%s683_s25 + $0x18] sm:$0xff] %v6508_v39  ;;  %v6509_v34 = vadd.f32 %v6496_v50, %v10458_v61 }
0x1419   : > { %v6498_v41 = vpop.f32.mrf.mxu1 }
0x141a   : > { %6517 = vst [vmem:[%s683_s25 + $0x20] sm:$0xff] %v6509_v34  ;;  %v6510_v31 = vadd.f32 %v6498_v41, %v10461_v23 }
0x141b   : > { %v6500_v45 = vpop.f32.mrf.mxu1 }
0x141c   : > { %6518 = vst [vmem:[%s683_s25 + $0x28] sm:$0xff] %v6510_v31  ;;  %v6511_v13 = vadd.f32 %v6500_v45, %v10464_v49 }
0x141d   : > { %v6502_v54 = vpop.f32.mrf.mxu1 }
0x141e   : > { %6519 = vst [vmem:[%s683_s25 + $0x30] sm:$0xff] %v6511_v13  ;;  %v6512_v40 = vadd.f32 %v6502_v54, %v10467_v10 }
0x1420   : > { %6520 = vst [vmem:[%s683_s25 + $0x38] sm:$0xff] %v6512_v40 }
0x1421 PF: > { %s32_s3 = sadd.s32 1, %s7784_s3  }
0x1422   : > { %p29_p4 = scmp.ge.s32.totalorder %s32_s3, 4  }
0x1424   :  { %31 = sbr.rel (!%p29_p4) target bundleno = 8 (0x8), region = 206 }

</bundles_post_ra>
